<compile_context>
chip_gen: v5e
topology: v5e:2x2
jax: 0.10.0
libtpu: 0.0.40
codegen_flags: <defaults>
</compile_context>

<pallas_src>
import jax
import jax.numpy as jnp
from jax.experimental import pallas as pl
from jax.experimental.pallas import tpu as pltpu

_C = 4            # conv channels
_L = 250          # length of every stride-phase row inside the kernel
_SLOT = 256       # lane span reserved per staging slot (250 data + zero halo)
_BASE = 128       # lane-aligned base offset of slot 0
_NSLOT = 5        # 4 conv-channel slots + 1 input-phase slot
_SCR_W = 1536     # >= _BASE + _NSLOT*_SLOT + halo, multiple of 128


# ---------------------------------------------------------------------------
# Shift helpers: stage a (B, L) row into a pre-zeroed VMEM scratch at a
# per-slot offset; "prev"/"next" are then plain static-offset reads with a
# guaranteed zero halo column on either side (the conv's zero padding).
# ---------------------------------------------------------------------------
def _off(slot):
    return _BASE + _SLOT * slot


def _stage(scr, a, slot):
    scr[:, _off(slot):_off(slot) + a.shape[1]] = a


def _prev(scr, slot, l=_L):
    # out[:, m] = staged[:, m-1], zero at m=0
    return scr[:, _off(slot) - 1:_off(slot) - 1 + l]


def _next(scr, slot, l=_L):
    # out[:, m] = staged[:, m+1], zero at m=l-1
    return scr[:, _off(slot) + 1:_off(slot) + 1 + l]


def _fused_forward_kernel(
    xph_ref,                                   # (4, B, 250) input stride phases
    cw1_ref, cb1_ref,                          # (4, 3)  SMEM, (4,) SMEM
    cw2_ref, cb2_ref,                          # (4, 12) SMEM, (4,) SMEM
    cw3_ref, cb3_ref,                          # (4, 12) SMEM, (4,) SMEM
    w1r_ref, lb1_ref,                          # (4, 250, 512), (1, 512)
    w2t_ref, lb2_ref,                          # (512, 256),    (1, 256)
    w3t_ref, lb3_ref,                          # (256, 128),    (1, 128)
    w4t_ref, lb4_ref,                          # (128, 1),      (1, 1)
    o_ref,                                     # (B, 1)
    scr_ref,                                   # (B, _SCR_W) VMEM shift scratch
):
    # Zero the staging scratch once; every _stage() rewrites only its own
    # 250-wide slot window, so all halo columns stay zero for the whole kernel.
    scr_ref[...] = jnp.zeros(scr_ref.shape, scr_ref.dtype)

    # ---- input phases: xph[p][b, m] = x[b, 0, 4*m + p]
    x0 = xph_ref[0]
    x1 = xph_ref[1]
    x2 = xph_ref[2]
    x3 = xph_ref[3]
    _stage(scr_ref, x3, 4)                     # dedicated slot: no WAR vs conv2
    x3p = _prev(scr_ref, 4)                    # x[b, 4*m - 1] (zero at m=0)

    # ---- Conv1 (1->4, k3, s2, p1) + ReLU.
    # out1[l] = b + w0*x[2l-1] + w1*x[2l] + w2*x[2l+1]; produce its even
    # (l=2m) and odd (l=2m+1) phases directly — exactly what the stride-2
    # conv2 consumes, so no deinterleaving is ever needed.
    y1e, y1o = [], []
    for c in range(_C):
        w0, w1, w2 = cw1_ref[c, 0], cw1_ref[c, 1], cw1_ref[c, 2]
        b = cb1_ref[c]
        y1e.append(jnp.maximum(w0 * x3p + w1 * x0 + w2 * x1 + b, 0.0))
        y1o.append(jnp.maximum(w0 * x1 + w1 * x2 + w2 * x3 + b, 0.0))

    # ---- Conv2 (4->4, k3, s2, p1) + ReLU -> 4 channels of (B, 250).
    # y2[m] = b + sum_ci (w0*y1o[ci][m-1] + w1*y1e[ci][m] + w2*y1o[ci][m]).
    y1o_p = []
    for ci in range(_C):
        _stage(scr_ref, y1o[ci], ci)           # each channel its own slot
        y1o_p.append(_prev(scr_ref, ci))
    y2 = []
    for co in range(_C):
        acc = None
        for ci in range(_C):
            t = (cw2_ref[co, 3 * ci + 0] * y1o_p[ci]
                 + cw2_ref[co, 3 * ci + 1] * y1e[ci]
                 + cw2_ref[co, 3 * ci + 2] * y1o[ci])
            acc = t if acc is None else acc + t
        y2.append(jnp.maximum(acc + cb2_ref[co], 0.0))

    # ---- Conv3 (4->4, k3, s1, p1) + ReLU -> 4 channels of (B, 250).
    y2p, y2n = [], []
    for ci in range(_C):
        _stage(scr_ref, y2[ci], ci)            # slot reuse is safe: y2 already
        y2p.append(_prev(scr_ref, ci))         # depends on every y1o_p value
        y2n.append(_next(scr_ref, ci))
    y3 = []
    for co in range(_C):
        acc = None
        for ci in range(_C):
            t = (cw3_ref[co, 3 * ci + 0] * y2p[ci]
                 + cw3_ref[co, 3 * ci + 1] * y2[ci]
                 + cw3_ref[co, 3 * ci + 2] * y2n[ci])
            acc = t if acc is None else acc + t
        y3.append(jnp.maximum(acc + cb3_ref[co], 0.0))

    # ---- view(-1, 1000) + Linear(1000, 512) + ReLU.
    # flat[b] = [y3[0][b] | y3[1][b] | y3[2][b] | y3[3][b]] (channel-major), so
    # flat @ W1.T == sum_c y3[c] @ w1r[c], with w1r[c] = W1[:, 250c:250(c+1)].T
    h = None
    for c in range(_C):
        part = jnp.dot(y3[c], w1r_ref[c], preferred_element_type=jnp.float32)
        h = part if h is None else h + part
    h = jnp.maximum(h + lb1_ref[...], 0.0)

    # ---- Linear(512,256)+ReLU -> Linear(256,128)+ReLU -> Linear(128,1)+ReLU.
    h = jnp.maximum(
        jnp.dot(h, w2t_ref[...], preferred_element_type=jnp.float32)
        + lb2_ref[...], 0.0)
    h = jnp.maximum(
        jnp.dot(h, w3t_ref[...], preferred_element_type=jnp.float32)
        + lb3_ref[...], 0.0)
    h = jnp.maximum(
        jnp.dot(h, w4t_ref[...], preferred_element_type=jnp.float32)
        + lb4_ref[...], 0.0)
    o_ref[...] = h.astype(o_ref.dtype)


def _whole(space):
    return pl.BlockSpec(memory_space=space)


@jax.jit
def forward(kp, x):
    """x: (B, 1, 1000) float32 -> (B, 1) float32, matching Model.forward."""
    B = x.shape[0]
    assert x.shape[1:] == (1, 1000)
    # Stride-phase split of the input: xph[p, b, m] = x[b, 0, 4m + p] (tiny op).
    xph = x.astype(jnp.float32).reshape(B, _L, 4).transpose(2, 0, 1)

    vmem = pltpu.MemorySpace.VMEM
    smem = pltpu.MemorySpace.SMEM
    in_specs = [
        _whole(vmem),                                  # xph
        _whole(smem), _whole(smem),                    # cw1, cb1
        _whole(smem), _whole(smem),                    # cw2, cb2
        _whole(smem), _whole(smem),                    # cw3, cb3
        _whole(vmem), _whole(vmem),                    # w1r, lb1
        _whole(vmem), _whole(vmem),                    # w2t, lb2
        _whole(vmem), _whole(vmem),                    # w3t, lb3
        _whole(vmem), _whole(vmem),                    # w4t, lb4
    ]
    return pl.pallas_call(
        _fused_forward_kernel,
        out_shape=jax.ShapeDtypeStruct((B, 1), jnp.float32),
        in_specs=in_specs,
        out_specs=_whole(vmem),
        scratch_shapes=[pltpu.VMEM((B, _SCR_W), jnp.float32)],
        compiler_params=pltpu.CompilerParams(vmem_limit_bytes=16 << 20),
    )(xph,
      kp["cw1"], kp["cb1"], kp["cw2"], kp["cb2"], kp["cw3"], kp["cb3"],
      kp["w1r"], kp["lb1"], kp["w2t"], kp["lb2"], kp["w3t"], kp["lb3"],
      kp["w4t"], kp["lb4"])


def init_params(key):
    """PyTorch-layout parameters with PyTorch-style uniform init."""
    ks = jax.random.split(key, 14)

    def u(k, shape, fan_in):
        bound = 1.0 / jnp.sqrt(jnp.float32(fan_in))
        return jax.random.uniform(k, shape, jnp.float32, -bound, bound)

    return {
        "cw1": u(ks[0], (4, 1, 3), 1 * 3),  "cb1": u(ks[1], (4,), 1 * 3),
        "cw2": u(ks[2], (4, 4, 3), 4 * 3),  "cb2": u(ks[3], (4,), 4 * 3),
        "cw3": u(ks[4], (4, 4, 3), 4 * 3),  "cb3": u(ks[5], (4,), 4 * 3),
        "lw1": u(ks[6], (512, 1000), 1000), "lb1": u(ks[7], (512,), 1000),
        "lw2": u(ks[8], (256, 512), 512),   "lb2": u(ks[9], (256,), 512),
        "lw3": u(ks[10], (128, 256), 256),  "lb3": u(ks[11], (128,), 256),
        "lw4": u(ks[12], (1, 128), 128),    "lb4": u(ks[13], (1,), 128),
    }


def prepare_params(p):
    """One-time conversion of PyTorch-layout params to the fused-kernel layout
    (pre-transposed / pre-reshaped so the forward pass never transposes)."""
    f32 = jnp.float32
    return {
        "cw1": p["cw1"].reshape(4, 3).astype(f32),      # (Cout, Cin*K)
        "cb1": p["cb1"].astype(f32),
        "cw2": p["cw2"].reshape(4, 12).astype(f32),     # [co, ci*3 + k]
        "cb2": p["cb2"].astype(f32),
        "cw3": p["cw3"].reshape(4, 12).astype(f32),
        "cb3": p["cb3"].astype(f32),
        # Linear(1000,512): W1 (512,1000) -> W1.T (1000,512) -> (4,250,512) so
        # w1r[c] multiplies conv channel c of the flattened activation.
        "w1r": p["lw1"].T.reshape(4, _L, 512).astype(f32),
        "lb1": p["lb1"].reshape(1, 512).astype(f32),
        "w2t": p["lw2"].T.astype(f32),                  # (512, 256)
        "lb2": p["lb2"].reshape(1, 256).astype(f32),
        "w3t": p["lw3"].T.astype(f32),                  # (256, 128)
        "lb3": p["lb3"].reshape(1, 128).astype(f32),
        "w4t": p["lw4"].T.astype(f32),                  # (128, 1)
        "lb4": p["lb4"].reshape(1, 1).astype(f32),
    }


def reference(params, x):
    """Pure-JAX reference (PyTorch semantics) for correctness checking."""
    def conv(h, w, b, stride):
        y = jax.lax.conv_general_dilated(
            h, w, window_strides=(stride,), padding=[(1, 1)],
            dimension_numbers=("NCH", "OIH", "NCH"))
        return jax.nn.relu(y + b[None, :, None])

    h = conv(x, params["cw1"], params["cb1"], 2)
    h = conv(h, params["cw2"], params["cb2"], 2)
    h = conv(h, params["cw3"], params["cb3"], 1)
    h = h.reshape(h.shape[0], -1)
    for wk, bk in (("lw1", "lb1"), ("lw2", "lb2"), ("lw3", "lb3"), ("lw4", "lb4")):
        h = jax.nn.relu(h @ params[wk].T + params[bk])
    return h


if __name__ == "__main__":
    key = jax.random.PRNGKey(0)
    kp_key, kx = jax.random.split(key)
    params = init_params(kp_key)
    kparams = prepare_params(params)           # one-time layout prep (no per-forward .T)
    # Input length must be 1000 so view(-1, 1000) matches Linear(1000, ...):
    # 1000 --conv(s2)--> 500 --conv(s2)--> 250 --conv(s1)--> 250; 4*250 = 1000.
    x = jax.random.normal(kx, (2, 1, 1000), dtype=jnp.float32)

    out = jax.block_until_ready(forward(kparams, x))
    ref = jax.block_until_ready(reference(params, x))

    assert out.shape == (2, 1), out.shape
    assert jnp.allclose(out, ref, atol=1e-4, rtol=1e-4), "mismatch vs reference"
    print("KERNEL_OK")
</pallas_src>

<mosaic_0001>
module attributes {stable_mosaic.version = 11 : i64} {
  func.func @_fused_forward_kernel(%arg0: memref<4x2x250xf32, #tpu.memory_space<vmem>>, %arg1: memref<4x3xf32, #tpu.memory_space<smem>>, %arg2: memref<4xf32, #tpu.memory_space<smem>>, %arg3: memref<4x12xf32, #tpu.memory_space<smem>>, %arg4: memref<4xf32, #tpu.memory_space<smem>>, %arg5: memref<4x12xf32, #tpu.memory_space<smem>>, %arg6: memref<4xf32, #tpu.memory_space<smem>>, %arg7: memref<4x250x512xf32, #tpu.memory_space<vmem>>, %arg8: memref<1x512xf32, #tpu.memory_space<vmem>>, %arg9: memref<512x256xf32, #tpu.memory_space<vmem>>, %arg10: memref<1x256xf32, #tpu.memory_space<vmem>>, %arg11: memref<256x128xf32, #tpu.memory_space<vmem>>, %arg12: memref<1x128xf32, #tpu.memory_space<vmem>>, %arg13: memref<128x1xf32, #tpu.memory_space<vmem>>, %arg14: memref<1x1xf32, #tpu.memory_space<vmem>>, %arg15: memref<2x1xf32, #tpu.memory_space<vmem>>, %arg16: memref<2x1536xf32, #tpu.memory_space<vmem>>) attributes {dimension_semantics = [], scalar_prefetch = 0 : i64, scratch_operands = 1 : i64, tpu.core_type = #tpu.core_type<tc>} {
    %cst = arith.constant 0.000000e+00 : f32
    %0 = vector.broadcast %cst : f32 to vector<2x1536xf32>
    %c0 = arith.constant 0 : index
    %c0_0 = arith.constant 0 : index
    %1 = vector.load %arg16[%c0, %c0_0] : memref<2x1536xf32, #tpu.memory_space<vmem>>, vector<2x1536xf32>
    tpu.vector_store %arg16[%c0, %c0_0], %0 {strides = array<i32>} : memref<2x1536xf32, #tpu.memory_space<vmem>>, vector<2x1536xf32>,
    %c0_1 = arith.constant 0 : index
    %c0_2 = arith.constant 0 : index
    %c0_3 = arith.constant 0 : index
    %2 = vector.load %arg0[%c0_1, %c0_2, %c0_3] : memref<4x2x250xf32, #tpu.memory_space<vmem>>, vector<1x2x250xf32>
    %3 = vector.shape_cast %2 : vector<1x2x250xf32> to vector<2x250xf32>
    %c1 = arith.constant 1 : index
    %c0_4 = arith.constant 0 : index
    %c0_5 = arith.constant 0 : index
    %4 = vector.load %arg0[%c1, %c0_4, %c0_5] : memref<4x2x250xf32, #tpu.memory_space<vmem>>, vector<1x2x250xf32>
    %5 = vector.shape_cast %4 : vector<1x2x250xf32> to vector<2x250xf32>
    %c2 = arith.constant 2 : index
    %c0_6 = arith.constant 0 : index
    %c0_7 = arith.constant 0 : index
    %6 = vector.load %arg0[%c2, %c0_6, %c0_7] : memref<4x2x250xf32, #tpu.memory_space<vmem>>, vector<1x2x250xf32>
    %7 = vector.shape_cast %6 : vector<1x2x250xf32> to vector<2x250xf32>
    %c3 = arith.constant 3 : index
    %c0_8 = arith.constant 0 : index
    %c0_9 = arith.constant 0 : index
    %8 = vector.load %arg0[%c3, %c0_8, %c0_9] : memref<4x2x250xf32, #tpu.memory_space<vmem>>, vector<1x2x250xf32>
    %9 = vector.shape_cast %8 : vector<1x2x250xf32> to vector<2x250xf32>
    %c0_10 = arith.constant 0 : index
    %c1152 = arith.constant 1152 : index
    %10 = vector.load %arg16[%c0_10, %c1152] : memref<2x1536xf32, #tpu.memory_space<vmem>>, vector<2x250xf32>
    tpu.vector_store %arg16[%c0_10, %c1152], %9 {strides = array<i32>} : memref<2x1536xf32, #tpu.memory_space<vmem>>, vector<2x250xf32>,
    %c0_11 = arith.constant 0 : index
    %c1151 = arith.constant 1151 : index
    %11 = vector.load %arg16[%c0_11, %c1151] : memref<2x1536xf32, #tpu.memory_space<vmem>>, vector<2x250xf32>
    %c0_12 = arith.constant 0 : index
    %c0_13 = arith.constant 0 : index
    %12 = memref.load %arg1[%c0_12, %c0_13] : memref<4x3xf32, #tpu.memory_space<smem>>
    %c0_14 = arith.constant 0 : index
    %c1_15 = arith.constant 1 : index
    %13 = memref.load %arg1[%c0_14, %c1_15] : memref<4x3xf32, #tpu.memory_space<smem>>
    %c0_16 = arith.constant 0 : index
    %c2_17 = arith.constant 2 : index
    %14 = memref.load %arg1[%c0_16, %c2_17] : memref<4x3xf32, #tpu.memory_space<smem>>
    %c0_18 = arith.constant 0 : index
    %15 = memref.load %arg2[%c0_18] : memref<4xf32, #tpu.memory_space<smem>>
    %16 = vector.broadcast %12 : f32 to vector<2x250xf32>
    %17 = arith.mulf %16, %11 : vector<2x250xf32>
    %18 = vector.broadcast %13 : f32 to vector<2x250xf32>
    %19 = arith.mulf %18, %3 : vector<2x250xf32>
    %20 = arith.addf %17, %19 : vector<2x250xf32>
    %21 = vector.broadcast %14 : f32 to vector<2x250xf32>
    %22 = arith.mulf %21, %5 : vector<2x250xf32>
    %23 = arith.addf %20, %22 : vector<2x250xf32>
    %24 = vector.broadcast %15 : f32 to vector<2x250xf32>
    %25 = arith.addf %23, %24 : vector<2x250xf32>
    %cst_19 = arith.constant 0.000000e+00 : f32
    %26 = vector.broadcast %cst_19 : f32 to vector<2x250xf32>
    %27 = arith.maximumf %25, %26 : vector<2x250xf32>
    %28 = vector.broadcast %12 : f32 to vector<2x250xf32>
    %29 = arith.mulf %28, %5 : vector<2x250xf32>
    %30 = vector.broadcast %13 : f32 to vector<2x250xf32>
    %31 = arith.mulf %30, %7 : vector<2x250xf32>
    %32 = arith.addf %29, %31 : vector<2x250xf32>
    %33 = vector.broadcast %14 : f32 to vector<2x250xf32>
    %34 = arith.mulf %33, %9 : vector<2x250xf32>
    %35 = arith.addf %32, %34 : vector<2x250xf32>
    %36 = vector.broadcast %15 : f32 to vector<2x250xf32>
    %37 = arith.addf %35, %36 : vector<2x250xf32>
    %cst_20 = arith.constant 0.000000e+00 : f32
    %38 = vector.broadcast %cst_20 : f32 to vector<2x250xf32>
    %39 = arith.maximumf %37, %38 : vector<2x250xf32>
    %c1_21 = arith.constant 1 : index
    %c0_22 = arith.constant 0 : index
    %40 = memref.load %arg1[%c1_21, %c0_22] : memref<4x3xf32, #tpu.memory_space<smem>>
    %c1_23 = arith.constant 1 : index
    %c1_24 = arith.constant 1 : index
    %41 = memref.load %arg1[%c1_23, %c1_24] : memref<4x3xf32, #tpu.memory_space<smem>>
    %c1_25 = arith.constant 1 : index
    %c2_26 = arith.constant 2 : index
    %42 = memref.load %arg1[%c1_25, %c2_26] : memref<4x3xf32, #tpu.memory_space<smem>>
    %c1_27 = arith.constant 1 : index
    %43 = memref.load %arg2[%c1_27] : memref<4xf32, #tpu.memory_space<smem>>
    %44 = vector.broadcast %40 : f32 to vector<2x250xf32>
    %45 = arith.mulf %44, %11 : vector<2x250xf32>
    %46 = vector.broadcast %41 : f32 to vector<2x250xf32>
    %47 = arith.mulf %46, %3 : vector<2x250xf32>
    %48 = arith.addf %45, %47 : vector<2x250xf32>
    %49 = vector.broadcast %42 : f32 to vector<2x250xf32>
    %50 = arith.mulf %49, %5 : vector<2x250xf32>
    %51 = arith.addf %48, %50 : vector<2x250xf32>
    %52 = vector.broadcast %43 : f32 to vector<2x250xf32>
    %53 = arith.addf %51, %52 : vector<2x250xf32>
    %cst_28 = arith.constant 0.000000e+00 : f32
    %54 = vector.broadcast %cst_28 : f32 to vector<2x250xf32>
    %55 = arith.maximumf %53, %54 : vector<2x250xf32>
    %56 = vector.broadcast %40 : f32 to vector<2x250xf32>
    %57 = arith.mulf %56, %5 : vector<2x250xf32>
    %58 = vector.broadcast %41 : f32 to vector<2x250xf32>
    %59 = arith.mulf %58, %7 : vector<2x250xf32>
    %60 = arith.addf %57, %59 : vector<2x250xf32>
    %61 = vector.broadcast %42 : f32 to vector<2x250xf32>
    %62 = arith.mulf %61, %9 : vector<2x250xf32>
    %63 = arith.addf %60, %62 : vector<2x250xf32>
    %64 = vector.broadcast %43 : f32 to vector<2x250xf32>
    %65 = arith.addf %63, %64 : vector<2x250xf32>
    %cst_29 = arith.constant 0.000000e+00 : f32
    %66 = vector.broadcast %cst_29 : f32 to vector<2x250xf32>
    %67 = arith.maximumf %65, %66 : vector<2x250xf32>
    %c2_30 = arith.constant 2 : index
    %c0_31 = arith.constant 0 : index
    %68 = memref.load %arg1[%c2_30, %c0_31] : memref<4x3xf32, #tpu.memory_space<smem>>
    %c2_32 = arith.constant 2 : index
    %c1_33 = arith.constant 1 : index
    %69 = memref.load %arg1[%c2_32, %c1_33] : memref<4x3xf32, #tpu.memory_space<smem>>
    %c2_34 = arith.constant 2 : index
    %c2_35 = arith.constant 2 : index
    %70 = memref.load %arg1[%c2_34, %c2_35] : memref<4x3xf32, #tpu.memory_space<smem>>
    %c2_36 = arith.constant 2 : index
    %71 = memref.load %arg2[%c2_36] : memref<4xf32, #tpu.memory_space<smem>>
    %72 = vector.broadcast %68 : f32 to vector<2x250xf32>
    %73 = arith.mulf %72, %11 : vector<2x250xf32>
    %74 = vector.broadcast %69 : f32 to vector<2x250xf32>
    %75 = arith.mulf %74, %3 : vector<2x250xf32>
    %76 = arith.addf %73, %75 : vector<2x250xf32>
    %77 = vector.broadcast %70 : f32 to vector<2x250xf32>
    %78 = arith.mulf %77, %5 : vector<2x250xf32>
    %79 = arith.addf %76, %78 : vector<2x250xf32>
    %80 = vector.broadcast %71 : f32 to vector<2x250xf32>
    %81 = arith.addf %79, %80 : vector<2x250xf32>
    %cst_37 = arith.constant 0.000000e+00 : f32
    %82 = vector.broadcast %cst_37 : f32 to vector<2x250xf32>
    %83 = arith.maximumf %81, %82 : vector<2x250xf32>
    %84 = vector.broadcast %68 : f32 to vector<2x250xf32>
    %85 = arith.mulf %84, %5 : vector<2x250xf32>
    %86 = vector.broadcast %69 : f32 to vector<2x250xf32>
    %87 = arith.mulf %86, %7 : vector<2x250xf32>
    %88 = arith.addf %85, %87 : vector<2x250xf32>
    %89 = vector.broadcast %70 : f32 to vector<2x250xf32>
    %90 = arith.mulf %89, %9 : vector<2x250xf32>
    %91 = arith.addf %88, %90 : vector<2x250xf32>
    %92 = vector.broadcast %71 : f32 to vector<2x250xf32>
    %93 = arith.addf %91, %92 : vector<2x250xf32>
    %cst_38 = arith.constant 0.000000e+00 : f32
    %94 = vector.broadcast %cst_38 : f32 to vector<2x250xf32>
    %95 = arith.maximumf %93, %94 : vector<2x250xf32>
    %c3_39 = arith.constant 3 : index
    %c0_40 = arith.constant 0 : index
    %96 = memref.load %arg1[%c3_39, %c0_40] : memref<4x3xf32, #tpu.memory_space<smem>>
    %c3_41 = arith.constant 3 : index
    %c1_42 = arith.constant 1 : index
    %97 = memref.load %arg1[%c3_41, %c1_42] : memref<4x3xf32, #tpu.memory_space<smem>>
    %c3_43 = arith.constant 3 : index
    %c2_44 = arith.constant 2 : index
    %98 = memref.load %arg1[%c3_43, %c2_44] : memref<4x3xf32, #tpu.memory_space<smem>>
    %c3_45 = arith.constant 3 : index
    %99 = memref.load %arg2[%c3_45] : memref<4xf32, #tpu.memory_space<smem>>
    %100 = vector.broadcast %96 : f32 to vector<2x250xf32>
    %101 = arith.mulf %100, %11 : vector<2x250xf32>
    %102 = vector.broadcast %97 : f32 to vector<2x250xf32>
    %103 = arith.mulf %102, %3 : vector<2x250xf32>
    %104 = arith.addf %101, %103 : vector<2x250xf32>
    %105 = vector.broadcast %98 : f32 to vector<2x250xf32>
    %106 = arith.mulf %105, %5 : vector<2x250xf32>
    %107 = arith.addf %104, %106 : vector<2x250xf32>
    %108 = vector.broadcast %99 : f32 to vector<2x250xf32>
    %109 = arith.addf %107, %108 : vector<2x250xf32>
    %cst_46 = arith.constant 0.000000e+00 : f32
    %110 = vector.broadcast %cst_46 : f32 to vector<2x250xf32>
    %111 = arith.maximumf %109, %110 : vector<2x250xf32>
    %112 = vector.broadcast %96 : f32 to vector<2x250xf32>
    %113 = arith.mulf %112, %5 : vector<2x250xf32>
    %114 = vector.broadcast %97 : f32 to vector<2x250xf32>
    %115 = arith.mulf %114, %7 : vector<2x250xf32>
    %116 = arith.addf %113, %115 : vector<2x250xf32>
    %117 = vector.broadcast %98 : f32 to vector<2x250xf32>
    %118 = arith.mulf %117, %9 : vector<2x250xf32>
    %119 = arith.addf %116, %118 : vector<2x250xf32>
    %120 = vector.broadcast %99 : f32 to vector<2x250xf32>
    %121 = arith.addf %119, %120 : vector<2x250xf32>
    %cst_47 = arith.constant 0.000000e+00 : f32
    %122 = vector.broadcast %cst_47 : f32 to vector<2x250xf32>
    %123 = arith.maximumf %121, %122 : vector<2x250xf32>
    %c0_48 = arith.constant 0 : index
    %c128 = arith.constant 128 : index
    %124 = vector.load %arg16[%c0_48, %c128] : memref<2x1536xf32, #tpu.memory_space<vmem>>, vector<2x250xf32>
    tpu.vector_store %arg16[%c0_48, %c128], %39 {strides = array<i32>} : memref<2x1536xf32, #tpu.memory_space<vmem>>, vector<2x250xf32>,
    %c0_49 = arith.constant 0 : index
    %c127 = arith.constant 127 : index
    %125 = vector.load %arg16[%c0_49, %c127] : memref<2x1536xf32, #tpu.memory_space<vmem>>, vector<2x250xf32>
    %c0_50 = arith.constant 0 : index
    %c384 = arith.constant 384 : index
    %126 = vector.load %arg16[%c0_50, %c384] : memref<2x1536xf32, #tpu.memory_space<vmem>>, vector<2x250xf32>
    tpu.vector_store %arg16[%c0_50, %c384], %67 {strides = array<i32>} : memref<2x1536xf32, #tpu.memory_space<vmem>>, vector<2x250xf32>,
    %c0_51 = arith.constant 0 : index
    %c383 = arith.constant 383 : index
    %127 = vector.load %arg16[%c0_51, %c383] : memref<2x1536xf32, #tpu.memory_space<vmem>>, vector<2x250xf32>
    %c0_52 = arith.constant 0 : index
    %c640 = arith.constant 640 : index
    %128 = vector.load %arg16[%c0_52, %c640] : memref<2x1536xf32, #tpu.memory_space<vmem>>, vector<2x250xf32>
    tpu.vector_store %arg16[%c0_52, %c640], %95 {strides = array<i32>} : memref<2x1536xf32, #tpu.memory_space<vmem>>, vector<2x250xf32>,
    %c0_53 = arith.constant 0 : index
    %c639 = arith.constant 639 : index
    %129 = vector.load %arg16[%c0_53, %c639] : memref<2x1536xf32, #tpu.memory_space<vmem>>, vector<2x250xf32>
    %c0_54 = arith.constant 0 : index
    %c896 = arith.constant 896 : index
    %130 = vector.load %arg16[%c0_54, %c896] : memref<2x1536xf32, #tpu.memory_space<vmem>>, vector<2x250xf32>
    tpu.vector_store %arg16[%c0_54, %c896], %123 {strides = array<i32>} : memref<2x1536xf32, #tpu.memory_space<vmem>>, vector<2x250xf32>,
    %c0_55 = arith.constant 0 : index
    %c895 = arith.constant 895 : index
    %131 = vector.load %arg16[%c0_55, %c895] : memref<2x1536xf32, #tpu.memory_space<vmem>>, vector<2x250xf32>
    %c0_56 = arith.constant 0 : index
    %c0_57 = arith.constant 0 : index
    %132 = memref.load %arg3[%c0_56, %c0_57] : memref<4x12xf32, #tpu.memory_space<smem>>
    %133 = vector.broadcast %132 : f32 to vector<2x250xf32>
    %134 = arith.mulf %133, %125 : vector<2x250xf32>
    %c0_58 = arith.constant 0 : index
    %c1_59 = arith.constant 1 : index
    %135 = memref.load %arg3[%c0_58, %c1_59] : memref<4x12xf32, #tpu.memory_space<smem>>
    %136 = vector.broadcast %135 : f32 to vector<2x250xf32>
    %137 = arith.mulf %136, %27 : vector<2x250xf32>
    %138 = arith.addf %134, %137 : vector<2x250xf32>
    %c0_60 = arith.constant 0 : index
    %c2_61 = arith.constant 2 : index
    %139 = memref.load %arg3[%c0_60, %c2_61] : memref<4x12xf32, #tpu.memory_space<smem>>
    %140 = vector.broadcast %139 : f32 to vector<2x250xf32>
    %141 = arith.mulf %140, %39 : vector<2x250xf32>
    %142 = arith.addf %138, %141 : vector<2x250xf32>
    %c0_62 = arith.constant 0 : index
    %c3_63 = arith.constant 3 : index
    %143 = memref.load %arg3[%c0_62, %c3_63] : memref<4x12xf32, #tpu.memory_space<smem>>
    %144 = vector.broadcast %143 : f32 to vector<2x250xf32>
    %145 = arith.mulf %144, %127 : vector<2x250xf32>
    %c0_64 = arith.constant 0 : index
    %c4 = arith.constant 4 : index
    %146 = memref.load %arg3[%c0_64, %c4] : memref<4x12xf32, #tpu.memory_space<smem>>
    %147 = vector.broadcast %146 : f32 to vector<2x250xf32>
    %148 = arith.mulf %147, %55 : vector<2x250xf32>
    %149 = arith.addf %145, %148 : vector<2x250xf32>
    %c0_65 = arith.constant 0 : index
    %c5 = arith.constant 5 : index
    %150 = memref.load %arg3[%c0_65, %c5] : memref<4x12xf32, #tpu.memory_space<smem>>
    %151 = vector.broadcast %150 : f32 to vector<2x250xf32>
    %152 = arith.mulf %151, %67 : vector<2x250xf32>
    %153 = arith.addf %149, %152 : vector<2x250xf32>
    %154 = arith.addf %142, %153 : vector<2x250xf32>
    %c0_66 = arith.constant 0 : index
    %c6 = arith.constant 6 : index
    %155 = memref.load %arg3[%c0_66, %c6] : memref<4x12xf32, #tpu.memory_space<smem>>
    %156 = vector.broadcast %155 : f32 to vector<2x250xf32>
    %157 = arith.mulf %156, %129 : vector<2x250xf32>
    %c0_67 = arith.constant 0 : index
    %c7 = arith.constant 7 : index
    %158 = memref.load %arg3[%c0_67, %c7] : memref<4x12xf32, #tpu.memory_space<smem>>
    %159 = vector.broadcast %158 : f32 to vector<2x250xf32>
    %160 = arith.mulf %159, %83 : vector<2x250xf32>
    %161 = arith.addf %157, %160 : vector<2x250xf32>
    %c0_68 = arith.constant 0 : index
    %c8 = arith.constant 8 : index
    %162 = memref.load %arg3[%c0_68, %c8] : memref<4x12xf32, #tpu.memory_space<smem>>
    %163 = vector.broadcast %162 : f32 to vector<2x250xf32>
    %164 = arith.mulf %163, %95 : vector<2x250xf32>
    %165 = arith.addf %161, %164 : vector<2x250xf32>
    %166 = arith.addf %154, %165 : vector<2x250xf32>
    %c0_69 = arith.constant 0 : index
    %c9 = arith.constant 9 : index
    %167 = memref.load %arg3[%c0_69, %c9] : memref<4x12xf32, #tpu.memory_space<smem>>
    %168 = vector.broadcast %167 : f32 to vector<2x250xf32>
    %169 = arith.mulf %168, %131 : vector<2x250xf32>
    %c0_70 = arith.constant 0 : index
    %c10 = arith.constant 10 : index
    %170 = memref.load %arg3[%c0_70, %c10] : memref<4x12xf32, #tpu.memory_space<smem>>
    %171 = vector.broadcast %170 : f32 to vector<2x250xf32>
    %172 = arith.mulf %171, %111 : vector<2x250xf32>
    %173 = arith.addf %169, %172 : vector<2x250xf32>
    %c0_71 = arith.constant 0 : index
    %c11 = arith.constant 11 : index
    %174 = memref.load %arg3[%c0_71, %c11] : memref<4x12xf32, #tpu.memory_space<smem>>
    %175 = vector.broadcast %174 : f32 to vector<2x250xf32>
    %176 = arith.mulf %175, %123 : vector<2x250xf32>
    %177 = arith.addf %173, %176 : vector<2x250xf32>
    %178 = arith.addf %166, %177 : vector<2x250xf32>
    %c0_72 = arith.constant 0 : index
    %179 = memref.load %arg4[%c0_72] : memref<4xf32, #tpu.memory_space<smem>>
    %180 = vector.broadcast %179 : f32 to vector<2x250xf32>
    %181 = arith.addf %178, %180 : vector<2x250xf32>
    %cst_73 = arith.constant 0.000000e+00 : f32
    %182 = vector.broadcast %cst_73 : f32 to vector<2x250xf32>
    %183 = arith.maximumf %181, %182 : vector<2x250xf32>
    %c1_74 = arith.constant 1 : index
    %c0_75 = arith.constant 0 : index
    %184 = memref.load %arg3[%c1_74, %c0_75] : memref<4x12xf32, #tpu.memory_space<smem>>
    %185 = vector.broadcast %184 : f32 to vector<2x250xf32>
    %186 = arith.mulf %185, %125 : vector<2x250xf32>
    %c1_76 = arith.constant 1 : index
    %c1_77 = arith.constant 1 : index
    %187 = memref.load %arg3[%c1_76, %c1_77] : memref<4x12xf32, #tpu.memory_space<smem>>
    %188 = vector.broadcast %187 : f32 to vector<2x250xf32>
    %189 = arith.mulf %188, %27 : vector<2x250xf32>
    %190 = arith.addf %186, %189 : vector<2x250xf32>
    %c1_78 = arith.constant 1 : index
    %c2_79 = arith.constant 2 : index
    %191 = memref.load %arg3[%c1_78, %c2_79] : memref<4x12xf32, #tpu.memory_space<smem>>
    %192 = vector.broadcast %191 : f32 to vector<2x250xf32>
    %193 = arith.mulf %192, %39 : vector<2x250xf32>
    %194 = arith.addf %190, %193 : vector<2x250xf32>
    %c1_80 = arith.constant 1 : index
    %c3_81 = arith.constant 3 : index
    %195 = memref.load %arg3[%c1_80, %c3_81] : memref<4x12xf32, #tpu.memory_space<smem>>
    %196 = vector.broadcast %195 : f32 to vector<2x250xf32>
    %197 = arith.mulf %196, %127 : vector<2x250xf32>
    %c1_82 = arith.constant 1 : index
    %c4_83 = arith.constant 4 : index
    %198 = memref.load %arg3[%c1_82, %c4_83] : memref<4x12xf32, #tpu.memory_space<smem>>
    %199 = vector.broadcast %198 : f32 to vector<2x250xf32>
    %200 = arith.mulf %199, %55 : vector<2x250xf32>
    %201 = arith.addf %197, %200 : vector<2x250xf32>
    %c1_84 = arith.constant 1 : index
    %c5_85 = arith.constant 5 : index
    %202 = memref.load %arg3[%c1_84, %c5_85] : memref<4x12xf32, #tpu.memory_space<smem>>
    %203 = vector.broadcast %202 : f32 to vector<2x250xf32>
    %204 = arith.mulf %203, %67 : vector<2x250xf32>
    %205 = arith.addf %201, %204 : vector<2x250xf32>
    %206 = arith.addf %194, %205 : vector<2x250xf32>
    %c1_86 = arith.constant 1 : index
    %c6_87 = arith.constant 6 : index
    %207 = memref.load %arg3[%c1_86, %c6_87] : memref<4x12xf32, #tpu.memory_space<smem>>
    %208 = vector.broadcast %207 : f32 to vector<2x250xf32>
    %209 = arith.mulf %208, %129 : vector<2x250xf32>
    %c1_88 = arith.constant 1 : index
    %c7_89 = arith.constant 7 : index
    %210 = memref.load %arg3[%c1_88, %c7_89] : memref<4x12xf32, #tpu.memory_space<smem>>
    %211 = vector.broadcast %210 : f32 to vector<2x250xf32>
    %212 = arith.mulf %211, %83 : vector<2x250xf32>
    %213 = arith.addf %209, %212 : vector<2x250xf32>
    %c1_90 = arith.constant 1 : index
    %c8_91 = arith.constant 8 : index
    %214 = memref.load %arg3[%c1_90, %c8_91] : memref<4x12xf32, #tpu.memory_space<smem>>
    %215 = vector.broadcast %214 : f32 to vector<2x250xf32>
    %216 = arith.mulf %215, %95 : vector<2x250xf32>
    %217 = arith.addf %213, %216 : vector<2x250xf32>
    %218 = arith.addf %206, %217 : vector<2x250xf32>
    %c1_92 = arith.constant 1 : index
    %c9_93 = arith.constant 9 : index
    %219 = memref.load %arg3[%c1_92, %c9_93] : memref<4x12xf32, #tpu.memory_space<smem>>
    %220 = vector.broadcast %219 : f32 to vector<2x250xf32>
    %221 = arith.mulf %220, %131 : vector<2x250xf32>
    %c1_94 = arith.constant 1 : index
    %c10_95 = arith.constant 10 : index
    %222 = memref.load %arg3[%c1_94, %c10_95] : memref<4x12xf32, #tpu.memory_space<smem>>
    %223 = vector.broadcast %222 : f32 to vector<2x250xf32>
    %224 = arith.mulf %223, %111 : vector<2x250xf32>
    %225 = arith.addf %221, %224 : vector<2x250xf32>
    %c1_96 = arith.constant 1 : index
    %c11_97 = arith.constant 11 : index
    %226 = memref.load %arg3[%c1_96, %c11_97] : memref<4x12xf32, #tpu.memory_space<smem>>
    %227 = vector.broadcast %226 : f32 to vector<2x250xf32>
    %228 = arith.mulf %227, %123 : vector<2x250xf32>
    %229 = arith.addf %225, %228 : vector<2x250xf32>
    %230 = arith.addf %218, %229 : vector<2x250xf32>
    %c1_98 = arith.constant 1 : index
    %231 = memref.load %arg4[%c1_98] : memref<4xf32, #tpu.memory_space<smem>>
    %232 = vector.broadcast %231 : f32 to vector<2x250xf32>
    %233 = arith.addf %230, %232 : vector<2x250xf32>
    %cst_99 = arith.constant 0.000000e+00 : f32
    %234 = vector.broadcast %cst_99 : f32 to vector<2x250xf32>
    %235 = arith.maximumf %233, %234 : vector<2x250xf32>
    %c2_100 = arith.constant 2 : index
    %c0_101 = arith.constant 0 : index
    %236 = memref.load %arg3[%c2_100, %c0_101] : memref<4x12xf32, #tpu.memory_space<smem>>
    %237 = vector.broadcast %236 : f32 to vector<2x250xf32>
    %238 = arith.mulf %237, %125 : vector<2x250xf32>
    %c2_102 = arith.constant 2 : index
    %c1_103 = arith.constant 1 : index
    %239 = memref.load %arg3[%c2_102, %c1_103] : memref<4x12xf32, #tpu.memory_space<smem>>
    %240 = vector.broadcast %239 : f32 to vector<2x250xf32>
    %241 = arith.mulf %240, %27 : vector<2x250xf32>
    %242 = arith.addf %238, %241 : vector<2x250xf32>
    %c2_104 = arith.constant 2 : index
    %c2_105 = arith.constant 2 : index
    %243 = memref.load %arg3[%c2_104, %c2_105] : memref<4x12xf32, #tpu.memory_space<smem>>
    %244 = vector.broadcast %243 : f32 to vector<2x250xf32>
    %245 = arith.mulf %244, %39 : vector<2x250xf32>
    %246 = arith.addf %242, %245 : vector<2x250xf32>
    %c2_106 = arith.constant 2 : index
    %c3_107 = arith.constant 3 : index
    %247 = memref.load %arg3[%c2_106, %c3_107] : memref<4x12xf32, #tpu.memory_space<smem>>
    %248 = vector.broadcast %247 : f32 to vector<2x250xf32>
    %249 = arith.mulf %248, %127 : vector<2x250xf32>
    %c2_108 = arith.constant 2 : index
    %c4_109 = arith.constant 4 : index
    %250 = memref.load %arg3[%c2_108, %c4_109] : memref<4x12xf32, #tpu.memory_space<smem>>
    %251 = vector.broadcast %250 : f32 to vector<2x250xf32>
    %252 = arith.mulf %251, %55 : vector<2x250xf32>
    %253 = arith.addf %249, %252 : vector<2x250xf32>
    %c2_110 = arith.constant 2 : index
    %c5_111 = arith.constant 5 : index
    %254 = memref.load %arg3[%c2_110, %c5_111] : memref<4x12xf32, #tpu.memory_space<smem>>
    %255 = vector.broadcast %254 : f32 to vector<2x250xf32>
    %256 = arith.mulf %255, %67 : vector<2x250xf32>
    %257 = arith.addf %253, %256 : vector<2x250xf32>
    %258 = arith.addf %246, %257 : vector<2x250xf32>
    %c2_112 = arith.constant 2 : index
    %c6_113 = arith.constant 6 : index
    %259 = memref.load %arg3[%c2_112, %c6_113] : memref<4x12xf32, #tpu.memory_space<smem>>
    %260 = vector.broadcast %259 : f32 to vector<2x250xf32>
    %261 = arith.mulf %260, %129 : vector<2x250xf32>
    %c2_114 = arith.constant 2 : index
    %c7_115 = arith.constant 7 : index
    %262 = memref.load %arg3[%c2_114, %c7_115] : memref<4x12xf32, #tpu.memory_space<smem>>
    %263 = vector.broadcast %262 : f32 to vector<2x250xf32>
    %264 = arith.mulf %263, %83 : vector<2x250xf32>
    %265 = arith.addf %261, %264 : vector<2x250xf32>
    %c2_116 = arith.constant 2 : index
    %c8_117 = arith.constant 8 : index
    %266 = memref.load %arg3[%c2_116, %c8_117] : memref<4x12xf32, #tpu.memory_space<smem>>
    %267 = vector.broadcast %266 : f32 to vector<2x250xf32>
    %268 = arith.mulf %267, %95 : vector<2x250xf32>
    %269 = arith.addf %265, %268 : vector<2x250xf32>
    %270 = arith.addf %258, %269 : vector<2x250xf32>
    %c2_118 = arith.constant 2 : index
    %c9_119 = arith.constant 9 : index
    %271 = memref.load %arg3[%c2_118, %c9_119] : memref<4x12xf32, #tpu.memory_space<smem>>
    %272 = vector.broadcast %271 : f32 to vector<2x250xf32>
    %273 = arith.mulf %272, %131 : vector<2x250xf32>
    %c2_120 = arith.constant 2 : index
    %c10_121 = arith.constant 10 : index
    %274 = memref.load %arg3[%c2_120, %c10_121] : memref<4x12xf32, #tpu.memory_space<smem>>
    %275 = vector.broadcast %274 : f32 to vector<2x250xf32>
    %276 = arith.mulf %275, %111 : vector<2x250xf32>
    %277 = arith.addf %273, %276 : vector<2x250xf32>
    %c2_122 = arith.constant 2 : index
    %c11_123 = arith.constant 11 : index
    %278 = memref.load %arg3[%c2_122, %c11_123] : memref<4x12xf32, #tpu.memory_space<smem>>
    %279 = vector.broadcast %278 : f32 to vector<2x250xf32>
    %280 = arith.mulf %279, %123 : vector<2x250xf32>
    %281 = arith.addf %277, %280 : vector<2x250xf32>
    %282 = arith.addf %270, %281 : vector<2x250xf32>
    %c2_124 = arith.constant 2 : index
    %283 = memref.load %arg4[%c2_124] : memref<4xf32, #tpu.memory_space<smem>>
    %284 = vector.broadcast %283 : f32 to vector<2x250xf32>
    %285 = arith.addf %282, %284 : vector<2x250xf32>
    %cst_125 = arith.constant 0.000000e+00 : f32
    %286 = vector.broadcast %cst_125 : f32 to vector<2x250xf32>
    %287 = arith.maximumf %285, %286 : vector<2x250xf32>
    %c3_126 = arith.constant 3 : index
    %c0_127 = arith.constant 0 : index
    %288 = memref.load %arg3[%c3_126, %c0_127] : memref<4x12xf32, #tpu.memory_space<smem>>
    %289 = vector.broadcast %288 : f32 to vector<2x250xf32>
    %290 = arith.mulf %289, %125 : vector<2x250xf32>
    %c3_128 = arith.constant 3 : index
    %c1_129 = arith.constant 1 : index
    %291 = memref.load %arg3[%c3_128, %c1_129] : memref<4x12xf32, #tpu.memory_space<smem>>
    %292 = vector.broadcast %291 : f32 to vector<2x250xf32>
    %293 = arith.mulf %292, %27 : vector<2x250xf32>
    %294 = arith.addf %290, %293 : vector<2x250xf32>
    %c3_130 = arith.constant 3 : index
    %c2_131 = arith.constant 2 : index
    %295 = memref.load %arg3[%c3_130, %c2_131] : memref<4x12xf32, #tpu.memory_space<smem>>
    %296 = vector.broadcast %295 : f32 to vector<2x250xf32>
    %297 = arith.mulf %296, %39 : vector<2x250xf32>
    %298 = arith.addf %294, %297 : vector<2x250xf32>
    %c3_132 = arith.constant 3 : index
    %c3_133 = arith.constant 3 : index
    %299 = memref.load %arg3[%c3_132, %c3_133] : memref<4x12xf32, #tpu.memory_space<smem>>
    %300 = vector.broadcast %299 : f32 to vector<2x250xf32>
    %301 = arith.mulf %300, %127 : vector<2x250xf32>
    %c3_134 = arith.constant 3 : index
    %c4_135 = arith.constant 4 : index
    %302 = memref.load %arg3[%c3_134, %c4_135] : memref<4x12xf32, #tpu.memory_space<smem>>
    %303 = vector.broadcast %302 : f32 to vector<2x250xf32>
    %304 = arith.mulf %303, %55 : vector<2x250xf32>
    %305 = arith.addf %301, %304 : vector<2x250xf32>
    %c3_136 = arith.constant 3 : index
    %c5_137 = arith.constant 5 : index
    %306 = memref.load %arg3[%c3_136, %c5_137] : memref<4x12xf32, #tpu.memory_space<smem>>
    %307 = vector.broadcast %306 : f32 to vector<2x250xf32>
    %308 = arith.mulf %307, %67 : vector<2x250xf32>
    %309 = arith.addf %305, %308 : vector<2x250xf32>
    %310 = arith.addf %298, %309 : vector<2x250xf32>
    %c3_138 = arith.constant 3 : index
    %c6_139 = arith.constant 6 : index
    %311 = memref.load %arg3[%c3_138, %c6_139] : memref<4x12xf32, #tpu.memory_space<smem>>
    %312 = vector.broadcast %311 : f32 to vector<2x250xf32>
    %313 = arith.mulf %312, %129 : vector<2x250xf32>
    %c3_140 = arith.constant 3 : index
    %c7_141 = arith.constant 7 : index
    %314 = memref.load %arg3[%c3_140, %c7_141] : memref<4x12xf32, #tpu.memory_space<smem>>
    %315 = vector.broadcast %314 : f32 to vector<2x250xf32>
    %316 = arith.mulf %315, %83 : vector<2x250xf32>
    %317 = arith.addf %313, %316 : vector<2x250xf32>
    %c3_142 = arith.constant 3 : index
    %c8_143 = arith.constant 8 : index
    %318 = memref.load %arg3[%c3_142, %c8_143] : memref<4x12xf32, #tpu.memory_space<smem>>
    %319 = vector.broadcast %318 : f32 to vector<2x250xf32>
    %320 = arith.mulf %319, %95 : vector<2x250xf32>
    %321 = arith.addf %317, %320 : vector<2x250xf32>
    %322 = arith.addf %310, %321 : vector<2x250xf32>
    %c3_144 = arith.constant 3 : index
    %c9_145 = arith.constant 9 : index
    %323 = memref.load %arg3[%c3_144, %c9_145] : memref<4x12xf32, #tpu.memory_space<smem>>
    %324 = vector.broadcast %323 : f32 to vector<2x250xf32>
    %325 = arith.mulf %324, %131 : vector<2x250xf32>
    %c3_146 = arith.constant 3 : index
    %c10_147 = arith.constant 10 : index
    %326 = memref.load %arg3[%c3_146, %c10_147] : memref<4x12xf32, #tpu.memory_space<smem>>
    %327 = vector.broadcast %326 : f32 to vector<2x250xf32>
    %328 = arith.mulf %327, %111 : vector<2x250xf32>
    %329 = arith.addf %325, %328 : vector<2x250xf32>
    %c3_148 = arith.constant 3 : index
    %c11_149 = arith.constant 11 : index
    %330 = memref.load %arg3[%c3_148, %c11_149] : memref<4x12xf32, #tpu.memory_space<smem>>
    %331 = vector.broadcast %330 : f32 to vector<2x250xf32>
    %332 = arith.mulf %331, %123 : vector<2x250xf32>
    %333 = arith.addf %329, %332 : vector<2x250xf32>
    %334 = arith.addf %322, %333 : vector<2x250xf32>
    %c3_150 = arith.constant 3 : index
    %335 = memref.load %arg4[%c3_150] : memref<4xf32, #tpu.memory_space<smem>>
    %336 = vector.broadcast %335 : f32 to vector<2x250xf32>
    %337 = arith.addf %334, %336 : vector<2x250xf32>
    %cst_151 = arith.constant 0.000000e+00 : f32
    %338 = vector.broadcast %cst_151 : f32 to vector<2x250xf32>
    %339 = arith.maximumf %337, %338 : vector<2x250xf32>
    %c0_152 = arith.constant 0 : index
    %c128_153 = arith.constant 128 : index
    %340 = vector.load %arg16[%c0_152, %c128_153] : memref<2x1536xf32, #tpu.memory_space<vmem>>, vector<2x250xf32>
    tpu.vector_store %arg16[%c0_152, %c128_153], %183 {strides = array<i32>} : memref<2x1536xf32, #tpu.memory_space<vmem>>, vector<2x250xf32>,
    %c0_154 = arith.constant 0 : index
    %c127_155 = arith.constant 127 : index
    %341 = vector.load %arg16[%c0_154, %c127_155] : memref<2x1536xf32, #tpu.memory_space<vmem>>, vector<2x250xf32>
    %c0_156 = arith.constant 0 : index
    %c129 = arith.constant 129 : index
    %342 = vector.load %arg16[%c0_156, %c129] : memref<2x1536xf32, #tpu.memory_space<vmem>>, vector<2x250xf32>
    %c0_157 = arith.constant 0 : index
    %c384_158 = arith.constant 384 : index
    %343 = vector.load %arg16[%c0_157, %c384_158] : memref<2x1536xf32, #tpu.memory_space<vmem>>, vector<2x250xf32>
    tpu.vector_store %arg16[%c0_157, %c384_158], %235 {strides = array<i32>} : memref<2x1536xf32, #tpu.memory_space<vmem>>, vector<2x250xf32>,
    %c0_159 = arith.constant 0 : index
    %c383_160 = arith.constant 383 : index
    %344 = vector.load %arg16[%c0_159, %c383_160] : memref<2x1536xf32, #tpu.memory_space<vmem>>, vector<2x250xf32>
    %c0_161 = arith.constant 0 : index
    %c385 = arith.constant 385 : index
    %345 = vector.load %arg16[%c0_161, %c385] : memref<2x1536xf32, #tpu.memory_space<vmem>>, vector<2x250xf32>
    %c0_162 = arith.constant 0 : index
    %c640_163 = arith.constant 640 : index
    %346 = vector.load %arg16[%c0_162, %c640_163] : memref<2x1536xf32, #tpu.memory_space<vmem>>, vector<2x250xf32>
    tpu.vector_store %arg16[%c0_162, %c640_163], %287 {strides = array<i32>} : memref<2x1536xf32, #tpu.memory_space<vmem>>, vector<2x250xf32>,
    %c0_164 = arith.constant 0 : index
    %c639_165 = arith.constant 639 : index
    %347 = vector.load %arg16[%c0_164, %c639_165] : memref<2x1536xf32, #tpu.memory_space<vmem>>, vector<2x250xf32>
    %c0_166 = arith.constant 0 : index
    %c641 = arith.constant 641 : index
    %348 = vector.load %arg16[%c0_166, %c641] : memref<2x1536xf32, #tpu.memory_space<vmem>>, vector<2x250xf32>
    %c0_167 = arith.constant 0 : index
    %c896_168 = arith.constant 896 : index
    %349 = vector.load %arg16[%c0_167, %c896_168] : memref<2x1536xf32, #tpu.memory_space<vmem>>, vector<2x250xf32>
    tpu.vector_store %arg16[%c0_167, %c896_168], %339 {strides = array<i32>} : memref<2x1536xf32, #tpu.memory_space<vmem>>, vector<2x250xf32>,
    %c0_169 = arith.constant 0 : index
    %c895_170 = arith.constant 895 : index
    %350 = vector.load %arg16[%c0_169, %c895_170] : memref<2x1536xf32, #tpu.memory_space<vmem>>, vector<2x250xf32>
    %c0_171 = arith.constant 0 : index
    %c897 = arith.constant 897 : index
    %351 = vector.load %arg16[%c0_171, %c897] : memref<2x1536xf32, #tpu.memory_space<vmem>>, vector<2x250xf32>
    %c0_172 = arith.constant 0 : index
    %c0_173 = arith.constant 0 : index
    %352 = memref.load %arg5[%c0_172, %c0_173] : memref<4x12xf32, #tpu.memory_space<smem>>
    %353 = vector.broadcast %352 : f32 to vector<2x250xf32>
    %354 = arith.mulf %353, %341 : vector<2x250xf32>
    %c0_174 = arith.constant 0 : index
    %c1_175 = arith.constant 1 : index
    %355 = memref.load %arg5[%c0_174, %c1_175] : memref<4x12xf32, #tpu.memory_space<smem>>
    %356 = vector.broadcast %355 : f32 to vector<2x250xf32>
    %357 = arith.mulf %356, %183 : vector<2x250xf32>
    %358 = arith.addf %354, %357 : vector<2x250xf32>
    %c0_176 = arith.constant 0 : index
    %c2_177 = arith.constant 2 : index
    %359 = memref.load %arg5[%c0_176, %c2_177] : memref<4x12xf32, #tpu.memory_space<smem>>
    %360 = vector.broadcast %359 : f32 to vector<2x250xf32>
    %361 = arith.mulf %360, %342 : vector<2x250xf32>
    %362 = arith.addf %358, %361 : vector<2x250xf32>
    %c0_178 = arith.constant 0 : index
    %c3_179 = arith.constant 3 : index
    %363 = memref.load %arg5[%c0_178, %c3_179] : memref<4x12xf32, #tpu.memory_space<smem>>
    %364 = vector.broadcast %363 : f32 to vector<2x250xf32>
    %365 = arith.mulf %364, %344 : vector<2x250xf32>
    %c0_180 = arith.constant 0 : index
    %c4_181 = arith.constant 4 : index
    %366 = memref.load %arg5[%c0_180, %c4_181] : memref<4x12xf32, #tpu.memory_space<smem>>
    %367 = vector.broadcast %366 : f32 to vector<2x250xf32>
    %368 = arith.mulf %367, %235 : vector<2x250xf32>
    %369 = arith.addf %365, %368 : vector<2x250xf32>
    %c0_182 = arith.constant 0 : index
    %c5_183 = arith.constant 5 : index
    %370 = memref.load %arg5[%c0_182, %c5_183] : memref<4x12xf32, #tpu.memory_space<smem>>
    %371 = vector.broadcast %370 : f32 to vector<2x250xf32>
    %372 = arith.mulf %371, %345 : vector<2x250xf32>
    %373 = arith.addf %369, %372 : vector<2x250xf32>
    %374 = arith.addf %362, %373 : vector<2x250xf32>
    %c0_184 = arith.constant 0 : index
    %c6_185 = arith.constant 6 : index
    %375 = memref.load %arg5[%c0_184, %c6_185] : memref<4x12xf32, #tpu.memory_space<smem>>
    %376 = vector.broadcast %375 : f32 to vector<2x250xf32>
    %377 = arith.mulf %376, %347 : vector<2x250xf32>
    %c0_186 = arith.constant 0 : index
    %c7_187 = arith.constant 7 : index
    %378 = memref.load %arg5[%c0_186, %c7_187] : memref<4x12xf32, #tpu.memory_space<smem>>
    %379 = vector.broadcast %378 : f32 to vector<2x250xf32>
    %380 = arith.mulf %379, %287 : vector<2x250xf32>
    %381 = arith.addf %377, %380 : vector<2x250xf32>
    %c0_188 = arith.constant 0 : index
    %c8_189 = arith.constant 8 : index
    %382 = memref.load %arg5[%c0_188, %c8_189] : memref<4x12xf32, #tpu.memory_space<smem>>
    %383 = vector.broadcast %382 : f32 to vector<2x250xf32>
    %384 = arith.mulf %383, %348 : vector<2x250xf32>
    %385 = arith.addf %381, %384 : vector<2x250xf32>
    %386 = arith.addf %374, %385 : vector<2x250xf32>
    %c0_190 = arith.constant 0 : index
    %c9_191 = arith.constant 9 : index
    %387 = memref.load %arg5[%c0_190, %c9_191] : memref<4x12xf32, #tpu.memory_space<smem>>
    %388 = vector.broadcast %387 : f32 to vector<2x250xf32>
    %389 = arith.mulf %388, %350 : vector<2x250xf32>
    %c0_192 = arith.constant 0 : index
    %c10_193 = arith.constant 10 : index
    %390 = memref.load %arg5[%c0_192, %c10_193] : memref<4x12xf32, #tpu.memory_space<smem>>
    %391 = vector.broadcast %390 : f32 to vector<2x250xf32>
    %392 = arith.mulf %391, %339 : vector<2x250xf32>
    %393 = arith.addf %389, %392 : vector<2x250xf32>
    %c0_194 = arith.constant 0 : index
    %c11_195 = arith.constant 11 : index
    %394 = memref.load %arg5[%c0_194, %c11_195] : memref<4x12xf32, #tpu.memory_space<smem>>
    %395 = vector.broadcast %394 : f32 to vector<2x250xf32>
    %396 = arith.mulf %395, %351 : vector<2x250xf32>
    %397 = arith.addf %393, %396 : vector<2x250xf32>
    %398 = arith.addf %386, %397 : vector<2x250xf32>
    %c0_196 = arith.constant 0 : index
    %399 = memref.load %arg6[%c0_196] : memref<4xf32, #tpu.memory_space<smem>>
    %400 = vector.broadcast %399 : f32 to vector<2x250xf32>
    %401 = arith.addf %398, %400 : vector<2x250xf32>
    %cst_197 = arith.constant 0.000000e+00 : f32
    %402 = vector.broadcast %cst_197 : f32 to vector<2x250xf32>
    %403 = arith.maximumf %401, %402 : vector<2x250xf32>
    %c1_198 = arith.constant 1 : index
    %c0_199 = arith.constant 0 : index
    %404 = memref.load %arg5[%c1_198, %c0_199] : memref<4x12xf32, #tpu.memory_space<smem>>
    %405 = vector.broadcast %404 : f32 to vector<2x250xf32>
    %406 = arith.mulf %405, %341 : vector<2x250xf32>
    %c1_200 = arith.constant 1 : index
    %c1_201 = arith.constant 1 : index
    %407 = memref.load %arg5[%c1_200, %c1_201] : memref<4x12xf32, #tpu.memory_space<smem>>
    %408 = vector.broadcast %407 : f32 to vector<2x250xf32>
    %409 = arith.mulf %408, %183 : vector<2x250xf32>
    %410 = arith.addf %406, %409 : vector<2x250xf32>
    %c1_202 = arith.constant 1 : index
    %c2_203 = arith.constant 2 : index
    %411 = memref.load %arg5[%c1_202, %c2_203] : memref<4x12xf32, #tpu.memory_space<smem>>
    %412 = vector.broadcast %411 : f32 to vector<2x250xf32>
    %413 = arith.mulf %412, %342 : vector<2x250xf32>
    %414 = arith.addf %410, %413 : vector<2x250xf32>
    %c1_204 = arith.constant 1 : index
    %c3_205 = arith.constant 3 : index
    %415 = memref.load %arg5[%c1_204, %c3_205] : memref<4x12xf32, #tpu.memory_space<smem>>
    %416 = vector.broadcast %415 : f32 to vector<2x250xf32>
    %417 = arith.mulf %416, %344 : vector<2x250xf32>
    %c1_206 = arith.constant 1 : index
    %c4_207 = arith.constant 4 : index
    %418 = memref.load %arg5[%c1_206, %c4_207] : memref<4x12xf32, #tpu.memory_space<smem>>
    %419 = vector.broadcast %418 : f32 to vector<2x250xf32>
    %420 = arith.mulf %419, %235 : vector<2x250xf32>
    %421 = arith.addf %417, %420 : vector<2x250xf32>
    %c1_208 = arith.constant 1 : index
    %c5_209 = arith.constant 5 : index
    %422 = memref.load %arg5[%c1_208, %c5_209] : memref<4x12xf32, #tpu.memory_space<smem>>
    %423 = vector.broadcast %422 : f32 to vector<2x250xf32>
    %424 = arith.mulf %423, %345 : vector<2x250xf32>
    %425 = arith.addf %421, %424 : vector<2x250xf32>
    %426 = arith.addf %414, %425 : vector<2x250xf32>
    %c1_210 = arith.constant 1 : index
    %c6_211 = arith.constant 6 : index
    %427 = memref.load %arg5[%c1_210, %c6_211] : memref<4x12xf32, #tpu.memory_space<smem>>
    %428 = vector.broadcast %427 : f32 to vector<2x250xf32>
    %429 = arith.mulf %428, %347 : vector<2x250xf32>
    %c1_212 = arith.constant 1 : index
    %c7_213 = arith.constant 7 : index
    %430 = memref.load %arg5[%c1_212, %c7_213] : memref<4x12xf32, #tpu.memory_space<smem>>
    %431 = vector.broadcast %430 : f32 to vector<2x250xf32>
    %432 = arith.mulf %431, %287 : vector<2x250xf32>
    %433 = arith.addf %429, %432 : vector<2x250xf32>
    %c1_214 = arith.constant 1 : index
    %c8_215 = arith.constant 8 : index
    %434 = memref.load %arg5[%c1_214, %c8_215] : memref<4x12xf32, #tpu.memory_space<smem>>
    %435 = vector.broadcast %434 : f32 to vector<2x250xf32>
    %436 = arith.mulf %435, %348 : vector<2x250xf32>
    %437 = arith.addf %433, %436 : vector<2x250xf32>
    %438 = arith.addf %426, %437 : vector<2x250xf32>
    %c1_216 = arith.constant 1 : index
    %c9_217 = arith.constant 9 : index
    %439 = memref.load %arg5[%c1_216, %c9_217] : memref<4x12xf32, #tpu.memory_space<smem>>
    %440 = vector.broadcast %439 : f32 to vector<2x250xf32>
    %441 = arith.mulf %440, %350 : vector<2x250xf32>
    %c1_218 = arith.constant 1 : index
    %c10_219 = arith.constant 10 : index
    %442 = memref.load %arg5[%c1_218, %c10_219] : memref<4x12xf32, #tpu.memory_space<smem>>
    %443 = vector.broadcast %442 : f32 to vector<2x250xf32>
    %444 = arith.mulf %443, %339 : vector<2x250xf32>
    %445 = arith.addf %441, %444 : vector<2x250xf32>
    %c1_220 = arith.constant 1 : index
    %c11_221 = arith.constant 11 : index
    %446 = memref.load %arg5[%c1_220, %c11_221] : memref<4x12xf32, #tpu.memory_space<smem>>
    %447 = vector.broadcast %446 : f32 to vector<2x250xf32>
    %448 = arith.mulf %447, %351 : vector<2x250xf32>
    %449 = arith.addf %445, %448 : vector<2x250xf32>
    %450 = arith.addf %438, %449 : vector<2x250xf32>
    %c1_222 = arith.constant 1 : index
    %451 = memref.load %arg6[%c1_222] : memref<4xf32, #tpu.memory_space<smem>>
    %452 = vector.broadcast %451 : f32 to vector<2x250xf32>
    %453 = arith.addf %450, %452 : vector<2x250xf32>
    %cst_223 = arith.constant 0.000000e+00 : f32
    %454 = vector.broadcast %cst_223 : f32 to vector<2x250xf32>
    %455 = arith.maximumf %453, %454 : vector<2x250xf32>
    %c2_224 = arith.constant 2 : index
    %c0_225 = arith.constant 0 : index
    %456 = memref.load %arg5[%c2_224, %c0_225] : memref<4x12xf32, #tpu.memory_space<smem>>
    %457 = vector.broadcast %456 : f32 to vector<2x250xf32>
    %458 = arith.mulf %457, %341 : vector<2x250xf32>
    %c2_226 = arith.constant 2 : index
    %c1_227 = arith.constant 1 : index
    %459 = memref.load %arg5[%c2_226, %c1_227] : memref<4x12xf32, #tpu.memory_space<smem>>
    %460 = vector.broadcast %459 : f32 to vector<2x250xf32>
    %461 = arith.mulf %460, %183 : vector<2x250xf32>
    %462 = arith.addf %458, %461 : vector<2x250xf32>
    %c2_228 = arith.constant 2 : index
    %c2_229 = arith.constant 2 : index
    %463 = memref.load %arg5[%c2_228, %c2_229] : memref<4x12xf32, #tpu.memory_space<smem>>
    %464 = vector.broadcast %463 : f32 to vector<2x250xf32>
    %465 = arith.mulf %464, %342 : vector<2x250xf32>
    %466 = arith.addf %462, %465 : vector<2x250xf32>
    %c2_230 = arith.constant 2 : index
    %c3_231 = arith.constant 3 : index
    %467 = memref.load %arg5[%c2_230, %c3_231] : memref<4x12xf32, #tpu.memory_space<smem>>
    %468 = vector.broadcast %467 : f32 to vector<2x250xf32>
    %469 = arith.mulf %468, %344 : vector<2x250xf32>
    %c2_232 = arith.constant 2 : index
    %c4_233 = arith.constant 4 : index
    %470 = memref.load %arg5[%c2_232, %c4_233] : memref<4x12xf32, #tpu.memory_space<smem>>
    %471 = vector.broadcast %470 : f32 to vector<2x250xf32>
    %472 = arith.mulf %471, %235 : vector<2x250xf32>
    %473 = arith.addf %469, %472 : vector<2x250xf32>
    %c2_234 = arith.constant 2 : index
    %c5_235 = arith.constant 5 : index
    %474 = memref.load %arg5[%c2_234, %c5_235] : memref<4x12xf32, #tpu.memory_space<smem>>
    %475 = vector.broadcast %474 : f32 to vector<2x250xf32>
    %476 = arith.mulf %475, %345 : vector<2x250xf32>
    %477 = arith.addf %473, %476 : vector<2x250xf32>
    %478 = arith.addf %466, %477 : vector<2x250xf32>
    %c2_236 = arith.constant 2 : index
    %c6_237 = arith.constant 6 : index
    %479 = memref.load %arg5[%c2_236, %c6_237] : memref<4x12xf32, #tpu.memory_space<smem>>
    %480 = vector.broadcast %479 : f32 to vector<2x250xf32>
    %481 = arith.mulf %480, %347 : vector<2x250xf32>
    %c2_238 = arith.constant 2 : index
    %c7_239 = arith.constant 7 : index
    %482 = memref.load %arg5[%c2_238, %c7_239] : memref<4x12xf32, #tpu.memory_space<smem>>
    %483 = vector.broadcast %482 : f32 to vector<2x250xf32>
    %484 = arith.mulf %483, %287 : vector<2x250xf32>
    %485 = arith.addf %481, %484 : vector<2x250xf32>
    %c2_240 = arith.constant 2 : index
    %c8_241 = arith.constant 8 : index
    %486 = memref.load %arg5[%c2_240, %c8_241] : memref<4x12xf32, #tpu.memory_space<smem>>
    %487 = vector.broadcast %486 : f32 to vector<2x250xf32>
    %488 = arith.mulf %487, %348 : vector<2x250xf32>
    %489 = arith.addf %485, %488 : vector<2x250xf32>
    %490 = arith.addf %478, %489 : vector<2x250xf32>
    %c2_242 = arith.constant 2 : index
    %c9_243 = arith.constant 9 : index
    %491 = memref.load %arg5[%c2_242, %c9_243] : memref<4x12xf32, #tpu.memory_space<smem>>
    %492 = vector.broadcast %491 : f32 to vector<2x250xf32>
    %493 = arith.mulf %492, %350 : vector<2x250xf32>
    %c2_244 = arith.constant 2 : index
    %c10_245 = arith.constant 10 : index
    %494 = memref.load %arg5[%c2_244, %c10_245] : memref<4x12xf32, #tpu.memory_space<smem>>
    %495 = vector.broadcast %494 : f32 to vector<2x250xf32>
    %496 = arith.mulf %495, %339 : vector<2x250xf32>
    %497 = arith.addf %493, %496 : vector<2x250xf32>
    %c2_246 = arith.constant 2 : index
    %c11_247 = arith.constant 11 : index
    %498 = memref.load %arg5[%c2_246, %c11_247] : memref<4x12xf32, #tpu.memory_space<smem>>
    %499 = vector.broadcast %498 : f32 to vector<2x250xf32>
    %500 = arith.mulf %499, %351 : vector<2x250xf32>
    %501 = arith.addf %497, %500 : vector<2x250xf32>
    %502 = arith.addf %490, %501 : vector<2x250xf32>
    %c2_248 = arith.constant 2 : index
    %503 = memref.load %arg6[%c2_248] : memref<4xf32, #tpu.memory_space<smem>>
    %504 = vector.broadcast %503 : f32 to vector<2x250xf32>
    %505 = arith.addf %502, %504 : vector<2x250xf32>
    %cst_249 = arith.constant 0.000000e+00 : f32
    %506 = vector.broadcast %cst_249 : f32 to vector<2x250xf32>
    %507 = arith.maximumf %505, %506 : vector<2x250xf32>
    %c3_250 = arith.constant 3 : index
    %c0_251 = arith.constant 0 : index
    %508 = memref.load %arg5[%c3_250, %c0_251] : memref<4x12xf32, #tpu.memory_space<smem>>
    %509 = vector.broadcast %508 : f32 to vector<2x250xf32>
    %510 = arith.mulf %509, %341 : vector<2x250xf32>
    %c3_252 = arith.constant 3 : index
    %c1_253 = arith.constant 1 : index
    %511 = memref.load %arg5[%c3_252, %c1_253] : memref<4x12xf32, #tpu.memory_space<smem>>
    %512 = vector.broadcast %511 : f32 to vector<2x250xf32>
    %513 = arith.mulf %512, %183 : vector<2x250xf32>
    %514 = arith.addf %510, %513 : vector<2x250xf32>
    %c3_254 = arith.constant 3 : index
    %c2_255 = arith.constant 2 : index
    %515 = memref.load %arg5[%c3_254, %c2_255] : memref<4x12xf32, #tpu.memory_space<smem>>
    %516 = vector.broadcast %515 : f32 to vector<2x250xf32>
    %517 = arith.mulf %516, %342 : vector<2x250xf32>
    %518 = arith.addf %514, %517 : vector<2x250xf32>
    %c3_256 = arith.constant 3 : index
    %c3_257 = arith.constant 3 : index
    %519 = memref.load %arg5[%c3_256, %c3_257] : memref<4x12xf32, #tpu.memory_space<smem>>
    %520 = vector.broadcast %519 : f32 to vector<2x250xf32>
    %521 = arith.mulf %520, %344 : vector<2x250xf32>
    %c3_258 = arith.constant 3 : index
    %c4_259 = arith.constant 4 : index
    %522 = memref.load %arg5[%c3_258, %c4_259] : memref<4x12xf32, #tpu.memory_space<smem>>
    %523 = vector.broadcast %522 : f32 to vector<2x250xf32>
    %524 = arith.mulf %523, %235 : vector<2x250xf32>
    %525 = arith.addf %521, %524 : vector<2x250xf32>
    %c3_260 = arith.constant 3 : index
    %c5_261 = arith.constant 5 : index
    %526 = memref.load %arg5[%c3_260, %c5_261] : memref<4x12xf32, #tpu.memory_space<smem>>
    %527 = vector.broadcast %526 : f32 to vector<2x250xf32>
    %528 = arith.mulf %527, %345 : vector<2x250xf32>
    %529 = arith.addf %525, %528 : vector<2x250xf32>
    %530 = arith.addf %518, %529 : vector<2x250xf32>
    %c3_262 = arith.constant 3 : index
    %c6_263 = arith.constant 6 : index
    %531 = memref.load %arg5[%c3_262, %c6_263] : memref<4x12xf32, #tpu.memory_space<smem>>
    %532 = vector.broadcast %531 : f32 to vector<2x250xf32>
    %533 = arith.mulf %532, %347 : vector<2x250xf32>
    %c3_264 = arith.constant 3 : index
    %c7_265 = arith.constant 7 : index
    %534 = memref.load %arg5[%c3_264, %c7_265] : memref<4x12xf32, #tpu.memory_space<smem>>
    %535 = vector.broadcast %534 : f32 to vector<2x250xf32>
    %536 = arith.mulf %535, %287 : vector<2x250xf32>
    %537 = arith.addf %533, %536 : vector<2x250xf32>
    %c3_266 = arith.constant 3 : index
    %c8_267 = arith.constant 8 : index
    %538 = memref.load %arg5[%c3_266, %c8_267] : memref<4x12xf32, #tpu.memory_space<smem>>
    %539 = vector.broadcast %538 : f32 to vector<2x250xf32>
    %540 = arith.mulf %539, %348 : vector<2x250xf32>
    %541 = arith.addf %537, %540 : vector<2x250xf32>
    %542 = arith.addf %530, %541 : vector<2x250xf32>
    %c3_268 = arith.constant 3 : index
    %c9_269 = arith.constant 9 : index
    %543 = memref.load %arg5[%c3_268, %c9_269] : memref<4x12xf32, #tpu.memory_space<smem>>
    %544 = vector.broadcast %543 : f32 to vector<2x250xf32>
    %545 = arith.mulf %544, %350 : vector<2x250xf32>
    %c3_270 = arith.constant 3 : index
    %c10_271 = arith.constant 10 : index
    %546 = memref.load %arg5[%c3_270, %c10_271] : memref<4x12xf32, #tpu.memory_space<smem>>
    %547 = vector.broadcast %546 : f32 to vector<2x250xf32>
    %548 = arith.mulf %547, %339 : vector<2x250xf32>
    %549 = arith.addf %545, %548 : vector<2x250xf32>
    %c3_272 = arith.constant 3 : index
    %c11_273 = arith.constant 11 : index
    %550 = memref.load %arg5[%c3_272, %c11_273] : memref<4x12xf32, #tpu.memory_space<smem>>
    %551 = vector.broadcast %550 : f32 to vector<2x250xf32>
    %552 = arith.mulf %551, %351 : vector<2x250xf32>
    %553 = arith.addf %549, %552 : vector<2x250xf32>
    %554 = arith.addf %542, %553 : vector<2x250xf32>
    %c3_274 = arith.constant 3 : index
    %555 = memref.load %arg6[%c3_274] : memref<4xf32, #tpu.memory_space<smem>>
    %556 = vector.broadcast %555 : f32 to vector<2x250xf32>
    %557 = arith.addf %554, %556 : vector<2x250xf32>
    %cst_275 = arith.constant 0.000000e+00 : f32
    %558 = vector.broadcast %cst_275 : f32 to vector<2x250xf32>
    %559 = arith.maximumf %557, %558 : vector<2x250xf32>
    %c0_276 = arith.constant 0 : index
    %c0_277 = arith.constant 0 : index
    %c0_278 = arith.constant 0 : index
    %560 = vector.load %arg7[%c0_276, %c0_277, %c0_278] : memref<4x250x512xf32, #tpu.memory_space<vmem>>, vector<1x250x512xf32>
    %561 = vector.shape_cast %560 : vector<1x250x512xf32> to vector<250x512xf32>
    %cst_279 = arith.constant dense<0.000000e+00> : vector<2x512xf32>
    %562 = tpu.matmul %403, %561, %cst_279 {dimension_numbers = #tpu.dot_dimension_numbers<[1], [0], [0], [1], [0, 0, 1, 1], [], []>} : vector<2x250xf32>, vector<250x512xf32>, vector<2x512xf32> -> vector<2x512xf32>
    %c1_280 = arith.constant 1 : index
    %c0_281 = arith.constant 0 : index
    %c0_282 = arith.constant 0 : index
    %563 = vector.load %arg7[%c1_280, %c0_281, %c0_282] : memref<4x250x512xf32, #tpu.memory_space<vmem>>, vector<1x250x512xf32>
    %564 = vector.shape_cast %563 : vector<1x250x512xf32> to vector<250x512xf32>
    %cst_283 = arith.constant dense<0.000000e+00> : vector<2x512xf32>
    %565 = tpu.matmul %455, %564, %cst_283 {dimension_numbers = #tpu.dot_dimension_numbers<[1], [0], [0], [1], [0, 0, 1, 1], [], []>} : vector<2x250xf32>, vector<250x512xf32>, vector<2x512xf32> -> vector<2x512xf32>
    %566 = arith.addf %562, %565 : vector<2x512xf32>
    %c2_284 = arith.constant 2 : index
    %c0_285 = arith.constant 0 : index
    %c0_286 = arith.constant 0 : index
    %567 = vector.load %arg7[%c2_284, %c0_285, %c0_286] : memref<4x250x512xf32, #tpu.memory_space<vmem>>, vector<1x250x512xf32>
    %568 = vector.shape_cast %567 : vector<1x250x512xf32> to vector<250x512xf32>
    %cst_287 = arith.constant dense<0.000000e+00> : vector<2x512xf32>
    %569 = tpu.matmul %507, %568, %cst_287 {dimension_numbers = #tpu.dot_dimension_numbers<[1], [0], [0], [1], [0, 0, 1, 1], [], []>} : vector<2x250xf32>, vector<250x512xf32>, vector<2x512xf32> -> vector<2x512xf32>
    %570 = arith.addf %566, %569 : vector<2x512xf32>
    %c3_288 = arith.constant 3 : index
    %c0_289 = arith.constant 0 : index
    %c0_290 = arith.constant 0 : index
    %571 = vector.load %arg7[%c3_288, %c0_289, %c0_290] : memref<4x250x512xf32, #tpu.memory_space<vmem>>, vector<1x250x512xf32>
    %572 = vector.shape_cast %571 : vector<1x250x512xf32> to vector<250x512xf32>
    %cst_291 = arith.constant dense<0.000000e+00> : vector<2x512xf32>
    %573 = tpu.matmul %559, %572, %cst_291 {dimension_numbers = #tpu.dot_dimension_numbers<[1], [0], [0], [1], [0, 0, 1, 1], [], []>} : vector<2x250xf32>, vector<250x512xf32>, vector<2x512xf32> -> vector<2x512xf32>
    %574 = arith.addf %570, %573 : vector<2x512xf32>
    %c0_292 = arith.constant 0 : index
    %c0_293 = arith.constant 0 : index
    %575 = vector.load %arg8[%c0_292, %c0_293] : memref<1x512xf32, #tpu.memory_space<vmem>>, vector<1x512xf32>
    %576 = vector.broadcast %575 : vector<1x512xf32> to vector<2x512xf32>
    %577 = arith.addf %574, %576 : vector<2x512xf32>
    %cst_294 = arith.constant 0.000000e+00 : f32
    %578 = vector.broadcast %cst_294 : f32 to vector<2x512xf32>
    %579 = arith.maximumf %577, %578 : vector<2x512xf32>
    %c0_295 = arith.constant 0 : index
    %c0_296 = arith.constant 0 : index
    %580 = vector.load %arg9[%c0_295, %c0_296] : memref<512x256xf32, #tpu.memory_space<vmem>>, vector<512x256xf32>
    %cst_297 = arith.constant dense<0.000000e+00> : vector<2x256xf32>
    %581 = tpu.matmul %579, %580, %cst_297 {dimension_numbers = #tpu.dot_dimension_numbers<[1], [0], [0], [1], [0, 0, 1, 1], [], []>} : vector<2x512xf32>, vector<512x256xf32>, vector<2x256xf32> -> vector<2x256xf32>
    %c0_298 = arith.constant 0 : index
    %c0_299 = arith.constant 0 : index
    %582 = vector.load %arg10[%c0_298, %c0_299] : memref<1x256xf32, #tpu.memory_space<vmem>>, vector<1x256xf32>
    %583 = vector.broadcast %582 : vector<1x256xf32> to vector<2x256xf32>
    %584 = arith.addf %581, %583 : vector<2x256xf32>
    %cst_300 = arith.constant 0.000000e+00 : f32
    %585 = vector.broadcast %cst_300 : f32 to vector<2x256xf32>
    %586 = arith.maximumf %584, %585 : vector<2x256xf32>
    %c0_301 = arith.constant 0 : index
    %c0_302 = arith.constant 0 : index
    %587 = vector.load %arg11[%c0_301, %c0_302] : memref<256x128xf32, #tpu.memory_space<vmem>>, vector<256x128xf32>
    %cst_303 = arith.constant dense<0.000000e+00> : vector<2x128xf32>
    %588 = tpu.matmul %586, %587, %cst_303 {dimension_numbers = #tpu.dot_dimension_numbers<[1], [0], [0], [1], [0, 0, 1, 1], [], []>} : vector<2x256xf32>, vector<256x128xf32>, vector<2x128xf32> -> vector<2x128xf32>
    %c0_304 = arith.constant 0 : index
    %c0_305 = arith.constant 0 : index
    %589 = vector.load %arg12[%c0_304, %c0_305] : memref<1x128xf32, #tpu.memory_space<vmem>>, vector<1x128xf32>
    %590 = vector.broadcast %589 : vector<1x128xf32> to vector<2x128xf32>
    %591 = arith.addf %588, %590 : vector<2x128xf32>
    %cst_306 = arith.constant 0.000000e+00 : f32
    %592 = vector.broadcast %cst_306 : f32 to vector<2x128xf32>
    %593 = arith.maximumf %591, %592 : vector<2x128xf32>
    %c0_307 = arith.constant 0 : index
    %c0_308 = arith.constant 0 : index
    %594 = vector.load %arg13[%c0_307, %c0_308] : memref<128x1xf32, #tpu.memory_space<vmem>>, vector<128x1xf32>
    %cst_309 = arith.constant dense<0.000000e+00> : vector<2x1xf32>
    %595 = tpu.matmul %593, %594, %cst_309 {dimension_numbers = #tpu.dot_dimension_numbers<[1], [0], [0], [1], [0, 0, 1, 1], [], []>} : vector<2x128xf32>, vector<128x1xf32>, vector<2x1xf32> -> vector<2x1xf32>
    %c0_310 = arith.constant 0 : index
    %c0_311 = arith.constant 0 : index
    %596 = vector.load %arg14[%c0_310, %c0_311] : memref<1x1xf32, #tpu.memory_space<vmem>>, vector<1x1xf32>
    %597 = vector.broadcast %596 : vector<1x1xf32> to vector<2x1xf32>
    %598 = arith.addf %595, %597 : vector<2x1xf32>
    %cst_312 = arith.constant 0.000000e+00 : f32
    %599 = vector.broadcast %cst_312 : f32 to vector<2x1xf32>
    %600 = arith.maximumf %598, %599 : vector<2x1xf32>
    %c0_313 = arith.constant 0 : index
    %c0_314 = arith.constant 0 : index
    %601 = vector.load %arg15[%c0_313, %c0_314] : memref<2x1xf32, #tpu.memory_space<vmem>>, vector<2x1xf32>
    tpu.vector_store %arg15[%c0_313, %c0_314], %600 {strides = array<i32>} : memref<2x1xf32, #tpu.memory_space<vmem>>, vector<2x1xf32>,
    return
  }
}

</mosaic_0001>

<bundles_post_ra>
// kernel: forward.1
= control target key start
LH: loop header
LB: loop body
LE: loop exit
PB: predicated region body
PF: predicated region fallthrough
CT: control target
= control target key end

     0   :  { %s6186_s0 = inlined_call_operand.vmem [shape: f32[4,2,250], index: 0, kind: input, shape index: {}]   ;;  %s6187_s1 = inlined_call_operand.vmem [shape: f32[4,3], index: 1, kind: input, shape index: {}]   ;;  %s6188_s2 = inlined_call_operand.vmem [shape: f32[4], index: 2, kind: input, shape index: {}]   ;;  %s6189_s3 = inlined_call_operand.vmem [shape: f32[4,12], index: 3, kind: input, shape index: {}]   ;;  %s6190_s4 = inlined_call_operand.vmem [shape: f32[4], index: 4, kind: input, shape index: {}]   ;;  %s6191_s5 = inlined_call_operand.vmem [shape: f32[4,12], index: 5, kind: input, shape index: {}]   ;;  %s6192_s6 = inlined_call_operand.vmem [shape: f32[4], index: 6, kind: input, shape index: {}]   ;;  %s6193_s7 = inlined_call_operand.vmem [shape: f32[4,250,512], index: 7, kind: input, shape index: {}]   ;;  %s6194_s8 = inlined_call_operand.vmem [shape: f32[1,512], index: 8, kind: input, shape index: {}]   ;;  %s6195_s9 = inlined_call_operand.vmem [shape: f32[512,256], index: 9, kind: input, shape index: {}]   ;;  %s6196_s10 = inlined_call_operand.vmem [shape: f32[1,256], index: 10, kind: input, shape index: {}]   ;;  %s6197_s11 = inlined_call_operand.vmem [shape: f32[256,128], index: 11, kind: input, shape index: {}]   ;;  %s6198_s12 = inlined_call_operand.vmem [shape: f32[1,128], index: 12, kind: input, shape index: {}]   ;;  %s6199_s13 = inlined_call_operand.vmem [shape: f32[128,1], index: 13, kind: input, shape index: {}]   ;;  %s6200_s14 = inlined_call_operand.<no memory space> [shape: f32[1,1], index: 14, kind: input, shape index: {}]   ;;  %s6201_s15 = inlined_call_operand.vmem [shape: f32[2,1], index: 15, kind: output, shape index: {}]  }
   0x1   :  { %v20_v0 = vstv %s6200_s14 }
   0x2   :  { %21 = vst [vmem:[#allocation3] sm:$0x1] %v20_v0 }
   0x3   :  { %22 = vsyncpa [#allocation5], 0 }
   0x4   :  { %23 = vsyncpa [#allocation7], 0 }
   0x5   :  { %24 = vsyncpa [#allocation10], 0  ;;  %s42_s22 = sshll.u32 %s6188_s2, 4  ;;  %s43_s22 = int_to_ptr.vmem [resolvable:$true] %s42_s22 }
   0x6   :  { %25 = vsyncpa [#allocation13], 0  ;;  %s60_s25 = sshll.u32 %s6190_s4, 4  ;;  %s3264_s26 = smov [#allocation6]   ;;  %s61_s25 = int_to_ptr.vmem [resolvable:$true] %s60_s25 }
   0x7   :  { %45 = dma.vmem_to_smem %s43_s22, 16, %s3264_s26, [#allocation7]  }
   0x8   :  { %s3265_s27 = smov [#allocation9]   ;;  %s33_s29 = sshll.u32 %s6187_s1, 4  ;;  %s34_s29 = int_to_ptr.vmem [resolvable:$true] %s33_s29 }
   0x9   :  { %63 = dma.vmem_to_smem %s61_s25, 16, %s3265_s27, [#allocation10]  }
   0xa   :  { %s51_s2 = sshll.u32 %s6189_s3, 4  ;;  %s3266_s17 = smov [#allocation4]   ;;  %s52_s2 = int_to_ptr.vmem [resolvable:$true] %s51_s2 }
   0xb   :  { %36 = dma.vmem_to_smem %s34_s29, 64, %s3266_s17, [#allocation5]  }
   0xc   :  { %s3267_s18 = smov [#allocation8]   ;;  %s69_s20 = sshll.u32 %s6191_s5, 4  ;;  %s70_s20 = int_to_ptr.vmem [resolvable:$true] %s69_s20 }
   0xd   :  { %54 = dma.vmem_to_smem %s52_s2, 64, %s3267_s18, [#allocation7]  }
   0xe   :  { %s78_s23 = sshll.u32 %s6192_s6, 4  ;;  %s3268_s1 = smov [#allocation11]   ;;  %s79_s23 = int_to_ptr.vmem [resolvable:$true] %s78_s23 }
   0xf   :  { %72 = dma.vmem_to_smem %s70_s20, 64, %s3268_s1, [#allocation10]  }
  0x10   :  { %s3269_s24 = smov [#allocation12]  }
  0x11   :  { %81 = dma.vmem_to_smem %s79_s23, 16, %s3269_s24, [#allocation13]  }
  0x12   :  { %3256 = dma.done.wait [#allocation5], 64  }
  0x13   :  { %3257 = vsyncadd [#allocation5], 4294967232 }
  0x14   :  { %3258 = dma.done.wait [#allocation7], 80  }
  0x15   :  { %3259 = vsyncadd [#allocation7], 4294967216 }
  0x16   :  { %3260 = dma.done.wait [#allocation10], 80  }
  0x17   :  { %3261 = vsyncadd [#allocation10], 4294967216 }
  0x18   :  { %3262 = dma.done.wait [#allocation13], 16  }
  0x19   :  { %3263 = vsyncadd [#allocation13], 4294967280 }
  0x1a   :  { %122 = sfence }
  0x1b   :  { %vm133_vm0 = vcmask 1041408   ;;  %vm134_vm1 = vcmask 994306   ;;  %s3375_s3 = sld [smem:[#allocation4 + $0x2]]  ;;  %v3380_v1 = vld [vmem:[%s6186_s0 + $0xc] sm:$0xf]  ;;  %v3270_v3 = vmov 0.0  }
  0x1c   :  { %vm3383_vm2 = vmor %vm134_vm1, %vm133_vm0  ;;  %123 = vst [vmem:[#allocation2] sm:$0xff] %v3270_v3  ;;  %s3387_s25 = sld [smem:[#allocation4 + $0x100]]  ;;  %v3394_v4 = vld [vmem:[%s6186_s0 + $0x4] sm:$0xf]  ;;  %v3405_v6 = vld [vmem:[%s6186_s0] sm:$0xf] }
  0x1d   :  { %124 = vst [vmem:[#allocation2 + $0x8] sm:$0xff] %v3270_v3  ;;  %s2649_s26 = sld [smem:[#allocation4 + $0x101]]  ;;  %v3416_v9 = vld [vmem:[%s6186_s0 + $0x8] sm:$0xf]  ;;  %s3271_s21 = smov 127   ;;  %vm150_vm3 = vcmask 1039360  }
  0x1e   :  { %125 = vst [vmem:[#allocation2 + $0x10] sm:$0xff] %v3270_v3  ;;  %s3389_s27 = sld [smem:[#allocation4]]  ;;  %vm587_vm4 = vcmask 7168   ;;  %vm634_vm5 = vcmask 1031168   ;;  %vm1192_vm6 = vcmask 998400   ;;  %vm2629_vm7 = vcmask 1024  }
  0x1f   :  { %136 = vst.msk [vmem:[#allocation2 + $0x12] sm:$0xf] %vm3383_vm2, %v3380_v1  ;;  %s2642_s29 = sld [smem:[#allocation4 + $0x1]] }
  0x20   :  { %s3399_s30 = sld [smem:[#allocation6]] }
  0x21   :  { %v154_v5 = vstv %s3375_s3  ;;  %s3407_s17 = sld [smem:[#allocation4 + $0x82]] }
  0x22   :  { %v155_v7 = vmul.f32 %v3394_v4, %v154_v5  ;;  %v211_v8 = vstv %s3387_s25  ;;  %s3411_s18 = sld [smem:[#allocation4 + $0x102]]  ;;  %v169_v17 = vmul.f32 %v3380_v1, %v154_v5 }
  0x23   :  { %v213_v10 = vstv %s2649_s26  ;;  %v234_v11 = vmul.f32 %v3394_v4, %v211_v8  ;;  %s3421_s20 = sld [smem:[#allocation6 + $0x2]] }
  0x24   :  { %157 = vrot.lane.b32.xlu1 %v155_v7, %s3271_s21  ;;  %v214_v12 = vmul.f32 %v213_v10, %v3405_v6  ;;  %v235_v13 = vmul.f32 %v3416_v9, %v213_v10  ;;  %v142_v14 = vstv %s3389_s27  ;;  %s3427_s22 = sld [smem:[#allocation4 + $0x80]] }
  0x25   :  { %v144_v15 = vstv %s2642_s29  ;;  %v166_v16 = vmul.f32 %v3394_v4, %v142_v14  ;;  %s2645_s0 = sld [smem:[#allocation4 + $0x81]] }
  0x26   :  { %216 = vrot.lane.b32.xlu2 %v214_v12, %s3271_s21  ;;  %v145_v18 = vmul.f32 %v144_v15, %v3405_v6  ;;  %v167_v19 = vmul.f32 %v3416_v9, %v144_v15  ;;  %s3436_s23 = sld [smem:[#allocation6 + $0x1]]  ;;  %v236_v20 = vadd.f32 %v235_v13, %v234_v11  ;;  %v163_v25 = vstv %s3399_s30 }
  0x27   :  { %v188_v21 = vstv %s3407_s17  ;;  %s3439_s1 = sld [smem:[#allocation4 + $0x182]] }
  0x28   :  { %v168_v22 = vadd.f32 %v167_v19, %v166_v16  ;;  %147 = vrot.lane.b32.xlu0 %v145_v18, %s3271_s21  ;;  %v189_v23 = vmul.f32 %v3394_v4, %v188_v21  ;;  %v222_v24 = vstv %s3411_s18  ;;  %s3444_s24 = sld [smem:[#allocation8 + $0x2]]  ;;  %v203_v35 = vmul.f32 %v3380_v1, %v188_v21 }
  0x29   :  { %v237_v26 = vmul.f32 %v3380_v1, %v222_v24  ;;  %s3448_s3 = sld [smem:[#allocation4 + $0x180]]  ;;  %v223_v28 = vmul.f32 %v3394_v4, %v222_v24  ;;  %v231_v29 = vstv %s3421_s20 }
  0x2a   :  { %v170_v27 = vadd.f32 %v169_v17, %v168_v22  ;;  %v177_v30 = vstv %s3427_s22  ;;  %s3453_s5 = sld [smem:[#allocation4 + $0x181]] }
  0x2b   :  { %v238_v31 = vadd.f32 %v237_v26, %v236_v20  ;;  %v179_v32 = vstv %s2645_s0  ;;  %v200_v33 = vmul.f32 %v3394_v4, %v177_v30  ;;  %s3467_s6 = sld [smem:[#allocation8 + $0x82]] }
  0x2c   :  { %v171_v34 = vadd.f32 %v170_v27, %v163_v25  ;;  %191 = vrot.lane.b32.xlu1 %v189_v23, %s3271_s21  ;;  %v180_v36 = vmul.f32 %v179_v32, %v3405_v6  ;;  %v201_v37 = vmul.f32 %v3416_v9, %v179_v32  ;;  %v197_v43 = vstv %s3436_s23  ;;  %s2672_s26 = sld [smem:[#allocation8 + $0x85]] }
  0x2d   :  { %v239_v38 = vadd.f32 %v238_v31, %v231_v29  ;;  %v256_v39 = vstv %s3439_s1  ;;  %s2660_s14 = sld [smem:[#allocation8 + $0x5]] }
  0x2e   :  { %v3469_v40 = vmax.f32 %v171_v34, 0.0  ;;  %225 = vrot.lane.b32.xlu2 %v223_v28, %s3271_s21  ;;  %v202_v41 = vadd.f32 %v201_v37, %v200_v33  ;;  %v291_v44 = vstv %s3444_s24  ;;  %v257_v46 = vmul.f32 %v3394_v4, %v256_v39  ;;  %s3490_s28 = sld [smem:[#allocation6 + $0x3]]  ;;  %v137_v33 = vld [vmem:[#allocation2 + $0x10] sm:$0x3f] }
  0x2f   :  { %v3472_v42 = vmax.f32 %v239_v38, 0.0  ;;  %v245_v47 = vstv %s3448_s3  ;;  %s2675_s29 = sld [smem:[#allocation8 + $0x88]]  ;;  %v271_v57 = vmul.f32 %v3380_v1, %v256_v39 }
  0x30   :  { %275 = vst.msk [vmem:[#allocation2 + $0x2] sm:$0xf] %vm3383_vm2, %v3469_v40  ;;  %v204_v45 = vadd.f32 %v203_v35, %v202_v41  ;;  %182 = vrot.lane.b32.xlu0 %v180_v36, %s3271_s21  ;;  %v247_v48 = vstv %s3453_s5  ;;  %v292_v50 = vmul.f32 %v291_v44, %v3469_v40  ;;  %v268_v53 = vmul.f32 %v3394_v4, %v245_v47  ;;  %s2682_s16 = sld [smem:[#allocation8 + $0x102]] }
  0x31   :  { %279 = vst.msk [vmem:[#allocation2 + $0xa] sm:$0xf] %vm3383_vm2, %v3472_v42  ;;  %v248_v52 = vmul.f32 %v247_v48, %v3405_v6  ;;  %v269_v54 = vmul.f32 %v3416_v9, %v247_v48  ;;  %v366_v55 = vstv %s3467_s6  ;;  %s2663_s2 = sld [smem:[#allocation8 + $0x8]]  ;;  %v143_v41 = vmul.f32 %v142_v14, %v137_v33 }
  0x32   :  { %v205_v49 = vadd.f32 %v204_v45, %v197_v43  ;;  %v383_v56 = vstv %s2672_s26  ;;  %v367_v59 = vmul.f32 %v366_v55, %v3469_v40  ;;  %s2666_s17 = sld [smem:[#allocation8 + $0xb]]  ;;  %v212_v45 = vmul.f32 %v211_v8, %v137_v33 }
  0x33   :  { %v270_v58 = vadd.f32 %v269_v54, %v268_v53  ;;  %v308_v60 = vstv %s2660_s14  ;;  %s2678_s18 = sld [smem:[#allocation8 + $0x8b]] }
  0x34   :  { %v206_v51 = vmax.f32 %v205_v49, 0.0  ;;  %259 = vrot.lane.b32.xlu1 %v257_v46, %s3271_s21  ;;  %v265_v0 = vstv %s3490_s28  ;;  %s2685_s4 = sld [smem:[#allocation8 + $0x105]] }
  0x35   :  { %v272_v62 = vadd.f32 %v271_v57, %v270_v58  ;;  %v401_v3 = vstv %s2675_s29  ;;  %s2695_s19 = sld [smem:[#allocation8 + $0x182]] }
  0x36   :  { %277 = vst.msk [vmem:[#allocation2 + $0x6] sm:$0xf] %vm3383_vm2, %v206_v51  ;;  %294 = vrot.lane.b32.xlu2 %v292_v50, %s3271_s21  ;;  %v384_v61 = vmul.f32 %v383_v56, %v206_v51  ;;  %v309_v63 = vmul.f32 %v308_v60, %v206_v51  ;;  %v441_v4 = vstv %s2682_s16  ;;  %v402_v5 = vmul.f32 %v401_v3, %v3472_v42  ;;  %s2698_s0 = sld [smem:[#allocation8 + $0x185]] }
  0x37   :  { %v273_v1 = vadd.f32 %v272_v62, %v265_v0  ;;  %v326_v6 = vstv %s2663_s2  ;;  %v442_v7 = vmul.f32 %v441_v4, %v3469_v40  ;;  %s2688_s1 = sld [smem:[#allocation8 + $0x108]] }
  0x38   :  { %250 = vrot.lane.b32.xlu0 %v248_v52, %s3271_s21  ;;  %v327_v10 = vmul.f32 %v326_v6, %v3472_v42  ;;  %v344_v11 = vstv %s2666_s17  ;;  %s2701_s24 = sld [smem:[#allocation8 + $0x188]]  ;;  %v178_v52 = vmul.f32 %v177_v30, %v137_v33  ;;  %v3582_v6 = vld [vmem:[#allocation2] sm:$0x3f] }
  0x39   :  { %v274_v9 = vmax.f32 %v273_v1, 0.0  ;;  %v419_v12 = vstv %s2678_s18  ;;  %s2704_s5 = sld [smem:[#allocation8 + $0x18b]] }
  0x3a   :  { %v458_v15 = vstv %s2685_s4  ;;  %s2691_s6 = sld [smem:[#allocation8 + $0x10b]] }
  0x3b   :  { %v345_v13 = vmul.f32 %v344_v11, %v274_v9  ;;  %v420_v16 = vmul.f32 %v419_v12, %v274_v9  ;;  %v459_v17 = vmul.f32 %v458_v15, %v206_v51  ;;  %v516_v18 = vstv %s2695_s19  ;;  %281 = vst.msk [vmem:[#allocation2 + $0xe] sm:$0xf] %vm3383_vm2, %v274_v9  ;;  %s3539_s26 = sld [smem:[#allocation8 + $0x81]] }
  0x3c   :  { %369 = vrot.lane.b32.xlu1 %v367_v59, %s3271_s21  ;;  %v533_v19 = vstv %s2698_s0  ;;  %v517_v20 = vmul.f32 %v516_v18, %v3469_v40  ;;  %s3544_s14 = sld [smem:[#allocation8 + $0x83]] }
  0x3d   :  { %v476_v21 = vstv %s2688_s1  ;;  %v534_v22 = vmul.f32 %v533_v19, %v206_v51  ;;  %s3546_s27 = sld [smem:[#allocation8 + $0x84]] }
  0x3e   :  { %386 = vrot.lane.b32.xlu2 %v384_v61, %s3271_s21  ;;  %v477_v23 = vmul.f32 %v476_v21, %v3472_v42  ;;  %v551_v24 = vstv %s2701_s24  ;;  %s3550_s29 = sld [smem:[#allocation8]] }
  0x3f   :  { %v569_v26 = vstv %s2704_s5  ;;  %v552_v27 = vmul.f32 %v551_v24, %v3472_v42  ;;  %s3553_s25 = sld [smem:[#allocation8 + $0x1]] }
  0x40   :  { %311 = vrot.lane.b32.xlu0 %v309_v63, %s3271_s21  ;;  %v494_v28 = vstv %s2691_s6  ;;  %v570_v31 = vmul.f32 %v569_v26, %v274_v9  ;;  %s3556_s16 = sld [smem:[#allocation8 + $0x3]] }
  0x41   :  { %v495_v32 = vmul.f32 %v494_v28, %v274_v9  ;;  %s3559_s22 = sld [smem:[#allocation8 + $0x4]]  ;;  %v362_v12 = vstv %s3539_s26 }
  0x42   :  { %s3561_s2 = sld [smem:[#allocation8 + $0x86]] }
  0x43   :  { %s3564_s17 = sld [smem:[#allocation8 + $0x87]]  ;;  %v379_v15 = vstv %s3546_s27 }
  0x44   :  { %404 = vrot.lane.b32.xlu1 %v402_v5, %s3271_s21  ;;  %s3568_s18 = sld [smem:[#allocation8 + $0x89]]  ;;  %v246_v5 = vmul.f32 %v245_v47, %v137_v33 }
  0x45   :  { %s3570_s4 = sld [smem:[#allocation8 + $0x6]] }
  0x46   :  { %444 = vrot.lane.b32.xlu2 %v442_v7, %s3271_s21  ;;  %s3578_s19 = sld [smem:[#allocation8 + $0x7]] }
  0x47   :  { %s3585_s30 = sld [smem:[#allocation8 + $0x8a]] }
  0x48   :  { %329 = vrot.lane.b32.xlu0 %v327_v10, %s3271_s21  ;;  %v394_v21 = vstv %s3561_s2  ;;  %s3610_s20 = sld [smem:[#allocation8 + $0x9]] }
  0x49   :  { %s3618_s23 = sld [smem:[#allocation8 + $0xa]] }
  0x4a   :  { %s3620_s3 = sld [smem:[#allocation8 + $0x100]] }
  0x4b   :  { %s3627_s0 = sld [smem:[#allocation8 + $0x101]] }
  0x4c   :  { %347 = vrot.lane.b32.xlu1 %v345_v13, %s3271_s21  ;;  %v376_v13 = vstv %s3544_s14  ;;  %s3635_s1 = sld [smem:[#allocation8 + $0x183]] }
  0x4d   :  { %s3641_s28 = sld [smem:[#allocation9 + $0x1]] }
  0x4e   :  { %422 = vrot.lane.b32.xlu2 %v420_v16, %s3271_s21  ;;  %v284_v16 = vstv %s3550_s29  ;;  %s3643_s24 = sld [smem:[#allocation8 + $0x184]] }
  0x4f   :  { %s3651_s5 = sld [smem:[#allocation9]] }
  0x50   :  { %461 = vrot.lane.b32.xlu0 %v459_v17, %s3271_s21  ;;  %s3654_s6 = sld [smem:[#allocation8 + $0x103]] }
  0x51   :  { %s3662_s26 = sld [smem:[#allocation8 + $0x106]] }
  0x52   :  { %s3667_s14 = sld [smem:[#allocation8 + $0x186]] }
  0x53   :  { %s3670_s27 = sld [smem:[#allocation8 + $0x181]] }
  0x54   :  { %519 = vrot.lane.b32.xlu1 %v517_v20, %s3271_s21  ;;  %v287_v20 = vstv %s3553_s25  ;;  %s3674_s29 = sld [smem:[#allocation8 + $0x107]] }
  0x55   :  { %s3676_s25 = sld [smem:[#allocation8 + $0x187]] }
  0x56   :  { %536 = vrot.lane.b32.xlu2 %v534_v22, %s3271_s21  ;;  %v3601_v22 = vld [vmem:[#allocation2 + $0x8] sm:$0x3f]  ;;  %s3687_s2 = sld [smem:[#allocation8 + $0x18a]] }
  0x58   :  { %479 = vrot.lane.b32.xlu0 %v477_v23, %s3271_s21 }
  0x5c   :  { %554 = vrot.lane.b32.xlu1 %v552_v27, %s3271_s21  ;;  %v397_v27 = vstv %s3564_s17  ;;  %s3692_s17 = sld [smem:[#allocation8 + $0x109]] }
  0x5e   :  { %572 = vrot.lane.b32.xlu2 %v570_v31, %s3271_s21 }
  0x60   :  { %497 = vrot.lane.b32.xlu0 %v495_v32, %s3271_s21  ;;  %s3535_s21 = sld [smem:[#allocation8 + $0x80]] }
  0x66   :  { %v359_v10 = vstv %s3535_s21  ;;  %s3660_s21 = sld [smem:[#allocation8 + $0x180]] }
  0x67   :  { %v360_v19 = vmul.f32 %v359_v10, %v3582_v6 }
  0x80   :  { %v217_v34 = vpop.permute.xlu2 %216 }
  0x81   :  { %v218_v40 = vrot.slane %v217_v34, 6 }
  0x83   :  { %v219_v48 = vsel %vm150_vm3, %v218_v40, %v217_v34 }
  0x84   :  { %v221_v53 = vadd.f32 %v219_v48, %v212_v45  ;;  %v322_v45 = vstv %s3578_s19  ;;  %v304_v48 = vstv %s3559_s22  ;;  %s3680_s22 = sld [smem:[#allocation8 + $0x189]] }
  0x85   :  { %s3733_s19 = sld [smem:[#allocation9 + $0x3]] }
  0x88   :  { %v226_v35 = vpop.permute.xlu2 %225 }
  0x89   :  { %v227_v49 = vrot.slane %v226_v35, 6 }
  0x8b   :  { %v228_v56 = vsel %vm150_vm3, %v227_v49, %v226_v35  ;;  %v285_v35 = vmul.f32 %v284_v16, %v3582_v6  ;;  %v415_v49 = vstv %s3585_s30  ;;  %s2692_s30 = sld [smem:[#allocation9 + $0x2]] }
  0x8c   :  { %v230_v60 = vadd.f32 %v228_v56, %v221_v53 }
  0x90   :  { %v3530_v36 = vpop.permute.xlu2 %294 }
  0x96   :  { %v158_v37 = vpop.permute.xlu1 %157 }
  0x97   :  { %v159_v46 = vrot.slane %v158_v37, 6 }
  0x98   :  { %v3542_v50 = vpop.permute.xlu2 %386 }
  0x99   :  { %v160_v8 = vsel %vm150_vm3, %v159_v46, %v158_v37  ;;  %v388_v34 = vrot.slane %v3542_v50, 6  ;;  %v412_v37 = vstv %s3568_s18  ;;  %s3272_s18 = smov 1  }
  0x9a   :  { %v148_v38 = vpop.permute.xlu0 %147 }
  0x9b   :  { %v149_v39 = vrot.slane %v148_v38, 6 }
  0x9d   :  { %v151_v42 = vsel %vm150_vm3, %v149_v39, %v148_v38  ;;  %v3615_v38 = vld [vmem:[#allocation2 + $0xc] sm:$0x3f]  ;;  %v395_v39 = vmul.f32 %v394_v21, %v3601_v22 }
  0x9e   :  { %v192_v44 = vpop.permute.xlu1 %191  ;;  %v153_v51 = vadd.f32 %v151_v42, %v143_v41  ;;  %v301_v41 = vstv %s3556_s16  ;;  %s3678_s16 = sld [smem:[#allocation8 + $0x104]] }
  0x9f   :  { %v193_v54 = vrot.slane %v192_v44, 6 }
  0xa0   :  { %v162_v57 = vadd.f32 %v160_v8, %v153_v51  ;;  %v3572_v3 = vpop.permute.xlu2 %444 }
  0xa1   :  { %v194_v61 = vsel %vm150_vm3, %v193_v54, %v192_v44  ;;  %v319_v44 = vstv %s3570_s4  ;;  %v389_v54 = vsel %vm150_vm3, %v388_v34, %v3542_v50  ;;  %v296_v50 = vrot.slane %v3530_v36, 6  ;;  %s3699_s4 = sld [smem:[#allocation8 + $0x10a]] }
  0xa2   :  { %v183_v14 = vpop.permute.xlu0 %182  ;;  %v164_v62 = vadd.f32 %v163_v25, %v162_v57  ;;  %v232_v25 = vadd.f32 %v231_v29, %v230_v60  ;;  %v3595_v29 = vld [vmem:[#allocation2 + $0x4] sm:$0x3f] }
  0xa3   :  { %v184_v55 = vrot.slane %v183_v14, 6  ;;  %v377_v32 = vmul.f32 %v376_v13, %v3595_v29  ;;  %v302_v56 = vmul.f32 %v301_v41, %v3595_v29 }
  0xa4   :  { %v3587_v11 = vmax.f32 %v164_v62, 0.0  ;;  %v3603_v23 = vmax.f32 %v232_v25, 0.0 }
  0xa5   :  { %v185_v58 = vsel %vm150_vm3, %v184_v55, %v183_v14 }
  0xa6   :  { %v187_v30 = vadd.f32 %v185_v58, %v178_v52  ;;  %v260_v59 = vpop.permute.xlu1 %259  ;;  %v363_v31 = vmul.f32 %v362_v12, %v3587_v11  ;;  %v398_v51 = vmul.f32 %v397_v27, %v3603_v23 }
  0xa7   :  { %v261_v7 = vrot.slane %v260_v59, 6 }
  0xa8   :  { %v196_v63 = vadd.f32 %v194_v61, %v187_v30  ;;  %v423_v14 = vpop.permute.xlu2 %422  ;;  %v364_v53 = vadd.f32 %v363_v31, %v360_v19  ;;  %v288_v30 = vmul.f32 %v287_v20, %v3587_v11  ;;  %v297_v19 = vsel %vm150_vm3, %v296_v50, %v3530_v36 }
  0xa9   :  { %v262_v24 = vsel %vm150_vm3, %v261_v7, %v260_v59  ;;  %v424_v55 = vrot.slane %v423_v14, 6  ;;  %v337_v7 = vstv %s3610_s20  ;;  %s3751_s20 = sld [smem:[#allocation11 + $0x101]] }
  0xaa   :  { %v198_v4 = vadd.f32 %v197_v43, %v196_v63  ;;  %v251_v1 = vpop.permute.xlu0 %250  ;;  %v320_v63 = vmul.f32 %v319_v44, %v3601_v22 }
  0xab   :  { %v252_v9 = vrot.slane %v251_v1, 6 }
  0xac   :  { %v3589_v43 = vmax.f32 %v198_v4, 0.0  ;;  %v323_v4 = vmul.f32 %v322_v45, %v3603_v23  ;;  %v434_v45 = vstv %s3620_s3  ;;  %s3755_s3 = sld [smem:[#allocation11 + $0x184]] }
  0xad   :  { %v253_v47 = vsel %vm150_vm3, %v252_v9, %v251_v1  ;;  %v425_v9 = vsel %vm150_vm3, %v424_v55, %v423_v14  ;;  %v437_v55 = vstv %s3627_s0  ;;  %s3757_s0 = sld [smem:[#allocation11 + $0x104]] }
  0xae   :  { %v255_v17 = vadd.f32 %v253_v47, %v246_v5  ;;  %v370_v18 = vpop.permute.xlu1 %369  ;;  %v380_v33 = vmul.f32 %v379_v15, %v3589_v43  ;;  %v305_v59 = vmul.f32 %v304_v48, %v3589_v43  ;;  %v399_v5 = vadd.f32 %v398_v51, %v395_v39 }
  0xaf   :  { %v371_v26 = vrot.slane %v370_v18, 6  ;;  %v340_v47 = vstv %s3618_s23  ;;  %v289_v15 = vadd.f32 %v288_v30, %v285_v35  ;;  %v324_v20 = vadd.f32 %v323_v4, %v320_v63  ;;  %s3753_s23 = sld [smem:[#allocation11 + $0x107]] }
  0xb0   :  { %v264_v28 = vadd.f32 %v262_v24, %v255_v17  ;;  %v381_v8 = vadd.f32 %v380_v33, %v377_v32  ;;  %v306_v16 = vadd.f32 %v305_v59, %v302_v56  ;;  %v338_v24 = vmul.f32 %v337_v7, %v3615_v38 }
  0xb1   :  { %v372_v46 = vsel %vm150_vm3, %v371_v26, %v370_v18  ;;  %v430_v32 = vstv %s3641_s28  ;;  %v299_v36 = vadd.f32 %v297_v19, %v289_v15  ;;  %v509_v48 = vstv %s3660_s21  ;;  %s3761_s28 = sld [smem:[#allocation11 + $0x187]] }
  0xb2   :  { %v266_v40 = vadd.f32 %v265_v0, %v264_v28  ;;  %v312_v42 = vpop.permute.xlu0 %311  ;;  %v413_v0 = vmul.f32 %v412_v37, %v3615_v38  ;;  %v374_v58 = vadd.f32 %v372_v46, %v364_v53  ;;  %v391_v1 = vadd.f32 %v389_v54, %v381_v8  ;;  %s2736_s21 = sld [smem:[#allocation11 + $0x106]] }
  0xb3   :  { %v313_v57 = vrot.slane %v312_v42, 6  ;;  %v469_v8 = vstv %s3662_s26  ;;  %v544_v54 = vstv %s3667_s14  ;;  %v435_v56 = vmul.f32 %v434_v45, %v3582_v6  ;;  %s3769_s26 = sld [smem:[#allocation11 + $0x2]] }
  0xb4   :  { %v3633_v52 = vmax.f32 %v266_v40, 0.0  ;;  %v392_v13 = vadd.f32 %v391_v1, %v374_v58  ;;  %v537_v40 = vpop.permute.xlu2 %536  ;;  %v512_v30 = vstv %s3670_s27  ;;  %v510_v59 = vmul.f32 %v509_v48, %v3582_v6  ;;  %s3773_s14 = sld [smem:[#allocation11 + $0x100]] }
  0xb5   :  { %v314_v10 = vsel %vm150_vm3, %v313_v57, %v312_v42  ;;  %v526_v57 = vstv %s3635_s1  ;;  %v547_v4 = vstv %s3676_s25  ;;  %v545_v1 = vmul.f32 %v544_v54, %v3601_v22  ;;  %s3759_s1 = sld [smem:[#allocation11 + $0x181]] }
  0xb6   :  { %v405_v60 = vpop.permute.xlu1 %404  ;;  %v416_v61 = vmul.f32 %v415_v49, %v3633_v52  ;;  %v316_v26 = vadd.f32 %v314_v10, %v306_v16  ;;  %v341_v31 = vmul.f32 %v340_v47, %v3633_v52  ;;  %v454_v7 = vstv %s3678_s16  ;;  %s3775_s27 = sld [smem:[#allocation11 + $0x186]] }
  0xb7   :  { %v406_v62 = vrot.slane %v405_v60, 6  ;;  %v446_v10 = vrot.slane %v3572_v3, 6  ;;  %v513_v6 = vmul.f32 %v512_v30, %v3587_v11  ;;  %v538_v15 = vrot.slane %v537_v40, 6  ;;  %s3780_s25 = sld [smem:[#allocation11 + $0x103]] }
  0xb8   :  { %v417_v25 = vadd.f32 %v416_v61, %v413_v0  ;;  %v317_v41 = vadd.f32 %v316_v26, %v299_v36  ;;  %v342_v44 = vadd.f32 %v341_v31, %v338_v24  ;;  %v355_v0 = vstv %s3651_s5  ;;  %s2725_s5 = sld [smem:[#allocation11 + $0x88]] }
  0xb9   :  { %v407_v12 = vsel %vm150_vm3, %v406_v62, %v405_v60  ;;  %v472_v60 = vstv %s3674_s29  ;;  %v470_v61 = vmul.f32 %v469_v8, %v3601_v22  ;;  %v451_v62 = vstv %s3654_s6  ;;  %s3764_s6 = sld [smem:[#allocation11 + $0x82]] }
  0xba   :  { %v409_v17 = vadd.f32 %v407_v12, %v399_v5  ;;  %v330_v18 = vpop.permute.xlu0 %329  ;;  %v427_v28 = vadd.f32 %v425_v9, %v417_v25  ;;  %v529_v5 = vstv %s3643_s24  ;;  %v527_v25 = vmul.f32 %v526_v57, %v3595_v29  ;;  %s2722_s24 = sld [smem:[#allocation11 + $0x85]] }
  0xbb   :  { %v331_v21 = vrot.slane %v330_v18, 6  ;;  %v562_v12 = vstv %s3680_s22  ;;  %v452_v16 = vmul.f32 %v451_v62, %v3595_v29  ;;  %v455_v19 = vmul.f32 %v454_v7, %v3589_v43  ;;  %s3777_s29 = sld [smem:[#allocation11 + $0x183]] }
  0xbc   :  { %v410_v27 = vadd.f32 %v409_v17, %v392_v13  ;;  %v438_v13 = vmul.f32 %v437_v55, %v3587_v11  ;;  %v530_v17 = vmul.f32 %v529_v5, %v3589_v43  ;;  %v548_v24 = vmul.f32 %v547_v4, %v3603_v23  ;;  %s3784_s16 = sld [smem:[#allocation11 + $0x5]] }
  0xbd   :  { %v332_v33 = vsel %vm150_vm3, %v331_v21, %v330_v18  ;;  %v573_v18 = vpop.permute.xlu2 %572  ;;  %v473_v21 = vmul.f32 %v472_v60, %v3603_v23  ;;  %v565_v11 = vstv %s3687_s2  ;;  %v563_v26 = vmul.f32 %v562_v12, %v3615_v38  ;;  %s3788_s22 = sld [smem:[#allocation11 + $0x180]]  ;;  %s3273_s2 = smov 126  }
  0xbe   :  { %v428_v34 = vadd.f32 %v427_v28, %v410_v27  ;;  %v334_v35 = vadd.f32 %v332_v33, %v324_v20  ;;  %v348_v37 = vpop.permute.xlu1 %347  ;;  %v447_v28 = vsel %vm150_vm3, %v446_v10, %v3572_v3  ;;  %v514_v31 = vadd.f32 %v513_v6, %v510_v59 }
  0xbf   :  { %v349_v39 = vrot.slane %v348_v37, 6  ;;  %v490_v43 = vstv %s3699_s4  ;;  %v439_v33 = vadd.f32 %v438_v13, %v435_v56  ;;  %v539_v36 = vsel %vm150_vm3, %v538_v15, %v537_v40  ;;  %s3838_s4 = sld [smem:[#allocation11 + $0x10a]] }
  0xc0   :  { %v431_v42 = vadd.f32 %v430_v32, %v428_v34  ;;  %v335_v51 = vadd.f32 %v334_v35, %v317_v41  ;;  %v487_v32 = vstv %s3692_s17  ;;  %v574_v34 = vrot.slane %v573_v18, 6  ;;  %s3824_s17 = sld [smem:[#allocation11 + $0x102]] }
  0xc1   :  { %v350_v46 = vsel %vm150_vm3, %v349_v39, %v348_v37  ;;  %v531_v23 = vadd.f32 %v530_v17, %v527_v25  ;;  %v566_v37 = vmul.f32 %v565_v11, %v3633_v52  ;;  %v456_v39 = vadd.f32 %v455_v19, %v452_v16 }
  0xc2   :  { %v3685_v49 = vmax.f32 %v431_v42, 0.0  ;;  %v352_v14 = vadd.f32 %v350_v46, %v342_v44  ;;  %v462_v53 = vpop.permute.xlu0 %461  ;;  %v474_v44 = vadd.f32 %v473_v21, %v470_v61  ;;  %v549_v45 = vadd.f32 %v548_v24, %v545_v1 }
  0xc3   :  { %v463_v22 = vrot.slane %v462_v53, 6  ;;  %v541_v48 = vadd.f32 %v539_v36, %v531_v23  ;;  %v488_v40 = vmul.f32 %v487_v32, %v3615_v38  ;;  %v575_v8 = vsel %vm150_vm3, %v574_v34, %v573_v18 }
  0xc4   :  { %v353_v58 = vadd.f32 %v352_v14, %v335_v51  ;;  %594 = vrot.lane.b32.xlu1 %v3685_v49, %s3272_s18  ;;  %v491_v14 = vmul.f32 %v490_v43, %v3633_v52  ;;  %v567_v54 = vadd.f32 %v566_v37, %v563_v26  ;;  %v580_v62 = vstv %s3733_s19  ;;  %s2753_s19 = sld [smem:[#allocation11 + $0x18a]] }
  0xc5   :  { %v464_v35 = vsel %vm150_vm3, %v463_v22, %v462_v53  ;;  %v449_v53 = vadd.f32 %v447_v28, %v439_v33  ;;  %v505_v1 = vstv %s2692_s30  ;;  %v739_v21 = vstv %s2725_s5  ;;  %s2728_s30 = sld [smem:[#allocation11 + $0x8b]] }
  0xc6   :  { %v356_v50 = vadd.f32 %v355_v0, %v353_v58  ;;  %v520_v63 = vpop.permute.xlu1 %519  ;;  %v466_v51 = vadd.f32 %v464_v35, %v456_v39  ;;  %v577_v59 = vadd.f32 %v575_v8, %v567_v54  ;;  %v807_v26 = vstv %s2736_s21  ;;  %s2720_s5 = sld [smem:[#allocation11 + $0x83]] }
  0xc7   :  { %v521_v9 = vrot.slane %v520_v63, 6  ;;  %v775_v32 = vstv %s3751_s20  ;;  %v867_v43 = vstv %s3755_s3  ;;  %v792_v33 = vstv %s3757_s0  ;;  %s2716_s20 = sld [smem:[#allocation11 + $0xb]] }
  0xc8   :  { %v3713_v47 = vmax.f32 %v356_v50, 0.0  ;;  %v467_v60 = vadd.f32 %v466_v51, %v449_v53  ;;  %v492_v50 = vadd.f32 %v491_v14, %v488_v40  ;;  %v704_v36 = vstv %s3764_s6  ;;  %s2752_s3 = sld [smem:[#allocation11 + $0x189]] }
  0xc9   :  { %v522_v29 = vsel %vm150_vm3, %v521_v9, %v520_v63  ;;  %v882_v23 = vstv %s3775_s27  ;;  %v772_v37 = vstv %s3773_s14  ;;  %v850_v39 = vstv %s3759_s1  ;;  %s2713_s0 = sld [smem:[#allocation11 + $0x8]] }
  0xca   :  { %v480_v20 = vpop.permute.xlu0 %479  ;;  %584 = vrot.lane.b32.xlu0 %v3713_v47, %s3272_s18  ;;  %v524_v41 = vadd.f32 %v522_v29, %v514_v31  ;;  %v810_v29 = vstv %s3753_s23  ;;  %v789_v51 = vstv %s3780_s25  ;;  %v646_v40 = vstv %s3784_s16  ;;  %s2739_s23 = sld [smem:[#allocation11 + $0x109]] }
  0xcb   :  { %v481_v27 = vrot.slane %v480_v20, 6  ;;  %v868_v53 = vmul.f32 %v867_v43, %v3685_v49  ;;  %v776_v54 = vmul.f32 %v775_v32, %v3713_v47  ;;  %s2721_s1 = sld [smem:[#allocation11 + $0x84]] }
  0xcc   :  { %v542_v55 = vadd.f32 %v541_v48, %v524_v41  ;;  %v885_v41 = vstv %s3761_s28  ;;  %v864_v48 = vstv %s3777_s29  ;;  %s3877_s28 = sld [smem:[#allocation11 + $0x87]] }
  0xcd   :  { %v482_v3 = vsel %vm150_vm3, %v481_v27, %v480_v20  ;;  %v721_v20 = vstv %s2722_s24  ;;  %s2718_s24 = sld [smem:[#allocation11 + $0x81]] }
  0xce   :  { %v555_v42 = vpop.permute.xlu1 %554  ;;  %v484_v56 = vadd.f32 %v482_v3, %v474_v44  ;;  %v628_v44 = vstv %s3769_s26  ;;  %s2717_s6 = sld [smem:[#allocation11 + $0x80]] }
  0xcf   :  { %v556_v46 = vrot.slane %v555_v42, 6  ;;  %v664_v43 = vstv %s2713_s0  ;;  %s3879_s21 = sld [smem:[#allocation11 + $0x4]] }
  0xd0   :  { %v485_v63 = vadd.f32 %v484_v56, %v467_v60  ;;  %v847_v56 = vstv %s3788_s22  ;;  %s2723_s26 = sld [smem:[#allocation11 + $0x86]] }
  0xd1   :  { %v557_v0 = vsel %vm150_vm3, %v556_v46, %v555_v42  ;;  %s620_s14 = sld [smem:[#allocation11]] }
  0xd2   :  { %v559_v57 = vadd.f32 %v557_v0, %v549_v45  ;;  %v498_v58 = vpop.permute.xlu0 %497  ;;  %s2708_s27 = sld [smem:[#allocation11 + $0x3]] }
  0xd3   :  { %v499_v30 = vrot.slane %v498_v58, 6  ;;  %s3881_s29 = sld [smem:[#allocation11 + $0x1]] }
  0xd4   :  { %v560_v61 = vadd.f32 %v559_v57, %v542_v55  ;;  %v793_v55 = vmul.f32 %v792_v33, %v3685_v49  ;;  %s2726_s25 = sld [smem:[#allocation11 + $0x89]] }
  0xd5   :  { %v500_v38 = vsel %vm150_vm3, %v499_v30, %v498_v58  ;;  %s2727_s16 = sld [smem:[#allocation11 + $0x8a]] }
  0xd6   :  { %v578_v52 = vadd.f32 %v577_v59, %v560_v61  ;;  %v502_v4 = vadd.f32 %v500_v38, %v492_v50  ;;  %v851_v50 = vmul.f32 %v850_v39, %v3713_v47  ;;  %s2712_s22 = sld [smem:[#allocation11 + $0x7]] }
  0xd7   :  { %s3914_s0 = sld [smem:[#allocation11 + $0x10b]] }
  0xd8   :  { %v581_v5 = vadd.f32 %v580_v62, %v578_v52  ;;  %v503_v25 = vadd.f32 %v502_v4, %v485_v63 }
  0xda   :  { %v3743_v7 = vmax.f32 %v581_v5, 0.0  ;;  %v506_v9 = vadd.f32 %v505_v1, %v503_v25 }
  0xdc   :  { %v3745_v10 = vmax.f32 %v506_v9, 0.0  ;;  %612 = vrot.lane.b32.xlu0 %v3743_v7, %s3272_s18  ;;  %v779_v9 = vstv %s3824_s17  ;;  %s2711_s17 = sld [smem:[#allocation11 + $0x6]] }
  0xde   :  { %603 = vrot.lane.b32.xlu2 %v3745_v10, %s3272_s18  ;;  %v811_v35 = vmul.f32 %v810_v29, %v3745_v10  ;;  %v886_v59 = vmul.f32 %v885_v41, %v3745_v10  ;;  %v732_v41 = vstv %s2723_s26 }
 0x136   :  { %v595_v12 = vpop.permute.xlu1 %594 }
 0x137   :  { %v596_v6 = vrot.slane %v595_v12, 2 }
 0x138   :  { %v604_v13 = vpop.permute.xlu2 %603 }
 0x139   :  { %v605_v15 = vrot.slane %v604_v13, 2  ;;  %v597_v16 = vsel %vm587_vm4, %v595_v12, %v596_v6  ;;  %v757_v6 = vstv %s2728_s30  ;;  %s2715_s30 = sld [smem:[#allocation11 + $0xa]] }
 0x13a   :  { %599 = vst.msk [vmem:[#allocation2 + $0x6] sm:$0xf] %vm3383_vm2, %v597_v16  ;;  %v828_v16 = vstv %s3838_s4  ;;  %s2714_s4 = sld [smem:[#allocation11 + $0x9]] }
 0x13b   :  { %v606_v22 = vsel %vm587_vm4, %v604_v13, %v605_v15  ;;  %v682_v13 = vstv %s2716_s20  ;;  %v825_v15 = vstv %s2739_s23  ;;  %s692_s20 = sld [smem:[#allocation12]] }
 0x13c   :  { %608 = vst.msk [vmem:[#allocation2 + $0xa] sm:$0xf] %vm3383_vm2, %v606_v22  ;;  %v585_v17 = vpop.permute.xlu0 %584  ;;  %v900_v22 = vstv %s2752_s3  ;;  %s3910_s23 = sld [smem:[#allocation11 + $0x108]] }
 0x13d   :  { %v586_v18 = vrot.slane %v585_v17, 2  ;;  %s3912_s3 = sld [smem:[#allocation11 + $0x105]] }
 0x13f   :  { %v588_v19 = vsel %vm587_vm4, %v585_v17, %v586_v18  ;;  %v903_v17 = vstv %s2753_s19  ;;  %s2729_s19 = sld [smem:[#allocation12 + $0x1]] }
 0x140   :  { %590 = vst.msk [vmem:[#allocation2 + $0x2] sm:$0xf] %vm3383_vm2, %v588_v19  ;;  %v904_v29 = vmul.f32 %v903_v17, %v3743_v7 }
 0x141   :  { %v3786_v24 = vld [vmem:[#allocation2 + $0x6] sm:$0xf] }
 0x142   :  { %v722_v11 = vmul.f32 %v721_v20, %v3786_v24  ;;  %v647_v60 = vmul.f32 %v646_v40, %v3786_v24  ;;  %v735_v40 = vstv %s3877_s28 }
 0x143   :  { %v3792_v27 = vld [vmem:[#allocation2 + $0xa] sm:$0xf] }
 0x144   :  { %v3794_v28 = vld [vmem:[#allocation2 + $0x8] sm:$0x3f]  ;;  %v740_v31 = vmul.f32 %v739_v21, %v3792_v27  ;;  %724 = vrot.lane.b32.xlu2 %v722_v11, %s3273_s2  ;;  %v829_v11 = vmul.f32 %v828_v16, %v3743_v7  ;;  %v665_v33 = vmul.f32 %v664_v43, %v3792_v27 }
 0x145   :  { %v808_v34 = vmul.f32 %v807_v26, %v3794_v28  ;;  %v883_v8 = vmul.f32 %v882_v23, %v3794_v28 }
 0x146   :  { %742 = vrot.lane.b32.xlu0 %v740_v31, %s3273_s2 }
 0x147   :  { %v3809_v42 = vld [vmem:[#allocation2 + $0x2] sm:$0xf]  ;;  %v3816_v46 = vadd.f32 %v811_v35, %v808_v34  ;;  %v3847_v52 = vadd.f32 %v886_v59, %v883_v8  ;;  %v714_v34 = vstv %s2720_s5  ;;  %v697_v35 = vstv %s2717_s6 }
 0x148   :  { %v3812_v3 = vld [vmem:[#allocation2 + $0x4] sm:$0x3f]  ;;  %v705_v14 = vmul.f32 %v704_v36, %v3809_v42  ;;  %v629_v57 = vmul.f32 %v628_v44, %v3809_v42  ;;  %v780_v12 = vmul.f32 %v779_v9, %v3809_v42  ;;  %v700_v44 = vstv %s2718_s24 }
 0x149   :  { %v3814_v45 = vld [vmem:[#allocation2] sm:$0x3f]  ;;  %v865_v58 = vmul.f32 %v864_v48, %v3812_v3  ;;  %v790_v30 = vmul.f32 %v789_v51, %v3812_v3  ;;  %v715_v48 = vmul.f32 %v714_v34, %v3812_v3  ;;  %v753_v34 = vstv %s2727_s16 }
 0x14a   :  { %v773_v0 = vmul.f32 %v772_v37, %v3814_v45  ;;  %707 = vrot.lane.b32.xlu1 %v705_v14, %s3273_s2  ;;  %v848_v63 = vmul.f32 %v847_v56, %v3814_v45  ;;  %v717_v37 = vstv %s2721_s1  ;;  %v698_v14 = vmul.f32 %v697_v35, %v3814_v45 }
 0x14b   :  { %v3842_v62 = vadd.f32 %v868_v53, %v865_v58  ;;  %v3844_v38 = vadd.f32 %v793_v55, %v790_v30  ;;  %v621_v53 = vstv %s620_s14  ;;  %v718_v55 = vmul.f32 %v717_v37, %v3685_v49 }
 0x14c   :  { %v3836_v61 = vadd.f32 %v776_v54, %v773_v0  ;;  %631 = vrot.lane.b32.xlu2 %v629_v57, %s3273_s2  ;;  %v3850_v1 = vadd.f32 %v851_v50, %v848_v63  ;;  %v639_v0 = vstv %s2708_s27  ;;  %v642_v54 = vstv %s3879_s21  ;;  %s3999_s21 = sld [smem:[#allocation11 + $0x185]] }
 0x14d   :  { %v624_v56 = vstv %s3881_s29  ;;  %v733_v57 = vmul.f32 %v732_v41, %v3794_v28  ;;  %v701_v30 = vmul.f32 %v700_v44, %v3713_v47  ;;  %v736_v50 = vmul.f32 %v735_v40, %v3745_v10  ;;  %s4007_s29 = sld [smem:[#allocation11 + $0x188]] }
 0x14e   :  { %649 = vrot.lane.b32.xlu0 %v647_v60, %s3273_s2  ;;  %v613_v4 = vpop.permute.xlu0 %612  ;;  %v640_v9 = vmul.f32 %v639_v0, %v3812_v3  ;;  %v625_v16 = vmul.f32 %v624_v56, %v3713_v47  ;;  %v750_v47 = vstv %s2726_s25 }
 0x14f   :  { %v614_v5 = vrot.slane %v613_v4, 2 }
 0x151   :  { %v615_v25 = vsel %vm587_vm4, %v613_v4, %v614_v5  ;;  %v719_v4 = vadd.f32 %v718_v55, %v715_v48  ;;  %v622_v5 = vmul.f32 %v621_v53, %v3814_v45  ;;  %v657_v48 = vstv %s2711_s17 }
 0x152   :  { %617 = vst.msk [vmem:[#allocation2 + $0xe] sm:$0xf] %vm3383_vm2, %v615_v25  ;;  %v702_v25 = vadd.f32 %v701_v30, %v698_v14  ;;  %v675_v14 = vstv %s2714_s4  ;;  %v768_v53 = vstv %s2729_s19  ;;  %v678_v55 = vstv %s2715_s30  ;;  %s3946_s30 = sld [smem:[#allocation11 + $0x182]] }
 0x153   :  { %v626_v45 = vadd.f32 %v625_v16, %v622_v5  ;;  %s4396_s4 = sld [smem:[#allocation12 + $0x2]] }
 0x156   :  { %782 = vrot.lane.b32.xlu0 %v780_v12, %s3273_s2 }
 0x159   :  { %v3859_v18 = vld [vmem:[#allocation2 + $0xe] sm:$0xf] }
 0x15a   :  { %v3861_v19 = vld [vmem:[#allocation2 + $0xc] sm:$0x3f]  ;;  %v758_v20 = vmul.f32 %v757_v6, %v3859_v18  ;;  %v683_v2 = vmul.f32 %v682_v13, %v3859_v18  ;;  %v643_v13 = vmul.f32 %v642_v54, %v3685_v49  ;;  %v658_v54 = vmul.f32 %v657_v48, %v3794_v28  ;;  %v2869_v48 = vld [vmem:[%s6193_s7 + $0x788] sm:$0xff] }
 0x15b   :  { %v826_v21 = vmul.f32 %v825_v15, %v3861_v19  ;;  %v901_v26 = vmul.f32 %v900_v22, %v3861_v19  ;;  %v737_v22 = vadd.f32 %v736_v50, %v733_v57  ;;  %v751_v35 = vmul.f32 %v750_v47, %v3861_v19 }
 0x15c   :  { %760 = vrot.lane.b32.xlu1 %v758_v20, %s3273_s2  ;;  %685 = vrot.lane.b32.xlu2 %v683_v2, %s3273_s2  ;;  %v644_v3 = vadd.f32 %v643_v13, %v640_v9  ;;  %v676_v57 = vmul.f32 %v675_v14, %v3861_v19  ;;  %v679_v50 = vmul.f32 %v678_v55, %v3743_v7  ;;  %v693_v19 = vstv %s692_s20  ;;  %v2801_v14 = vld [vmem:[%s6193_s7 + $0x568] sm:$0xff] }
 0x15d   :  { %v3871_v31 = vadd.f32 %v829_v11, %v826_v21  ;;  %v3873_v32 = vadd.f32 %v904_v29, %v901_v26  ;;  %v832_v47 = vstv %s3914_s0  ;;  %v2797_v55 = vld [vmem:[%s6193_s7 + $0x548] sm:$0xff] }
 0x15e   :  { %v680_v9 = vadd.f32 %v679_v50, %v676_v57  ;;  %v2792_v57 = vld [vmem:[%s6193_s7 + $0x520] sm:$0xff]  ;;  %v2857_v50 = vld [vmem:[%s6193_s7 + $0x728] sm:$0xff] }
 0x164   :  { %667 = vrot.lane.b32.xlu1 %v665_v33, %s3273_s2 }
 0x19e   :  { %v725_v36 = vpop.permute.xlu2 %724 }
 0x19f   :  { %v726_v39 = vrot.slane %v725_v36, 6 }
 0x1a1   :  { %v727_v59 = vsel %vm634_vm5, %v726_v39, %v725_v36 }
 0x1a2   :  { %v729_v15 = vadd.f32 %v727_v59, %v719_v4 }
 0x1a6   :  { %v632_v51 = vpop.permute.xlu2 %631 }
 0x1a7   :  { %v633_v60 = vrot.slane %v632_v51, 6 }
 0x1a9   :  { %v635_v2 = vsel %vm634_vm5, %v633_v60, %v632_v51 }
 0x1aa   :  { %v637_v43 = vadd.f32 %v635_v2, %v626_v45  ;;  %v2880_v2 = vld [vmem:[%s6193_s7 + $0x7e0] sm:$0x3] }
 0x1ab   :  { %v2812_v45 = vld [vmem:[%s6193_s7 + $0x5c0] sm:$0xff]  ;;  %2884 = vmatpush.msk.msra.mxu1 %vm133_vm0, %v2880_v2 }
 0x1ac   :  { %v2776_v2 = vld [vmem:[%s6193_s7 + $0x4a0] sm:$0xff] }
 0x1b6   :  { %v686_v51 = vpop.permute.xlu2 %685 }
 0x1b7   :  { %v687_v56 = vrot.slane %v686_v51, 6 }
 0x1b8   :  { %v743_v23 = vpop.permute.xlu0 %742 }
 0x1b9   :  { %v744_v8 = vrot.slane %v743_v23, 6  ;;  %v688_v5 = vsel %vm634_vm5, %v687_v56, %v686_v51  ;;  %v2800_v51 = vld [vmem:[%s6193_s7 + $0x560] sm:$0xff]  ;;  %v2861_v56 = vld [vmem:[%s6193_s7 + $0x748] sm:$0xff] }
 0x1bb   :  { %v745_v12 = vsel %vm634_vm5, %v744_v8, %v743_v23  ;;  %v754_v23 = vmul.f32 %v753_v34, %v3743_v7  ;;  %v660_v8 = vstv %s2712_s22  ;;  %v2873_v34 = vld [vmem:[%s6193_s7 + $0x7a8] sm:$0xff]  ;;  %s4047_s22 = sld [smem:[#allocation11 + $0x18b]] }
 0x1bc   :  { %v708_v58 = vpop.permute.xlu1 %707  ;;  %v747_v11 = vadd.f32 %v745_v12, %v737_v22  ;;  %v661_v30 = vmul.f32 %v660_v8, %v3745_v10  ;;  %v690_v12 = vadd.f32 %v688_v5, %v680_v9  ;;  %v2796_v8 = vld [vmem:[%s6193_s7 + $0x540] sm:$0xff]  ;;  %v2789_v5 = vld [vmem:[%s6193_s7 + $0x508] sm:$0xff] }
 0x1bd   :  { %v709_v63 = vrot.slane %v708_v58, 6  ;;  %v755_v41 = vadd.f32 %v754_v23, %v751_v35  ;;  %v2804_v35 = vld [vmem:[%s6193_s7 + $0x580] sm:$0xff] }
 0x1be   :  { %v662_v4 = vadd.f32 %v661_v30, %v658_v54  ;;  %v854_v54 = vstv %s3946_s30  ;;  %v2784_v9 = vld [vmem:[%s6193_s7 + $0x4e0] sm:$0xff] }
 0x1bf   :  { %v710_v6 = vsel %vm634_vm5, %v709_v63, %v708_v58  ;;  %v855_v30 = vmul.f32 %v854_v54, %v3809_v42  ;;  %v2883_v54 = vld [vmem:[%s6193_s7 + $0x7f8] sm:$0x3] }
 0x1c0   :  { %v712_v17 = vadd.f32 %v710_v6, %v702_v25  ;;  %v650_v20 = vpop.permute.xlu0 %649 }
 0x1c1   :  { %v651_v21 = vrot.slane %v650_v20, 6 }
 0x1c2   :  { %v730_v26 = vadd.f32 %v729_v15, %v712_v17  ;;  %v2816_v17 = vld [vmem:[%s6193_s7 + $0x5e0] sm:$0xff] }
 0x1c3   :  { %v652_v29 = vsel %vm634_vm5, %v651_v21, %v650_v20  ;;  %v2817_v20 = vld [vmem:[%s6193_s7 + $0x5e8] sm:$0xff]  ;;  %1207 = vmatpush.msra.mxu0 %v2816_v17 }
 0x1c4   :  { %v654_v33 = vadd.f32 %v652_v29, %v644_v3  ;;  %v748_v49 = vadd.f32 %v747_v11, %v730_v26  ;;  %v2881_v21 = vld [vmem:[%s6193_s7 + $0x7e8] sm:$0x3]  ;;  %v814_v11 = vstv %s3910_s23  ;;  %1247 = vmatpush.msra.mxu2 %v2817_v20  ;;  %v2876_v26 = vld [vmem:[%s6193_s7 + $0x7c0] sm:$0xff] }
 0x1c5   :  { %v2813_v3 = vld [vmem:[%s6193_s7 + $0x5c8] sm:$0xff]  ;;  %2886 = vmatpush.msk.msra.mxu3 %vm133_vm0, %v2881_v21  ;;  %1208 = vmatpush.msra.mxu0 %v2812_v45  ;;  %v815_v23 = vmul.f32 %v814_v11, %v3792_v27  ;;  %v2772_v45 = vld [vmem:[%s6193_s7 + $0x480] sm:$0xff] }
 0x1c6   :  { %v655_v36 = vadd.f32 %v654_v33, %v637_v43  ;;  %v2877_v29 = vld [vmem:[%s6193_s7 + $0x7c8] sm:$0xff]  ;;  %v796_v43 = vstv %s3912_s3  ;;  %v2808_v33 = vld [vmem:[%s6193_s7 + $0x5a0] sm:$0xff]  ;;  %1228 = vmatpush.msra.mxu1 %v2876_v26  ;;  %1248 = vmatpush.msra.mxu2 %v2813_v3  ;;  %s4530_s3 = sld [smem:[#allocation12 + $0x3]] }
 0x1c7   :  { %1268 = vmatpush.msra.mxu3 %v2877_v29  ;;  %1209 = vmatpush.msra.mxu0 %v2808_v33  ;;  %v2841_v21 = vld [vmem:[%s6193_s7 + $0x6a8] sm:$0xff]  ;;  %v2836_v11 = vld [vmem:[%s6193_s7 + $0x680] sm:$0xff]  ;;  %v907_v29 = vstv %s4047_s22 }
 0x1c8   :  { %v2773_v26 = vld [vmem:[%s6193_s7 + $0x488] sm:$0xff]  ;;  %v2832_v33 = vld [vmem:[%s6193_s7 + $0x660] sm:$0xff] }
 0x1c9   :  { %1269 = vmatpush.msra.mxu3 %v2873_v34  ;;  %1210 = vmatpush.msra.mxu0 %v2804_v35  ;;  %v2837_v3 = vld [vmem:[%s6193_s7 + $0x688] sm:$0xff]  ;;  %v908_v34 = vmul.f32 %v907_v29, %v3859_v18  ;;  %v2828_v35 = vld [vmem:[%s6193_s7 + $0x640] sm:$0xff]  ;;  %v2783_v29 = vld [vmem:[%s6193_s7 + $0x4d8] sm:$0xff] }
 0x1cb   :  { %1270 = vmatpush.msra.mxu3 %v2869_v48  ;;  %1211 = vmatpush.msra.mxu0 %v2800_v51  ;;  %v2756_v48 = vld [vmem:[%s6193_s7 + $0x400] sm:$0xff] }
 0x1cc   :  { %v2820_v51 = vld [vmem:[%s6193_s7 + $0x600] sm:$0xff] }
 0x1cd   :  { %1212 = vmatpush.msra.mxu0 %v2796_v8  ;;  %v2882_v8 = vld [vmem:[%s6193_s7 + $0x7f0] sm:$0x3] }
 0x1ce   :  { %v761_v37 = vpop.permute.xlu1 %760 }
 0x1cf   :  { %v762_v39 = vrot.slane %v761_v37, 6  ;;  %1213 = vmatpush.msra.mxu0 %v2792_v57  ;;  %v2815_v57 = vld [vmem:[%s6193_s7 + $0x5d8] sm:$0xff] }
 0x1d1   :  { %v763_v44 = vsel %vm634_vm5, %v762_v39, %v761_v37  ;;  %v797_v37 = vmul.f32 %v796_v43, %v3786_v24  ;;  %v2868_v39 = vld [vmem:[%s6193_s7 + $0x780] sm:$0xff] }
 0x1d2   :  { %v765_v40 = vadd.f32 %v763_v44, %v755_v41  ;;  %v833_v41 = vmul.f32 %v832_v47, %v3859_v18  ;;  %v2805_v44 = vld [vmem:[%s6193_s7 + $0x588] sm:$0xff]  ;;  %v2768_v43 = vld [vmem:[%s6193_s7 + $0x460] sm:$0xff] }
 0x1d3   :  { %v2764_v47 = vld [vmem:[%s6193_s7 + $0x440] sm:$0xff] }
 0x1d4   :  { %v766_v0 = vadd.f32 %v765_v40, %v748_v49  ;;  %v2872_v49 = vld [vmem:[%s6193_s7 + $0x7a0] sm:$0xff] }
 0x1d5   :  { %1229 = vmatpush.msra.mxu1 %v2872_v49  ;;  %v2864_v40 = vld [vmem:[%s6193_s7 + $0x760] sm:$0xff]  ;;  %v2769_v49 = vld [vmem:[%s6193_s7 + $0x468] sm:$0xff] }
 0x1d6   :  { %v769_v58 = vadd.f32 %v768_v53, %v766_v0  ;;  %v668_v59 = vpop.permute.xlu1 %667  ;;  %v2865_v53 = vld [vmem:[%s6193_s7 + $0x768] sm:$0xff]  ;;  %v2860_v0 = vld [vmem:[%s6193_s7 + $0x740] sm:$0xff] }
 0x1d7   :  { %v669_v60 = vrot.slane %v668_v59, 6  ;;  %1230 = vmatpush.msra.mxu1 %v2868_v39  ;;  %1271 = vmatpush.msra.mxu3 %v2865_v53  ;;  %v2760_v18 = vld [vmem:[%s6193_s7 + $0x420] sm:$0xff]  ;;  %v2818_v53 = vld [vmem:[%s6193_s7 + $0x5f0] sm:$0xff] }
 0x1d8   :  { %v770_v63 = vmax.f32 %v769_v58, 0.0  ;;  %v2856_v58 = vld [vmem:[%s6193_s7 + $0x720] sm:$0xff] }
 0x1d9   :  { %v670_v25 = vsel %vm634_vm5, %v669_v60, %v668_v59  ;;  %1231 = vmatpush.msra.mxu1 %v2864_v40  ;;  %1272 = vmatpush.msra.mxu3 %v2861_v56  ;;  %v2793_v59 = vld [vmem:[%s6193_s7 + $0x528] sm:$0xff]  ;;  %v2824_v39 = vld [vmem:[%s6193_s7 + $0x620] sm:$0xff]  ;;  %v2878_v56 = vld [vmem:[%s6193_s7 + $0x7d0] sm:$0xff] }
 0x1da   :  { %1179 = vst [vmem:[#allocation1] ss:$4 sm:$0xff] %v770_v63  ;;  %v672_v28 = vadd.f32 %v670_v25, %v662_v4  ;;  %v2788_v63 = vld [vmem:[%s6193_s7 + $0x500] sm:$0xff]  ;;  %v2853_v25 = vld [vmem:[%s6193_s7 + $0x708] sm:$0xff] }
 0x1db   :  { %1232 = vmatpush.msra.mxu1 %v2860_v0  ;;  %v2852_v4 = vld [vmem:[%s6193_s7 + $0x700] sm:$0xff]  ;;  %1273 = vmatpush.msra.mxu3 %v2857_v50  ;;  %v2757_v40 = vld [vmem:[%s6193_s7 + $0x408] sm:$0xff]  ;;  %v2819_v0 = vld [vmem:[%s6193_s7 + $0x5f8] sm:$0xff] }
 0x1dc   :  { %v673_v6 = vadd.f32 %v672_v28, %v655_v36  ;;  %v2809_v36 = vld [vmem:[%s6193_s7 + $0x5a8] sm:$0xff]  ;;  %1214 = vmatpush.msra.mxu0 %v2788_v63  ;;  %v2848_v28 = vld [vmem:[%s6193_s7 + $0x6e0] sm:$0xff]  ;;  %v2875_v50 = vld [vmem:[%s6193_s7 + $0x7b8] sm:$0xff] }
 0x1dd   :  { %1249 = vmatpush.msra.mxu2 %v2809_v36  ;;  %1233 = vmatpush.msra.mxu1 %v2856_v58  ;;  %v2833_v36 = vld [vmem:[%s6193_s7 + $0x668] sm:$0xff]  ;;  %v2879_v58 = vld [vmem:[%s6193_s7 + $0x7d8] sm:$0xff]  ;;  %v2806_v63 = vld [vmem:[%s6193_s7 + $0x590] sm:$0xff] }
 0x1de   :  { %v691_v10 = vadd.f32 %v690_v12, %v673_v6  ;;  %v2785_v12 = vld [vmem:[%s6193_s7 + $0x4e8] sm:$0xff]  ;;  %v871_v6 = vstv %s3999_s21  ;;  %1274 = vmatpush.msra.mxu3 %v2853_v25  ;;  %1215 = vmatpush.msra.mxu0 %v2784_v9  ;;  %v2802_v25 = vld [vmem:[%s6193_s7 + $0x570] sm:$0xff] }
 0x1df   :  { %1250 = vmatpush.msra.mxu2 %v2805_v44  ;;  %1234 = vmatpush.msra.mxu1 %v2852_v4  ;;  %v2825_v44 = vld [vmem:[%s6193_s7 + $0x628] sm:$0xff]  ;;  %v2807_v4 = vld [vmem:[%s6193_s7 + $0x598] sm:$0xff]  ;;  %v2866_v9 = vld [vmem:[%s6193_s7 + $0x770] sm:$0xff] }
 0x1e0   :  { %v694_v7 = vadd.f32 %v693_v19, %v691_v10  ;;  %v2849_v19 = vld [vmem:[%s6193_s7 + $0x6e8] sm:$0xff]  ;;  %v2780_v10 = vld [vmem:[%s6193_s7 + $0x4c0] sm:$0xff] }
 0x1e1   :  { %v1182_v13 = vld.sshfl [vmem:[#allocation1 + $0x10] sm:$0xff pattern:$0x73625140]  ;;  %v1181_v15 = vld.sshfl [vmem:[#allocation1 + $0x8] sm:$0xff pattern:$0x73625140]  ;;  %1251 = vmatpush.msra.mxu2 %v2801_v14  ;;  %1235 = vmatpush.msra.mxu1 %v2848_v28 }
 0x1e2   :  { %v695_v16 = vmax.f32 %v694_v7, 0.0  ;;  %1187 = vrot.lane.b32.xlu2 %v1182_v13, %s3272_s18  ;;  %1185 = vrot.lane.b32.xlu1 %v1181_v15, %s3272_s18  ;;  %v1180_v22 = vld.sshfl [vmem:[#allocation1] sm:$0xff pattern:$0x73625140]  ;;  %v889_v7 = vstv %s4007_s29  ;;  %v2781_v15 = vld [vmem:[%s6193_s7 + $0x4c8] sm:$0xff] }
 0x1e3   :  { %1183 = vrot.lane.b32.xlu0 %v1180_v22, %s3272_s18  ;;  %1252 = vmatpush.msra.mxu2 %v2797_v55  ;;  %v2844_v13 = vld [vmem:[%s6193_s7 + $0x6c0] sm:$0xff]  ;;  %v2845_v22 = vld [vmem:[%s6193_s7 + $0x6c8] sm:$0xff]  ;;  %v890_v17 = vmul.f32 %v889_v7, %v3792_v27  ;;  %v2814_v55 = vld [vmem:[%s6193_s7 + $0x5d0] sm:$0xff] }
 0x1e4   :  { %1368 = vst [vmem:[#allocation1] ss:$4 sm:$0xff] %v695_v16  ;;  %v872_v16 = vmul.f32 %v871_v6, %v3786_v24  ;;  %1275 = vmatpush.msra.mxu3 %v2849_v19  ;;  %1216 = vmatpush.msra.mxu0 %v2780_v10  ;;  %v2840_v24 = vld [vmem:[%s6193_s7 + $0x6a0] sm:$0xff]  ;;  %v2777_v27 = vld [vmem:[%s6193_s7 + $0x4a8] sm:$0xff]  ;;  %v2803_v28 = vld [vmem:[%s6193_s7 + $0x578] sm:$0xff] }
 0x1e5   :  { %1253 = vmatpush.msra.mxu2 %v2793_v59  ;;  %1236 = vmatpush.msra.mxu1 %v2844_v13  ;;  %v2821_v14 = vld [vmem:[%s6193_s7 + $0x608] sm:$0xff]  ;;  %v2874_v59 = vld [vmem:[%s6193_s7 + $0x7b0] sm:$0xff]  ;;  %v2799_v10 = vld [vmem:[%s6193_s7 + $0x558] sm:$0xff] }
 0x1e6   :  { %1276 = vmatpush.msra.mxu3 %v2845_v22  ;;  %1217 = vmatpush.msra.mxu0 %v2776_v2  ;;  %v2798_v6 = vld [vmem:[%s6193_s7 + $0x550] sm:$0xff]  ;;  %v2863_v7 = vld [vmem:[%s6193_s7 + $0x758] sm:$0xff] }
 0x1e7   :  { %1254 = vmatpush.msra.mxu2 %v2789_v5  ;;  %1237 = vmatpush.msra.mxu1 %v2840_v24  ;;  %v2871_v5 = vld [vmem:[%s6193_s7 + $0x798] sm:$0xff]  ;;  %v2862_v19 = vld [vmem:[%s6193_s7 + $0x750] sm:$0xff] }
 0x1e8   :  { %1277 = vmatpush.msra.mxu3 %v2841_v21  ;;  %1218 = vmatpush.msra.mxu0 %v2772_v45  ;;  %v2794_v13 = vld [vmem:[%s6193_s7 + $0x530] sm:$0xff]  ;;  %v2859_v22 = vld [vmem:[%s6193_s7 + $0x738] sm:$0xff] }
 0x1e9   :  { %1255 = vmatpush.msra.mxu2 %v2785_v12  ;;  %1238 = vmatpush.msra.mxu1 %v2836_v11  ;;  %v2867_v12 = vld [vmem:[%s6193_s7 + $0x778] sm:$0xff]  ;;  %v2850_v21 = vld [vmem:[%s6193_s7 + $0x6f0] sm:$0xff] }
 0x1ea   :  { %817 = vrot.lane.b32.xlu2 %v815_v23, %s3273_s2  ;;  %799 = vrot.lane.b32.xlu1 %v797_v37, %s3273_s2  ;;  %v2765_v23 = vld [vmem:[%s6193_s7 + $0x448] sm:$0xff]  ;;  %v2791_v2 = vld [vmem:[%s6193_s7 + $0x518] sm:$0xff] }
 0x1eb   :  { %835 = vrot.lane.b32.xlu0 %v833_v41, %s3273_s2  ;;  %v1370_v60 = vld.sshfl [vmem:[#allocation1 + $0x8] sm:$0xff pattern:$0x73625140]  ;;  %v1371_v42 = vld.sshfl [vmem:[#allocation1 + $0x10] sm:$0xff pattern:$0x73625140]  ;;  %1256 = vmatpush.msra.mxu2 %v2781_v15 }
 0x1ec   :  { %v1369_v20 = vld.sshfl [vmem:[#allocation1] sm:$0xff pattern:$0x73625140]  ;;  %1278 = vmatpush.msra.mxu3 %v2837_v3  ;;  %1219 = vmatpush.msra.mxu0 %v2768_v43  ;;  %v2829_v37 = vld [vmem:[%s6193_s7 + $0x648] sm:$0xff]  ;;  %v2858_v15 = vld [vmem:[%s6193_s7 + $0x730] sm:$0xff] }
 0x1ed   :  { %1257 = vmatpush.msra.mxu2 %v2777_v27  ;;  %1239 = vmatpush.msra.mxu1 %v2832_v33  ;;  %v2761_v41 = vld [vmem:[%s6193_s7 + $0x428] sm:$0xff]  ;;  %v2855_v24 = vld [vmem:[%s6193_s7 + $0x718] sm:$0xff]  ;;  %v2786_v27 = vld [vmem:[%s6193_s7 + $0x4f0] sm:$0xff] }
 0x1ee   :  { %1279 = vmatpush.msra.mxu3 %v2833_v36  ;;  %1220 = vmatpush.msra.mxu0 %v2764_v47  ;;  %v2787_v45 = vld [vmem:[%s6193_s7 + $0x4f8] sm:$0xff]  ;;  %v2846_v3 = vld [vmem:[%s6193_s7 + $0x6d0] sm:$0xff] }
 0x1ef   :  { %1258 = vmatpush.msra.mxu2 %v2773_v26  ;;  %1240 = vmatpush.msra.mxu1 %v2828_v35  ;;  %v2851_v11 = vld [vmem:[%s6193_s7 + $0x6f8] sm:$0xff]  ;;  %v2782_v26 = vld [vmem:[%s6193_s7 + $0x4d0] sm:$0xff] }
 0x1f0   :  { %1280 = vmatpush.msra.mxu3 %v2829_v37  ;;  %1221 = vmatpush.msra.mxu0 %v2760_v18  ;;  %v2847_v43 = vld [vmem:[%s6193_s7 + $0x6d8] sm:$0xff]  ;;  %v2778_v33 = vld [vmem:[%s6193_s7 + $0x4b0] sm:$0xff] }
 0x1f1   :  { %1259 = vmatpush.msra.mxu2 %v2769_v49  ;;  %1241 = vmatpush.msra.mxu1 %v2824_v39  ;;  %v2842_v49 = vld [vmem:[%s6193_s7 + $0x6b0] sm:$0xff]  ;;  %v2779_v36 = vld [vmem:[%s6193_s7 + $0x4b8] sm:$0xff] }
 0x1f2   :  { %857 = vrot.lane.b32.xlu1 %v855_v30, %s3273_s2  ;;  %1374 = vrot.lane.b32.xlu2 %v1370_v60, %s3272_s18  ;;  %v2810_v30 = vld [vmem:[%s6193_s7 + $0x5b0] sm:$0xff]  ;;  %v2811_v60 = vld [vmem:[%s6193_s7 + $0x5b8] sm:$0xff] }
 0x1f3   :  { %1376 = vrot.lane.b32.xlu0 %v1371_v42, %s3272_s18  ;;  %1260 = vmatpush.msra.mxu2 %v2765_v23  ;;  %v2870_v42 = vld [vmem:[%s6193_s7 + $0x790] sm:$0xff]  ;;  %v2843_v47 = vld [vmem:[%s6193_s7 + $0x6b8] sm:$0xff] }
 0x1f4   :  { %1281 = vmatpush.msra.mxu3 %v2825_v44  ;;  %1222 = vmatpush.msra.mxu0 %v2756_v48  ;;  %v2838_v35 = vld [vmem:[%s6193_s7 + $0x690] sm:$0xff]  ;;  %v2775_v23 = vld [vmem:[%s6193_s7 + $0x498] sm:$0xff] }
 0x1f5   :  { %1261 = vmatpush.msra.mxu2 %v2761_v41  ;;  %1242 = vmatpush.msra.mxu1 %v2820_v51  ;;  %v2839_v37 = vld [vmem:[%s6193_s7 + $0x698] sm:$0xff]  ;;  %v2770_v18 = vld [vmem:[%s6193_s7 + $0x470] sm:$0xff] }
 0x1f6   :  { %1282 = vmatpush.msra.mxu3 %v2821_v14  ;;  %1287 = vmatpush.msrb.mxu0 %v2818_v53  ;;  %v2834_v39 = vld [vmem:[%s6193_s7 + $0x670] sm:$0xff]  ;;  %v2771_v41 = vld [vmem:[%s6193_s7 + $0x478] sm:$0xff] }
 0x1f7   :  { %1262 = vmatpush.msra.mxu2 %v2757_v40  ;;  %2888 = vmatpush.msk.msrb.mxu1 %vm133_vm0, %v2882_v8  ;;  %v2835_v44 = vld [vmem:[%s6193_s7 + $0x678] sm:$0xff]  ;;  %v2766_v48 = vld [vmem:[%s6193_s7 + $0x450] sm:$0xff] }
 0x1f8   :  { %2890 = vmatpush.msk.msrb.mxu3 %vm133_vm0, %v2883_v54  ;;  %1288 = vmatpush.msrb.mxu0 %v2814_v55  ;;  %v2830_v51 = vld [vmem:[%s6193_s7 + $0x650] sm:$0xff]  ;;  %v2767_v40 = vld [vmem:[%s6193_s7 + $0x458] sm:$0xff] }
 0x1f9   :  { %1327 = vmatpush.msrb.mxu2 %v2819_v0  ;;  %1308 = vmatpush.msrb.mxu1 %v2878_v56  ;;  %v2831_v14 = vld [vmem:[%s6193_s7 + $0x658] sm:$0xff]  ;;  %v2762_v53 = vld [vmem:[%s6193_s7 + $0x430] sm:$0xff] }
 0x1fa   :  { %874 = vrot.lane.b32.xlu2 %v872_v16, %s3273_s2  ;;  %1372 = vrot.lane.b32.xlu1 %v1369_v20, %s3272_s18  ;;  %v2795_v16 = vld [vmem:[%s6193_s7 + $0x538] sm:$0xff]  ;;  %v2854_v20 = vld [vmem:[%s6193_s7 + $0x710] sm:$0xff] }
 0x1fb   :  { %892 = vrot.lane.b32.xlu0 %v890_v17, %s3273_s2  ;;  %1328 = vmatpush.msrb.mxu2 %v2815_v57  ;;  %v2790_v17 = vld [vmem:[%s6193_s7 + $0x510] sm:$0xff]  ;;  %v2763_v0 = vld [vmem:[%s6193_s7 + $0x438] sm:$0xff] }
 0x1fc   :  { %1348 = vmatpush.msrb.mxu3 %v2879_v58  ;;  %1289 = vmatpush.msrb.mxu0 %v2810_v30  ;;  %v2826_v8 = vld [vmem:[%s6193_s7 + $0x630] sm:$0xff]  ;;  %v2827_v54 = vld [vmem:[%s6193_s7 + $0x638] sm:$0xff] }
 0x1fd   :  { %1309 = vmatpush.msrb.mxu1 %v2874_v59  ;;  %1329 = vmatpush.msrb.mxu2 %v2811_v60  ;;  %v2758_v55 = vld [vmem:[%s6193_s7 + $0x410] sm:$0xff]  ;;  %v2759_v57 = vld [vmem:[%s6193_s7 + $0x418] sm:$0xff]  ;;  %v783_v60 = vpop.permute.xlu0 %782 }
 0x1fe   :  { %1349 = vmatpush.msrb.mxu3 %v2875_v50  ;;  %1290 = vmatpush.msrb.mxu0 %v2806_v63  ;;  %v2822_v56 = vld [vmem:[%s6193_s7 + $0x610] sm:$0xff]  ;;  %v2823_v58 = vld [vmem:[%s6193_s7 + $0x618] sm:$0xff] }
 0x1ff   :  { %1310 = vmatpush.msrb.mxu1 %v2870_v42  ;;  %1330 = vmatpush.msrb.mxu2 %v2807_v4 }
 0x200   :  { %1350 = vmatpush.msrb.mxu3 %v2871_v5  ;;  %1291 = vmatpush.msrb.mxu0 %v2802_v25  ;;  %v981_v5 = vld [vmem:[%s6193_s7 + $0x1e0] sm:$0xff] }
 0x201   :  { %1311 = vmatpush.msrb.mxu1 %v2866_v9  ;;  %1331 = vmatpush.msrb.mxu2 %v2803_v28  ;;  %v1045_v25 = vld [vmem:[%s6193_s7 + $0x3e0] sm:$0x3]  ;;  %v982_v28 = vld [vmem:[%s6193_s7 + $0x1e8] sm:$0xff] }
 0x202   :  { %910 = vrot.lane.b32.xlu1 %v908_v34, %s3273_s2  ;;  %1351 = vmatpush.msrb.mxu3 %v2867_v12  ;;  %v2774_v34 = vld [vmem:[%s6193_s7 + $0x490] sm:$0xff]  ;;  %v1046_v12 = vld [vmem:[%s6193_s7 + $0x3e8] sm:$0x3] }
 0x203   :  { %1292 = vmatpush.msrb.mxu0 %v2798_v6  ;;  %1312 = vmatpush.msrb.mxu1 %v2862_v19  ;;  %v977_v6 = vld [vmem:[%s6193_s7 + $0x1c0] sm:$0xff] }
 0x204   :  { %1332 = vmatpush.msrb.mxu2 %v2799_v10  ;;  %1352 = vmatpush.msrb.mxu3 %v2863_v7  ;;  %v1041_v19 = vld [vmem:[%s6193_s7 + $0x3c0] sm:$0xff]  ;;  %v978_v10 = vld [vmem:[%s6193_s7 + $0x1c8] sm:$0xff] }
 0x205   :  { %1293 = vmatpush.msrb.mxu0 %v2794_v13  ;;  %1313 = vmatpush.msrb.mxu1 %v2858_v15  ;;  %v1042_v7 = vld [vmem:[%s6193_s7 + $0x3c8] sm:$0xff]  ;;  %v784_v13 = vrot.slane %v783_v60, 6  ;;  %v973_v15 = vld [vmem:[%s6193_s7 + $0x1a0] sm:$0xff] }
 0x206   :  { %1333 = vmatpush.msrb.mxu2 %v2795_v16  ;;  %1353 = vmatpush.msrb.mxu3 %v2859_v22  ;;  %v1037_v16 = vld [vmem:[%s6193_s7 + $0x3a0] sm:$0xff]  ;;  %v974_v22 = vld [vmem:[%s6193_s7 + $0x1a8] sm:$0xff] }
 0x207   :  { %1294 = vmatpush.msrb.mxu0 %v2790_v17  ;;  %1314 = vmatpush.msrb.mxu1 %v2854_v20  ;;  %v1038_v17 = vld [vmem:[%s6193_s7 + $0x3a8] sm:$0xff] }
 0x208   :  { %1334 = vmatpush.msrb.mxu2 %v2791_v2  ;;  %1354 = vmatpush.msrb.mxu3 %v2855_v24  ;;  %v1033_v2 = vld [vmem:[%s6193_s7 + $0x380] sm:$0xff] }
 0x209   :  { %1295 = vmatpush.msrb.mxu0 %v2786_v27  ;;  %1315 = vmatpush.msrb.mxu1 %v2850_v21  ;;  %v969_v24 = vld [vmem:[%s6193_s7 + $0x180] sm:$0xff]  ;;  %v1034_v27 = vld [vmem:[%s6193_s7 + $0x388] sm:$0xff] }
 0x20a   :  { %1335 = vmatpush.msrb.mxu2 %v2787_v45  ;;  %1355 = vmatpush.msrb.mxu3 %v2851_v11  ;;  %v970_v45 = vld [vmem:[%s6193_s7 + $0x188] sm:$0xff]  ;;  %v785_v11 = vsel %vm634_vm5, %v784_v13, %v783_v60 }
 0x20b   :  { %1296 = vmatpush.msrb.mxu0 %v2782_v26  ;;  %1316 = vmatpush.msrb.mxu1 %v2846_v3  ;;  %v1018_v60 = vld [vmem:[%s6193_s7 + $0x308] sm:$0xff] }
 0x20c   :  { %1336 = vmatpush.msrb.mxu2 %v2783_v29  ;;  %1356 = vmatpush.msrb.mxu3 %v2847_v43  ;;  %v1010_v13 = vld [vmem:[%s6193_s7 + $0x2c8] sm:$0xff] }
 0x20d   :  { %1297 = vmatpush.msrb.mxu0 %v2778_v33  ;;  %1317 = vmatpush.msrb.mxu1 %v2842_v49 }
 0x20e   :  { %1337 = vmatpush.msrb.mxu2 %v2779_v36  ;;  %1357 = vmatpush.msrb.mxu3 %v2843_v47  ;;  %v965_v36 = vld [vmem:[%s6193_s7 + $0x160] sm:$0xff] }
 0x20f   :  { %1298 = vmatpush.msrb.mxu0 %v2774_v34  ;;  %1318 = vmatpush.msrb.mxu1 %v2838_v35  ;;  %v1029_v47 = vld [vmem:[%s6193_s7 + $0x360] sm:$0xff]  ;;  %v787_v34 = vadd.f32 %v785_v11, %v3836_v61 }
 0x210   :  { %1338 = vmatpush.msrb.mxu2 %v2775_v23  ;;  %1358 = vmatpush.msrb.mxu3 %v2839_v37  ;;  %v966_v23 = vld [vmem:[%s6193_s7 + $0x168] sm:$0xff]  ;;  %v961_v61 = vld [vmem:[%s6193_s7 + $0x140] sm:$0xff] }
 0x211   :  { %1299 = vmatpush.msrb.mxu0 %v2770_v18  ;;  %1319 = vmatpush.msrb.mxu1 %v2834_v39  ;;  %v1030_v37 = vld [vmem:[%s6193_s7 + $0x368] sm:$0xff] }
 0x212   :  { %1339 = vmatpush.msrb.mxu2 %v2771_v41  ;;  %1359 = vmatpush.msrb.mxu3 %v2835_v44 }
 0x213   :  { %1300 = vmatpush.msrb.mxu0 %v2766_v48  ;;  %1320 = vmatpush.msrb.mxu1 %v2830_v51  ;;  %v962_v48 = vld [vmem:[%s6193_s7 + $0x148] sm:$0xff] }
 0x214   :  { %1340 = vmatpush.msrb.mxu2 %v2767_v40  ;;  %1360 = vmatpush.msrb.mxu3 %v2831_v14  ;;  %v1026_v51 = vld [vmem:[%s6193_s7 + $0x348] sm:$0xff]  ;;  %v957_v40 = vld [vmem:[%s6193_s7 + $0x120] sm:$0xff] }
 0x215   :  { %1301 = vmatpush.msrb.mxu0 %v2762_v53  ;;  %1321 = vmatpush.msrb.mxu1 %v2826_v8  ;;  %v958_v8 = vld [vmem:[%s6193_s7 + $0x128] sm:$0xff] }
 0x216   :  { %1341 = vmatpush.msrb.mxu2 %v2763_v0  ;;  %1361 = vmatpush.msrb.mxu3 %v2827_v54  ;;  %v1022_v0 = vld [vmem:[%s6193_s7 + $0x328] sm:$0xff] }
 0x217   :  { %1302 = vmatpush.msrb.mxu0 %v2758_v55  ;;  %1322 = vmatpush.msrb.mxu1 %v2822_v56  ;;  %v843_v56 = vstv %s4396_s4 }
 0x218   :  { %1342 = vmatpush.msrb.mxu2 %v2759_v57  ;;  %1362 = vmatpush.msrb.mxu3 %v2823_v58  ;;  %v953_v58 = vld [vmem:[%s6193_s7 + $0x100] sm:$0xff] }
 0x23c   :  { %v1188_v30 = vpop.permute.xlu2 %1187 }
 0x244   :  { %v818_v59 = vpop.permute.xlu2 %817 }
 0x245   :  { %v819_v20 = vrot.slane %v818_v59, 6 }
 0x247   :  { %v820_v33 = vsel %vm634_vm5, %v819_v20, %v818_v59 }
 0x248   :  { %v822_v41 = vadd.f32 %v820_v33, %v3816_v46  ;;  %v1021_v46 = vld [vmem:[%s6193_s7 + $0x320] sm:$0xff]  ;;  %v998_v33 = vld [vmem:[%s6193_s7 + $0x268] sm:$0xff] }
 0x24c   :  { %v4339_v50 = vpop.permute.xlu2 %1374 }
 0x254   :  { %v1186_v63 = vpop.permute.xlu1 %1185  ;;  %v875_v29 = vpop.permute.xlu2 %874 }
 0x255   :  { %v1190_v42 = vsel %vm587_vm4, %v1186_v63, %v1188_v30  ;;  %v1184_v4 = vpop.permute.xlu0 %1183  ;;  %v876_v18 = vrot.slane %v875_v29, 6 }
 0x256   :  { %v1189_v9 = vsel %vm587_vm4, %v1184_v4, %v1186_v63  ;;  %2885 = vmatmul.msk.f32.vlgmr.msra.gmra.mxu1 %vm1192_vm6, %v1190_v42  ;;  %2887 = vmatmul.msk.f32.vlgmr.msra.gmra.mxu3 %vm1192_vm6, %v1190_v42  ;;  %v954_v63 = vld [vmem:[%s6193_s7 + $0x108] sm:$0xff]  ;;  %v949_v4 = vld [vmem:[%s6193_s7 + $0xe0] sm:$0xff] }
 0x257   :  { %1223 = vmatmul.f32.vlgmr.msra.gmra.mxu0 %v1189_v9  ;;  %1263 = vmatmul.f32.vlgmr.msra.gmra.mxu2 %v1189_v9  ;;  %v877_v55 = vsel %vm634_vm5, %v876_v18, %v875_v29  ;;  %v926_v18 = vld [vmem:[%s6193_s7 + $0x28] sm:$0xff] }
 0x258   :  { %1395 = vmatpush.msra.mxu0 %v981_v5  ;;  %2892 = vmatpush.msk.msra.mxu1 %vm133_vm0, %v1045_v25  ;;  %v1013_v5 = vld [vmem:[%s6193_s7 + $0x2e0] sm:$0xff]  ;;  %v879_v25 = vadd.f32 %v877_v55, %v3842_v62 }
 0x259   :  { %1435 = vmatpush.msra.mxu2 %v982_v28  ;;  %2894 = vmatpush.msk.msra.mxu3 %vm133_vm0, %v1046_v12  ;;  %v950_v12 = vld [vmem:[%s6193_s7 + $0xe8] sm:$0xff]  ;;  %v1009_v62 = vld [vmem:[%s6193_s7 + $0x2c0] sm:$0xff] }
 0x25a   :  { %1396 = vmatpush.msra.mxu0 %v977_v6  ;;  %1416 = vmatpush.msra.mxu1 %v1041_v19  ;;  %v1014_v6 = vld [vmem:[%s6193_s7 + $0x2e8] sm:$0xff]  ;;  %v945_v19 = vld [vmem:[%s6193_s7 + $0xc0] sm:$0xff] }
 0x25b   :  { %1436 = vmatpush.msra.mxu2 %v978_v10  ;;  %1456 = vmatpush.msra.mxu3 %v1042_v7  ;;  %v946_v7 = vld [vmem:[%s6193_s7 + $0xc8] sm:$0xff] }
 0x25c   :  { %1397 = vmatpush.msra.mxu0 %v973_v15  ;;  %1417 = vmatpush.msra.mxu1 %v1037_v16  ;;  %v800_v21 = vpop.permute.xlu1 %799  ;;  %v941_v15 = vld [vmem:[%s6193_s7 + $0xa0] sm:$0xff] }
 0x25d   :  { %1437 = vmatpush.msra.mxu2 %v974_v22  ;;  %1457 = vmatpush.msra.mxu3 %v1038_v17  ;;  %v801_v26 = vrot.slane %v800_v21, 6  ;;  %v836_v3 = vpop.permute.xlu0 %835  ;;  %v1005_v16 = vld [vmem:[%s6193_s7 + $0x2a0] sm:$0xff]  ;;  %v942_v22 = vld [vmem:[%s6193_s7 + $0xa8] sm:$0xff] }
 0x25e   :  { %1418 = vmatpush.msra.mxu1 %v1033_v2  ;;  %1398 = vmatpush.msra.mxu0 %v969_v24  ;;  %v837_v43 = vrot.slane %v836_v3, 6  ;;  %v1006_v17 = vld [vmem:[%s6193_s7 + $0x2a8] sm:$0xff]  ;;  %v937_v2 = vld [vmem:[%s6193_s7 + $0x80] sm:$0xff] }
 0x25f   :  { %1458 = vmatpush.msra.mxu3 %v1034_v27  ;;  %v802_v49 = vsel %vm634_vm5, %v801_v26, %v800_v21  ;;  %1438 = vmatpush.msra.mxu2 %v970_v45  ;;  %v1001_v24 = vld [vmem:[%s6193_s7 + $0x280] sm:$0xff]  ;;  %v938_v21 = vld [vmem:[%s6193_s7 + $0x88] sm:$0xff] }
 0x260   :  { %v804_v35 = vadd.f32 %v802_v49, %v3844_v38  ;;  %1303 = vmatmul.f32.vlgmr.msrb.gmra.mxu0 %v1189_v9  ;;  %2889 = vmatmul.msk.f32.vlgmr.msrb.gmra.mxu1 %vm1192_vm6, %v1190_v42  ;;  %v838_v39 = vsel %vm634_vm5, %v837_v43, %v836_v3  ;;  %v1025_v38 = vld [vmem:[%s6193_s7 + $0x340] sm:$0xff]  ;;  %v1002_v45 = vld [vmem:[%s6193_s7 + $0x288] sm:$0xff] }
 0x261   :  { %1343 = vmatmul.f32.vlgmr.msrb.gmra.mxu2 %v1189_v9  ;;  %2891 = vmatmul.msk.f32.vlgmr.msrb.gmra.mxu3 %vm1192_vm6, %v1190_v42  ;;  %v840_v53 = vadd.f32 %v838_v39, %v3871_v31  ;;  %v1017_v31 = vld [vmem:[%s6193_s7 + $0x300] sm:$0xff]  ;;  %v934_v43 = vld [vmem:[%s6193_s7 + $0x68] sm:$0xff] }
 0x262   :  { %v805_v44 = vadd.f32 %v804_v35, %v787_v34  ;;  %1399 = vmatpush.msra.mxu0 %v965_v36  ;;  %1419 = vmatpush.msra.mxu1 %v1029_v47  ;;  %v933_v26 = vld [vmem:[%s6193_s7 + $0x60] sm:$0xff]  ;;  %v930_v34 = vld [vmem:[%s6193_s7 + $0x48] sm:$0xff] }
 0x263   :  { %1439 = vmatpush.msra.mxu2 %v966_v23  ;;  %1459 = vmatpush.msra.mxu3 %v1030_v37  ;;  %v997_v3 = vld [vmem:[%s6193_s7 + $0x260] sm:$0xff]  ;;  %v990_v39 = vld [vmem:[%s6193_s7 + $0x228] sm:$0xff] }
 0x264   :  { %v823_v14 = vadd.f32 %v822_v41, %v805_v44  ;;  %1400 = vmatpush.msra.mxu0 %v961_v61  ;;  %1420 = vmatpush.msra.mxu1 %v1025_v38  ;;  %v858_v54 = vpop.permute.xlu1 %857  ;;  %v929_v36 = vld [vmem:[%s6193_s7 + $0x40] sm:$0xff] }
 0x265   :  { %1440 = vmatpush.msra.mxu2 %v962_v48  ;;  %1460 = vmatpush.msra.mxu3 %v1026_v51  ;;  %v859_v57 = vrot.slane %v858_v54, 6  ;;  %v4451_v30 = vpop.permute.xlu0 %1376  ;;  %v993_v47 = vld [vmem:[%s6193_s7 + $0x240] sm:$0xff]  ;;  %v922_v48 = vld [vmem:[%s6193_s7 + $0x8] sm:$0xff] }
 0x266   :  { %v841_v59 = vadd.f32 %v840_v53, %v823_v14  ;;  %1401 = vmatpush.msra.mxu0 %v957_v40  ;;  %1421 = vmatpush.msra.mxu1 %v1021_v46  ;;  %v925_v23 = vld [vmem:[%s6193_s7 + $0x20] sm:$0xff]  ;;  %v986_v51 = vld [vmem:[%s6193_s7 + $0x208] sm:$0xff] }
 0x267   :  { %1441 = vmatpush.msra.mxu2 %v958_v8  ;;  %1461 = vmatpush.msra.mxu3 %v1022_v0  ;;  %v860_v42 = vsel %vm634_vm5, %v859_v57, %v858_v54  ;;  %v989_v37 = vld [vmem:[%s6193_s7 + $0x220] sm:$0xff]  ;;  %v918_v0 = vstv %s4530_s3  ;;  %v984_v57 = vld [vmem:[%s6193_s7 + $0x1f8] sm:$0xff] }
 0x268   :  { %v844_v9 = vadd.f32 %v843_v56, %v841_v59  ;;  %1422 = vmatpush.msra.mxu1 %v1017_v31  ;;  %v862_v28 = vadd.f32 %v860_v42, %v3850_v1  ;;  %1402 = vmatpush.msra.mxu0 %v953_v58  ;;  %v921_v38 = vld [vmem:[%s6193_s7] sm:$0xff]  ;;  %v983_v56 = vld [vmem:[%s6193_s7 + $0x1f0] sm:$0xff]  ;;  %v1044_v42 = vld [vmem:[%s6193_s7 + $0x3d8] sm:$0xff] }
 0x269   :  { %1462 = vmatpush.msra.mxu3 %v1018_v60  ;;  %1442 = vmatpush.msra.mxu2 %v954_v63  ;;  %v985_v41 = vld [vmem:[%s6193_s7 + $0x200] sm:$0xff]  ;;  %v1047_v31 = vld [vmem:[%s6193_s7 + $0x3f0] sm:$0x3]  ;;  %v980_v60 = vld [vmem:[%s6193_s7 + $0x1d8] sm:$0xff] }
 0x26a   :  { %v845_v1 = vmax.f32 %v844_v9, 0.0  ;;  %v880_v10 = vadd.f32 %v879_v25, %v862_v28  ;;  %1403 = vmatpush.msra.mxu0 %v949_v4  ;;  %1423 = vmatpush.msra.mxu1 %v1013_v5  ;;  %v1043_v59 = vld [vmem:[%s6193_s7 + $0x3d0] sm:$0xff]  ;;  %v976_v25 = vld [vmem:[%s6193_s7 + $0x1b8] sm:$0xff] }
 0x26b   :  { %1443 = vmatpush.msra.mxu2 %v950_v12  ;;  %1463 = vmatpush.msra.mxu3 %v1014_v6  ;;  %v975_v4 = vld [vmem:[%s6193_s7 + $0x1b0] sm:$0xff]  ;;  %v1040_v9 = vld [vmem:[%s6193_s7 + $0x3b8] sm:$0xff] }
 0x26c   :  { %1685 = vst [vmem:[#allocation1] ss:$4 sm:$0xff] %v845_v1  ;;  %1404 = vmatpush.msra.mxu0 %v945_v19  ;;  %1424 = vmatpush.msra.mxu1 %v1009_v62  ;;  %v1373_v20 = vpop.permute.xlu1 %1372  ;;  %v1039_v5 = vld [vmem:[%s6193_s7 + $0x3b0] sm:$0xff]  ;;  %v972_v6 = vld [vmem:[%s6193_s7 + $0x198] sm:$0xff] }
 0x26d   :  { %1444 = vmatpush.msra.mxu2 %v946_v7  ;;  %1464 = vmatpush.msra.mxu3 %v1010_v13  ;;  %v893_v27 = vpop.permute.xlu0 %892  ;;  %v4567_v54 = vsel %vm587_vm4, %v1373_v20, %v4339_v50  ;;  %v971_v28 = vld [vmem:[%s6193_s7 + $0x190] sm:$0xff]  ;;  %v1036_v19 = vld [vmem:[%s6193_s7 + $0x398] sm:$0xff] }
 0x26e   :  { %1405 = vmatpush.msra.mxu0 %v941_v15  ;;  %1425 = vmatpush.msra.mxu1 %v1005_v16  ;;  %v894_v11 = vrot.slane %v893_v27, 6  ;;  %v1035_v12 = vld [vmem:[%s6193_s7 + $0x390] sm:$0xff]  ;;  %v1032_v7 = vld [vmem:[%s6193_s7 + $0x378] sm:$0xff] }
 0x26f   :  { %1445 = vmatpush.msra.mxu2 %v942_v22  ;;  %1465 = vmatpush.msra.mxu3 %v1006_v17  ;;  %v967_v62 = vld [vmem:[%s6193_s7 + $0x170] sm:$0xff]  ;;  %v964_v16 = vld [vmem:[%s6193_s7 + $0x158] sm:$0xff] }
 0x270   :  { %1406 = vmatpush.msra.mxu0 %v937_v2  ;;  %1426 = vmatpush.msra.mxu1 %v1001_v24  ;;  %v895_v29 = vsel %vm634_vm5, %v894_v11, %v893_v27  ;;  %v1031_v1 = vld [vmem:[%s6193_s7 + $0x370] sm:$0xff]  ;;  %v1028_v22 = vld [vmem:[%s6193_s7 + $0x358] sm:$0xff] }
 0x271   :  { %1446 = vmatpush.msra.mxu2 %v938_v21  ;;  %1466 = vmatpush.msra.mxu3 %v1002_v45  ;;  %v897_v49 = vadd.f32 %v895_v29, %v3847_v52  ;;  %v994_v52 = vld [vmem:[%s6193_s7 + $0x248] sm:$0xff]  ;;  %v963_v13 = vld [vmem:[%s6193_s7 + $0x150] sm:$0xff]  ;;  %v960_v2 = vld [vmem:[%s6193_s7 + $0x138] sm:$0xff] }
 0x272   :  { %1407 = vmatpush.msra.mxu0 %v933_v26  ;;  %1427 = vmatpush.msra.mxu1 %v997_v3  ;;  %v1027_v15 = vld [vmem:[%s6193_s7 + $0x350] sm:$0xff]  ;;  %v1024_v24 = vld [vmem:[%s6193_s7 + $0x338] sm:$0xff] }
 0x273   :  { %v898_v35 = vadd.f32 %v897_v49, %v880_v10  ;;  %1447 = vmatpush.msra.mxu2 %v934_v43  ;;  %1467 = vmatpush.msra.mxu3 %v998_v33  ;;  %v1688_v46 = vld.sshfl [vmem:[#allocation1 + $0x10] sm:$0xff pattern:$0x73625140]  ;;  %v1687_v14 = vld.sshfl [vmem:[#allocation1 + $0x8] sm:$0xff pattern:$0x73625140] }
 0x274   :  { %1408 = vmatpush.msra.mxu0 %v929_v36  ;;  %1428 = vmatpush.msra.mxu1 %v993_v47  ;;  %v911_v61 = vpop.permute.xlu1 %910  ;;  %v1686_v8 = vld.sshfl [vmem:[#allocation1] sm:$0xff pattern:$0x73625140]  ;;  %v968_v10 = vld [vmem:[%s6193_s7 + $0x178] sm:$0xff]  ;;  %v959_v17 = vld [vmem:[%s6193_s7 + $0x130] sm:$0xff] }
 0x275   :  { %1448 = vmatpush.msra.mxu2 %v930_v34  ;;  %1468 = vmatpush.msra.mxu3 %v994_v52  ;;  %v912_v44 = vrot.slane %v911_v61, 6  ;;  %v1023_v20 = vld [vmem:[%s6193_s7 + $0x330] sm:$0xff]  ;;  %v956_v45 = vld [vmem:[%s6193_s7 + $0x118] sm:$0xff] }
 0x276   :  { %1409 = vmatpush.msra.mxu0 %v925_v23  ;;  %1429 = vmatpush.msra.mxu1 %v989_v37  ;;  %v955_v27 = vld [vmem:[%s6193_s7 + $0x110] sm:$0xff]  ;;  %v1020_v11 = vld [vmem:[%s6193_s7 + $0x318] sm:$0xff] }
 0x277   :  { %1449 = vmatpush.msra.mxu2 %v926_v18  ;;  %1469 = vmatpush.msra.mxu3 %v990_v39  ;;  %v913_v40 = vsel %vm634_vm5, %v912_v44, %v911_v61  ;;  %v1019_v21 = vld [vmem:[%s6193_s7 + $0x310] sm:$0xff]  ;;  %v952_v29 = vld [vmem:[%s6193_s7 + $0xf8] sm:$0xff] }
 0x278   :  { %1410 = vmatpush.msra.mxu0 %v921_v38  ;;  %1430 = vmatpush.msra.mxu1 %v985_v41  ;;  %v915_v53 = vadd.f32 %v913_v40, %v3873_v32  ;;  %v4577_v32 = vsel %vm587_vm4, %v4339_v50, %v4451_v30  ;;  %v1048_v50 = vld [vmem:[%s6193_s7 + $0x3f8] sm:$0x3]  ;;  %v979_v30 = vld [vmem:[%s6193_s7 + $0x1d0] sm:$0xff] }
 0x279   :  { %1450 = vmatpush.msra.mxu2 %v922_v48  ;;  %1470 = vmatpush.msra.mxu3 %v986_v51  ;;  %v951_v26 = vld [vmem:[%s6193_s7 + $0xf0] sm:$0xff]  ;;  %v1016_v43 = vld [vmem:[%s6193_s7 + $0x2f8] sm:$0xff] }
 0x27a   :  { %v916_v55 = vadd.f32 %v915_v53, %v898_v35  ;;  %1693 = vrot.lane.b32.xlu1 %v1688_v46, %s3272_s18  ;;  %1691 = vrot.lane.b32.xlu0 %v1687_v14, %s3272_s18  ;;  %v1015_v3 = vld [vmem:[%s6193_s7 + $0x2f0] sm:$0xff]  ;;  %v948_v36 = vld [vmem:[%s6193_s7 + $0xd8] sm:$0xff] }
 0x27b   :  { %1689 = vrot.lane.b32.xlu2 %v1686_v8, %s3272_s18  ;;  %1411 = vmatmul.f32.vlgmr.msra.gmra.mxu0 %v4567_v54  ;;  %v947_v33 = vld [vmem:[%s6193_s7 + $0xd0] sm:$0xff]  ;;  %v1012_v47 = vld [vmem:[%s6193_s7 + $0x2d8] sm:$0xff] }
 0x27c   :  { %v919_v58 = vadd.f32 %v918_v0, %v916_v55  ;;  %2893 = vmatmul.msk.f32.vlgmr.msra.gmra.mxu1 %vm1192_vm6, %v4577_v32  ;;  %1451 = vmatmul.f32.vlgmr.msra.gmra.mxu2 %v4567_v54  ;;  %v1011_v49 = vld [vmem:[%s6193_s7 + $0x2d0] sm:$0xff]  ;;  %v944_v18 = vld [vmem:[%s6193_s7 + $0xb8] sm:$0xff] }
 0x27d   :  { %2895 = vmatmul.msk.f32.vlgmr.msra.gmra.mxu3 %vm1192_vm6, %v4577_v32  ;;  %1475 = vmatpush.msrb.mxu0 %v983_v56  ;;  %v943_v23 = vld [vmem:[%s6193_s7 + $0xb0] sm:$0xff]  ;;  %v1008_v39 = vld [vmem:[%s6193_s7 + $0x2b8] sm:$0xff] }
 0x27e   :  { %v920_v63 = vmax.f32 %v919_v58, 0.0  ;;  %2896 = vmatpush.msk.msrb.mxu1 %vm133_vm0, %v1047_v31  ;;  %1515 = vmatpush.msrb.mxu2 %v984_v57  ;;  %v1007_v37 = vld [vmem:[%s6193_s7 + $0x2b0] sm:$0xff]  ;;  %v940_v41 = vld [vmem:[%s6193_s7 + $0x98] sm:$0xff] }
 0x27f   :  { %2898 = vmatpush.msk.msrb.mxu3 %vm133_vm0, %v1048_v50  ;;  %1476 = vmatpush.msrb.mxu0 %v979_v30  ;;  %v939_v61 = vld [vmem:[%s6193_s7 + $0x90] sm:$0xff]  ;;  %v1004_v44 = vld [vmem:[%s6193_s7 + $0x298] sm:$0xff] }
 0x280   :  { %2006 = vst [vmem:[#allocation1] ss:$4 sm:$0xff] %v920_v63  ;;  %1496 = vmatpush.msrb.mxu1 %v1043_v59  ;;  %1516 = vmatpush.msrb.mxu2 %v980_v60  ;;  %v1003_v38 = vld [vmem:[%s6193_s7 + $0x290] sm:$0xff]  ;;  %v936_v40 = vld [vmem:[%s6193_s7 + $0x78] sm:$0xff]  ;;  %v2960_v60 = vld [vmem:[%s6193_s7 + $0x9e0] sm:$0xff] }
 0x281   :  { %1536 = vmatpush.msrb.mxu3 %v1044_v42  ;;  %1477 = vmatpush.msrb.mxu0 %v975_v4  ;;  %v935_v48 = vld [vmem:[%s6193_s7 + $0x70] sm:$0xff]  ;;  %v1000_v46 = vld [vmem:[%s6193_s7 + $0x278] sm:$0xff]  ;;  %v3024_v63 = vld [vmem:[%s6193_s7 + $0xbe0] sm:$0x3] }
 0x282   :  { %1497 = vmatpush.msrb.mxu1 %v1039_v5  ;;  %1517 = vmatpush.msrb.mxu2 %v976_v25  ;;  %v999_v51 = vld [vmem:[%s6193_s7 + $0x270] sm:$0xff]  ;;  %v932_v8 = vld [vmem:[%s6193_s7 + $0x58] sm:$0xff]  ;;  %v2961_v42 = vld [vmem:[%s6193_s7 + $0x9e8] sm:$0xff] }
 0x283   :  { %1537 = vmatpush.msrb.mxu3 %v1040_v9  ;;  %1478 = vmatpush.msrb.mxu0 %v971_v28  ;;  %v931_v14 = vld [vmem:[%s6193_s7 + $0x50] sm:$0xff]  ;;  %v996_v0 = vld [vmem:[%s6193_s7 + $0x258] sm:$0xff]  ;;  %v3025_v4 = vld [vmem:[%s6193_s7 + $0xbe8] sm:$0x3] }
 0x284   :  { %1498 = vmatpush.msrb.mxu1 %v1035_v12  ;;  %1518 = vmatpush.msrb.mxu2 %v972_v6  ;;  %v995_v53 = vld [vmem:[%s6193_s7 + $0x250] sm:$0xff]  ;;  %v928_v31 = vld [vmem:[%s6193_s7 + $0x38] sm:$0xff]  ;;  %v2956_v5 = vld [vmem:[%s6193_s7 + $0x9c0] sm:$0xff] }
 0x285   :  { %1538 = vmatpush.msrb.mxu3 %v1036_v19  ;;  %1479 = vmatpush.msrb.mxu0 %v967_v62  ;;  %v927_v55 = vld [vmem:[%s6193_s7 + $0x30] sm:$0xff]  ;;  %v992_v57 = vld [vmem:[%s6193_s7 + $0x238] sm:$0xff]  ;;  %v3020_v25 = vld [vmem:[%s6193_s7 + $0xbc0] sm:$0xff] }
 0x286   :  { %1499 = vmatpush.msrb.mxu1 %v1031_v1  ;;  %1519 = vmatpush.msrb.mxu2 %v968_v10  ;;  %v991_v56 = vld [vmem:[%s6193_s7 + $0x230] sm:$0xff]  ;;  %v924_v30 = vld [vmem:[%s6193_s7 + $0x18] sm:$0xff]  ;;  %v2957_v9 = vld [vmem:[%s6193_s7 + $0x9c8] sm:$0xff] }
 0x287   :  { %1539 = vmatpush.msrb.mxu3 %v1032_v7  ;;  %1480 = vmatpush.msrb.mxu0 %v963_v13  ;;  %v2009_v34 = vld.sshfl [vmem:[#allocation1 + $0x10] sm:$0xff pattern:$0x73625140]  ;;  %v2008_v52 = vld.sshfl [vmem:[#allocation1 + $0x8] sm:$0xff pattern:$0x73625140] }
 0x288   :  { %1500 = vmatpush.msrb.mxu1 %v1027_v15  ;;  %1520 = vmatpush.msrb.mxu2 %v964_v16  ;;  %v2007_v35 = vld.sshfl [vmem:[#allocation1] sm:$0xff pattern:$0x73625140]  ;;  %v923_v58 = vld [vmem:[%s6193_s7 + $0x10] sm:$0xff]  ;;  %v988_v59 = vld [vmem:[%s6193_s7 + $0x218] sm:$0xff] }
 0x289   :  { %1540 = vmatpush.msrb.mxu3 %v1028_v22  ;;  %1481 = vmatpush.msrb.mxu0 %v959_v17  ;;  %v987_v50 = vld [vmem:[%s6193_s7 + $0x210] sm:$0xff]  ;;  %v3016_v28 = vld [vmem:[%s6193_s7 + $0xba0] sm:$0xff]  ;;  %v2953_v12 = vld [vmem:[%s6193_s7 + $0x9a8] sm:$0xff] }
 0x28a   :  { %1501 = vmatpush.msrb.mxu1 %v1023_v20  ;;  %1521 = vmatpush.msrb.mxu2 %v960_v2  ;;  %v3017_v6 = vld [vmem:[%s6193_s7 + $0xba8] sm:$0xff]  ;;  %v2948_v19 = vld [vmem:[%s6193_s7 + $0x980] sm:$0xff] }
 0x28b   :  { %1541 = vmatpush.msrb.mxu3 %v1024_v24  ;;  %1482 = vmatpush.msrb.mxu0 %v955_v27  ;;  %v3012_v62 = vld [vmem:[%s6193_s7 + $0xb80] sm:$0xff]  ;;  %v2949_v1 = vld [vmem:[%s6193_s7 + $0x988] sm:$0xff] }
 0x28c   :  { %1502 = vmatpush.msrb.mxu1 %v1019_v21  ;;  %1522 = vmatpush.msrb.mxu2 %v956_v45  ;;  %v3013_v10 = vld [vmem:[%s6193_s7 + $0xb88] sm:$0xff]  ;;  %v2944_v7 = vld [vmem:[%s6193_s7 + $0x960] sm:$0xff] }
 0x28d   :  { %1542 = vmatpush.msrb.mxu3 %v1020_v11  ;;  %1483 = vmatpush.msrb.mxu0 %v951_v26  ;;  %v3008_v13 = vld [vmem:[%s6193_s7 + $0xb60] sm:$0xff]  ;;  %v2945_v15 = vld [vmem:[%s6193_s7 + $0x968] sm:$0xff] }
 0x28e   :  { %1503 = vmatpush.msrb.mxu1 %v1015_v3  ;;  %1523 = vmatpush.msrb.mxu2 %v952_v29  ;;  %v3009_v16 = vld [vmem:[%s6193_s7 + $0xb68] sm:$0xff]  ;;  %v2940_v22 = vld [vmem:[%s6193_s7 + $0x940] sm:$0xff] }
 0x28f   :  { %1543 = vmatpush.msrb.mxu3 %v1016_v43  ;;  %1484 = vmatpush.msrb.mxu0 %v947_v33  ;;  %v3004_v17 = vld [vmem:[%s6193_s7 + $0xb40] sm:$0xff]  ;;  %v2941_v20 = vld [vmem:[%s6193_s7 + $0x948] sm:$0xff] }
 0x290   :  { %1504 = vmatpush.msrb.mxu1 %v1011_v49  ;;  %1524 = vmatpush.msrb.mxu2 %v948_v36  ;;  %v3005_v2 = vld [vmem:[%s6193_s7 + $0xb48] sm:$0xff]  ;;  %v2936_v24 = vld [vmem:[%s6193_s7 + $0x920] sm:$0xff] }
 0x291   :  { %1544 = vmatpush.msrb.mxu3 %v1012_v47  ;;  %2014 = vrot.lane.b32.xlu1 %v2009_v34, %s3272_s18  ;;  %v3000_v27 = vld [vmem:[%s6193_s7 + $0xb20] sm:$0xff]  ;;  %v2937_v21 = vld [vmem:[%s6193_s7 + $0x928] sm:$0xff] }
 0x292   :  { %2012 = vrot.lane.b32.xlu0 %v2008_v52, %s3272_s18  ;;  %2010 = vrot.lane.b32.xlu2 %v2007_v35, %s3272_s18  ;;  %v3001_v45 = vld [vmem:[%s6193_s7 + $0xb28] sm:$0xff]  ;;  %v2932_v11 = vld [vmem:[%s6193_s7 + $0x900] sm:$0xff] }
 0x293   :  { %1485 = vmatpush.msrb.mxu0 %v943_v23  ;;  %1505 = vmatpush.msrb.mxu1 %v1007_v37  ;;  %v2996_v26 = vld [vmem:[%s6193_s7 + $0xb00] sm:$0xff]  ;;  %v2933_v3 = vld [vmem:[%s6193_s7 + $0x908] sm:$0xff] }
 0x294   :  { %1525 = vmatpush.msrb.mxu2 %v944_v18  ;;  %1545 = vmatpush.msrb.mxu3 %v1008_v39  ;;  %v2997_v29 = vld [vmem:[%s6193_s7 + $0xb08] sm:$0xff]  ;;  %v2928_v43 = vld [vmem:[%s6193_s7 + $0x8e0] sm:$0xff] }
 0x295   :  { %1486 = vmatpush.msrb.mxu0 %v939_v61  ;;  %1506 = vmatpush.msrb.mxu1 %v1003_v38  ;;  %v2992_v33 = vld [vmem:[%s6193_s7 + $0xae0] sm:$0xff]  ;;  %v2929_v49 = vld [vmem:[%s6193_s7 + $0x8e8] sm:$0xff] }
 0x296   :  { %1526 = vmatpush.msrb.mxu2 %v940_v41  ;;  %1546 = vmatpush.msrb.mxu3 %v1004_v44  ;;  %v2993_v36 = vld [vmem:[%s6193_s7 + $0xae8] sm:$0xff]  ;;  %v2924_v47 = vld [vmem:[%s6193_s7 + $0x8c0] sm:$0xff] }
 0x297   :  { %1487 = vmatpush.msrb.mxu0 %v935_v48  ;;  %1507 = vmatpush.msrb.mxu1 %v999_v51  ;;  %v2988_v34 = vld [vmem:[%s6193_s7 + $0xac0] sm:$0xff]  ;;  %v2925_v52 = vld [vmem:[%s6193_s7 + $0x8c8] sm:$0xff] }
 0x298   :  { %1527 = vmatpush.msrb.mxu2 %v936_v40  ;;  %1547 = vmatpush.msrb.mxu3 %v1000_v46  ;;  %v2989_v35 = vld [vmem:[%s6193_s7 + $0xac8] sm:$0xff]  ;;  %v2920_v23 = vld [vmem:[%s6193_s7 + $0x8a0] sm:$0xff] }
 0x299   :  { %1488 = vmatpush.msrb.mxu0 %v931_v14  ;;  %1508 = vmatpush.msrb.mxu1 %v995_v53  ;;  %v2984_v37 = vld [vmem:[%s6193_s7 + $0xaa0] sm:$0xff]  ;;  %v2921_v18 = vld [vmem:[%s6193_s7 + $0x8a8] sm:$0xff] }
 0x29a   :  { %1528 = vmatpush.msrb.mxu2 %v932_v8  ;;  %1548 = vmatpush.msrb.mxu3 %v996_v0  ;;  %v2985_v39 = vld [vmem:[%s6193_s7 + $0xaa8] sm:$0xff]  ;;  %v2916_v61 = vld [vmem:[%s6193_s7 + $0x880] sm:$0xff] }
 0x29b   :  { %1489 = vmatpush.msrb.mxu0 %v927_v55  ;;  %1509 = vmatpush.msrb.mxu1 %v991_v56  ;;  %v2980_v38 = vld [vmem:[%s6193_s7 + $0xa80] sm:$0xff]  ;;  %v2917_v41 = vld [vmem:[%s6193_s7 + $0x888] sm:$0xff] }
 0x29c   :  { %1529 = vmatpush.msrb.mxu2 %v928_v31  ;;  %1549 = vmatpush.msrb.mxu3 %v992_v57  ;;  %v2981_v44 = vld [vmem:[%s6193_s7 + $0xa88] sm:$0xff]  ;;  %v2912_v48 = vld [vmem:[%s6193_s7 + $0x860] sm:$0xff] }
 0x29d   :  { %1490 = vmatpush.msrb.mxu0 %v923_v58  ;;  %1510 = vmatpush.msrb.mxu1 %v987_v50  ;;  %v2976_v51 = vld [vmem:[%s6193_s7 + $0xa60] sm:$0xff]  ;;  %v2913_v40 = vld [vmem:[%s6193_s7 + $0x868] sm:$0xff] }
 0x29e   :  { %1530 = vmatpush.msrb.mxu2 %v924_v30  ;;  %1550 = vmatpush.msrb.mxu3 %v988_v59  ;;  %v2977_v46 = vld [vmem:[%s6193_s7 + $0xa68] sm:$0xff]  ;;  %v2908_v14 = vld [vmem:[%s6193_s7 + $0x840] sm:$0xff] }
 0x29f   :  { %1491 = vmatmul.f32.vlgmr.msrb.gmra.mxu0 %v4567_v54  ;;  %2897 = vmatmul.msk.f32.vlgmr.msrb.gmra.mxu1 %vm1192_vm6, %v4577_v32  ;;  %v2972_v53 = vld [vmem:[%s6193_s7 + $0xa40] sm:$0xff]  ;;  %v2909_v8 = vld [vmem:[%s6193_s7 + $0x848] sm:$0xff] }
 0x2a0   :  { %1531 = vmatmul.f32.vlgmr.msrb.gmra.mxu2 %v4567_v54  ;;  %2899 = vmatmul.msk.f32.vlgmr.msrb.gmra.mxu3 %vm1192_vm6, %v4577_v32  ;;  %v3021_v54 = vld [vmem:[%s6193_s7 + $0xbc8] sm:$0xff]  ;;  %v2952_v32 = vld [vmem:[%s6193_s7 + $0x9a0] sm:$0xff] }
 0x2a1   :  { %1712 = vmatpush.msra.mxu0 %v2960_v60  ;;  %3028 = vmatpush.msk.msra.mxu1 %vm133_vm0, %v3024_v63  ;;  %v2973_v0 = vld [vmem:[%s6193_s7 + $0xa48] sm:$0xff]  ;;  %v2904_v55 = vld [vmem:[%s6193_s7 + $0x820] sm:$0xff]  ;;  %v2962_v60 = vld [vmem:[%s6193_s7 + $0x9f0] sm:$0xff] }
 0x2a2   :  { %1752 = vmatpush.msra.mxu2 %v2961_v42  ;;  %3030 = vmatpush.msk.msra.mxu3 %vm133_vm0, %v3025_v4  ;;  %v2968_v56 = vld [vmem:[%s6193_s7 + $0xa20] sm:$0xff]  ;;  %v2905_v31 = vld [vmem:[%s6193_s7 + $0x828] sm:$0xff]  ;;  %v3026_v63 = vld [vmem:[%s6193_s7 + $0xbf0] sm:$0x3] }
 0x2a3   :  { %1713 = vmatpush.msra.mxu0 %v2956_v5  ;;  %1733 = vmatpush.msra.mxu1 %v3020_v25  ;;  %v2969_v57 = vld [vmem:[%s6193_s7 + $0xa28] sm:$0xff]  ;;  %v2900_v58 = vld [vmem:[%s6193_s7 + $0x800] sm:$0xff]  ;;  %v2963_v42 = vld [vmem:[%s6193_s7 + $0x9f8] sm:$0xff] }
 0x2a4   :  { %1753 = vmatpush.msra.mxu2 %v2957_v9  ;;  %1773 = vmatpush.msra.mxu3 %v3021_v54  ;;  %v2964_v50 = vld [vmem:[%s6193_s7 + $0xa00] sm:$0xff]  ;;  %v2901_v30 = vld [vmem:[%s6193_s7 + $0x808] sm:$0xff]  ;;  %v3027_v4 = vld [vmem:[%s6193_s7 + $0xbf8] sm:$0x3] }
 0x2a5   :  { %1714 = vmatpush.msra.mxu0 %v2952_v32  ;;  %1734 = vmatpush.msra.mxu1 %v3016_v28  ;;  %v2965_v59 = vld [vmem:[%s6193_s7 + $0xa08] sm:$0xff]  ;;  %v2958_v5 = vld [vmem:[%s6193_s7 + $0x9d0] sm:$0xff]  ;;  %v2959_v9 = vld [vmem:[%s6193_s7 + $0x9d8] sm:$0xff] }
 0x2a6   :  { %1754 = vmatpush.msra.mxu2 %v2953_v12  ;;  %1774 = vmatpush.msra.mxu3 %v3017_v6  ;;  %v3022_v25 = vld [vmem:[%s6193_s7 + $0xbd0] sm:$0xff]  ;;  %v3023_v54 = vld [vmem:[%s6193_s7 + $0xbd8] sm:$0xff] }
 0x2a7   :  { %1715 = vmatpush.msra.mxu0 %v2948_v19  ;;  %1735 = vmatpush.msra.mxu1 %v3012_v62  ;;  %v2954_v32 = vld [vmem:[%s6193_s7 + $0x9b0] sm:$0xff]  ;;  %v2955_v12 = vld [vmem:[%s6193_s7 + $0x9b8] sm:$0xff] }
 0x2a8   :  { %1755 = vmatpush.msra.mxu2 %v2949_v1  ;;  %1775 = vmatpush.msra.mxu3 %v3013_v10  ;;  %v3018_v28 = vld [vmem:[%s6193_s7 + $0xbb0] sm:$0xff]  ;;  %v3019_v6 = vld [vmem:[%s6193_s7 + $0xbb8] sm:$0xff] }
 0x2a9   :  { %1716 = vmatpush.msra.mxu0 %v2944_v7  ;;  %1736 = vmatpush.msra.mxu1 %v3008_v13  ;;  %v2950_v19 = vld [vmem:[%s6193_s7 + $0x990] sm:$0xff]  ;;  %v2951_v1 = vld [vmem:[%s6193_s7 + $0x998] sm:$0xff] }
 0x2aa   :  { %1756 = vmatpush.msra.mxu2 %v2945_v15  ;;  %1776 = vmatpush.msra.mxu3 %v3009_v16  ;;  %v3014_v62 = vld [vmem:[%s6193_s7 + $0xb90] sm:$0xff]  ;;  %v3015_v10 = vld [vmem:[%s6193_s7 + $0xb98] sm:$0xff] }
 0x2ab   :  { %1717 = vmatpush.msra.mxu0 %v2940_v22  ;;  %1737 = vmatpush.msra.mxu1 %v3004_v17  ;;  %v2946_v7 = vld [vmem:[%s6193_s7 + $0x970] sm:$0xff]  ;;  %v2947_v15 = vld [vmem:[%s6193_s7 + $0x978] sm:$0xff] }
 0x2ac   :  { %1757 = vmatpush.msra.mxu2 %v2941_v20  ;;  %1777 = vmatpush.msra.mxu3 %v3005_v2  ;;  %v3010_v13 = vld [vmem:[%s6193_s7 + $0xb70] sm:$0xff]  ;;  %v3011_v16 = vld [vmem:[%s6193_s7 + $0xb78] sm:$0xff] }
 0x2ad   :  { %1718 = vmatpush.msra.mxu0 %v2936_v24  ;;  %1738 = vmatpush.msra.mxu1 %v3000_v27  ;;  %v2942_v22 = vld [vmem:[%s6193_s7 + $0x950] sm:$0xff]  ;;  %v2943_v20 = vld [vmem:[%s6193_s7 + $0x958] sm:$0xff] }
 0x2ae   :  { %1758 = vmatpush.msra.mxu2 %v2937_v21  ;;  %1778 = vmatpush.msra.mxu3 %v3001_v45  ;;  %v3006_v17 = vld [vmem:[%s6193_s7 + $0xb50] sm:$0xff]  ;;  %v3007_v2 = vld [vmem:[%s6193_s7 + $0xb58] sm:$0xff] }
 0x2af   :  { %1719 = vmatpush.msra.mxu0 %v2932_v11  ;;  %1739 = vmatpush.msra.mxu1 %v2996_v26  ;;  %v2938_v24 = vld [vmem:[%s6193_s7 + $0x930] sm:$0xff]  ;;  %v2939_v21 = vld [vmem:[%s6193_s7 + $0x938] sm:$0xff] }
 0x2b0   :  { %1759 = vmatpush.msra.mxu2 %v2933_v3  ;;  %1779 = vmatpush.msra.mxu3 %v2997_v29  ;;  %v3002_v27 = vld [vmem:[%s6193_s7 + $0xb30] sm:$0xff]  ;;  %v3003_v45 = vld [vmem:[%s6193_s7 + $0xb38] sm:$0xff] }
 0x2b1   :  { %1720 = vmatpush.msra.mxu0 %v2928_v43  ;;  %1740 = vmatpush.msra.mxu1 %v2992_v33  ;;  %v2934_v11 = vld [vmem:[%s6193_s7 + $0x910] sm:$0xff]  ;;  %v2935_v3 = vld [vmem:[%s6193_s7 + $0x918] sm:$0xff] }
 0x2b2   :  { %1760 = vmatpush.msra.mxu2 %v2929_v49  ;;  %1780 = vmatpush.msra.mxu3 %v2993_v36  ;;  %v2998_v26 = vld [vmem:[%s6193_s7 + $0xb10] sm:$0xff]  ;;  %v2999_v29 = vld [vmem:[%s6193_s7 + $0xb18] sm:$0xff] }
 0x2b3   :  { %1721 = vmatpush.msra.mxu0 %v2924_v47  ;;  %1741 = vmatpush.msra.mxu1 %v2988_v34  ;;  %v2930_v43 = vld [vmem:[%s6193_s7 + $0x8f0] sm:$0xff]  ;;  %v2931_v49 = vld [vmem:[%s6193_s7 + $0x8f8] sm:$0xff] }
 0x2b4   :  { %1761 = vmatpush.msra.mxu2 %v2925_v52  ;;  %1781 = vmatpush.msra.mxu3 %v2989_v35  ;;  %v2994_v33 = vld [vmem:[%s6193_s7 + $0xaf0] sm:$0xff]  ;;  %v2995_v36 = vld [vmem:[%s6193_s7 + $0xaf8] sm:$0xff] }
 0x2b5   :  { %1722 = vmatpush.msra.mxu0 %v2920_v23  ;;  %1742 = vmatpush.msra.mxu1 %v2984_v37  ;;  %v2926_v47 = vld [vmem:[%s6193_s7 + $0x8d0] sm:$0xff]  ;;  %v2927_v52 = vld [vmem:[%s6193_s7 + $0x8d8] sm:$0xff] }
 0x2b6   :  { %1762 = vmatpush.msra.mxu2 %v2921_v18  ;;  %1782 = vmatpush.msra.mxu3 %v2985_v39  ;;  %v2990_v34 = vld [vmem:[%s6193_s7 + $0xad0] sm:$0xff]  ;;  %v2991_v35 = vld [vmem:[%s6193_s7 + $0xad8] sm:$0xff] }
 0x2b7   :  { %1723 = vmatpush.msra.mxu0 %v2916_v61  ;;  %1743 = vmatpush.msra.mxu1 %v2980_v38  ;;  %v2922_v23 = vld [vmem:[%s6193_s7 + $0x8b0] sm:$0xff]  ;;  %v2923_v39 = vld [vmem:[%s6193_s7 + $0x8b8] sm:$0xff] }
 0x2b8   :  { %1763 = vmatpush.msra.mxu2 %v2917_v41  ;;  %1783 = vmatpush.msra.mxu3 %v2981_v44  ;;  %v2986_v37 = vld [vmem:[%s6193_s7 + $0xab0] sm:$0xff]  ;;  %v2987_v61 = vld [vmem:[%s6193_s7 + $0xab8] sm:$0xff] }
 0x2b9   :  { %1724 = vmatpush.msra.mxu0 %v2912_v48  ;;  %1744 = vmatpush.msra.mxu1 %v2976_v51  ;;  %v2918_v41 = vld [vmem:[%s6193_s7 + $0x890] sm:$0xff]  ;;  %v2919_v48 = vld [vmem:[%s6193_s7 + $0x898] sm:$0xff] }
 0x2ba   :  { %1764 = vmatpush.msra.mxu2 %v2913_v40  ;;  %1784 = vmatpush.msra.mxu3 %v2977_v46  ;;  %v2982_v44 = vld [vmem:[%s6193_s7 + $0xa90] sm:$0xff]  ;;  %v2983_v51 = vld [vmem:[%s6193_s7 + $0xa98] sm:$0xff] }
 0x2bb   :  { %1725 = vmatpush.msra.mxu0 %v2908_v14  ;;  %1745 = vmatpush.msra.mxu1 %v2972_v53  ;;  %v2914_v40 = vld [vmem:[%s6193_s7 + $0x870] sm:$0xff]  ;;  %v2915_v14 = vld [vmem:[%s6193_s7 + $0x878] sm:$0xff] }
 0x2bc   :  { %1765 = vmatpush.msra.mxu2 %v2909_v8  ;;  %1785 = vmatpush.msra.mxu3 %v2973_v0  ;;  %v2978_v46 = vld [vmem:[%s6193_s7 + $0xa70] sm:$0xff]  ;;  %v2979_v53 = vld [vmem:[%s6193_s7 + $0xa78] sm:$0xff] }
 0x2bd   :  { %1726 = vmatpush.msra.mxu0 %v2904_v55  ;;  %1746 = vmatpush.msra.mxu1 %v2968_v56  ;;  %v2910_v8 = vld [vmem:[%s6193_s7 + $0x850] sm:$0xff]  ;;  %v2911_v55 = vld [vmem:[%s6193_s7 + $0x858] sm:$0xff] }
 0x2be   :  { %1766 = vmatpush.msra.mxu2 %v2905_v31  ;;  %1786 = vmatpush.msra.mxu3 %v2969_v57  ;;  %v2974_v0 = vld [vmem:[%s6193_s7 + $0xa50] sm:$0xff]  ;;  %v2975_v56 = vld [vmem:[%s6193_s7 + $0xa58] sm:$0xff] }
 0x2bf   :  { %1727 = vmatpush.msra.mxu0 %v2900_v58  ;;  %1747 = vmatpush.msra.mxu1 %v2964_v50  ;;  %v2906_v58 = vld [vmem:[%s6193_s7 + $0x830] sm:$0xff] }
 0x2c0   :  { %1767 = vmatpush.msra.mxu2 %v2901_v30  ;;  %1787 = vmatpush.msra.mxu3 %v2965_v59  ;;  %v2970_v50 = vld [vmem:[%s6193_s7 + $0xa30] sm:$0xff]  ;;  %v2907_v30 = vld [vmem:[%s6193_s7 + $0x838] sm:$0xff] }
 0x2c1   :  { %1792 = vmatpush.msrb.mxu0 %v2962_v60  ;;  %3032 = vmatpush.msk.msrb.mxu1 %vm133_vm0, %v3026_v63  ;;  %v2971_v59 = vld [vmem:[%s6193_s7 + $0xa38] sm:$0xff]  ;;  %v2902_v60 = vld [vmem:[%s6193_s7 + $0x810] sm:$0xff] }
 0x2c2   :  { %1832 = vmatpush.msrb.mxu2 %v2963_v42  ;;  %3034 = vmatpush.msk.msrb.mxu3 %vm133_vm0, %v3027_v4  ;;  %v2966_v63 = vld [vmem:[%s6193_s7 + $0xa10] sm:$0xff] }
 0x2c3   :  { %1793 = vmatpush.msrb.mxu0 %v2958_v5  ;;  %1813 = vmatpush.msrb.mxu1 %v3022_v25  ;;  %v2903_v5 = vld [vmem:[%s6193_s7 + $0x818] sm:$0xff] }
 0x2c4   :  { %1833 = vmatpush.msrb.mxu2 %v2959_v9  ;;  %1853 = vmatpush.msrb.mxu3 %v3023_v54  ;;  %v2967_v25 = vld [vmem:[%s6193_s7 + $0xa18] sm:$0xff] }
 0x2c5   :  { %1794 = vmatpush.msrb.mxu0 %v2954_v32  ;;  %1814 = vmatpush.msrb.mxu1 %v3018_v28 }
 0x2c6   :  { %1834 = vmatpush.msrb.mxu2 %v2955_v12  ;;  %1854 = vmatpush.msrb.mxu3 %v3019_v6 }
 0x2c7   :  { %1795 = vmatpush.msrb.mxu0 %v2950_v19  ;;  %1815 = vmatpush.msrb.mxu1 %v3014_v62 }
 0x2c8   :  { %1835 = vmatpush.msrb.mxu2 %v2951_v1  ;;  %1855 = vmatpush.msrb.mxu3 %v3015_v10  ;;  %v3096_v10 = vld [vmem:[%s6193_s7 + $0xde0] sm:$0xff] }
 0x2c9   :  { %1796 = vmatpush.msrb.mxu0 %v2946_v7  ;;  %1816 = vmatpush.msrb.mxu1 %v3010_v13  ;;  %v3160_v7 = vld [vmem:[%s6193_s7 + $0xfe0] sm:$0x3]  ;;  %v3097_v13 = vld [vmem:[%s6193_s7 + $0xde8] sm:$0xff] }
 0x2ca   :  { %1836 = vmatpush.msrb.mxu2 %v2947_v15  ;;  %1856 = vmatpush.msrb.mxu3 %v3011_v16  ;;  %v3161_v15 = vld [vmem:[%s6193_s7 + $0xfe8] sm:$0x3]  ;;  %v3092_v16 = vld [vmem:[%s6193_s7 + $0xdc0] sm:$0xff] }
 0x2cb   :  { %1797 = vmatpush.msrb.mxu0 %v2942_v22  ;;  %1817 = vmatpush.msrb.mxu1 %v3006_v17  ;;  %v3156_v22 = vld [vmem:[%s6193_s7 + $0xfc0] sm:$0xff]  ;;  %v3093_v17 = vld [vmem:[%s6193_s7 + $0xdc8] sm:$0xff] }
 0x2cc   :  { %1837 = vmatpush.msrb.mxu2 %v2943_v20  ;;  %1857 = vmatpush.msrb.mxu3 %v3007_v2  ;;  %v3157_v20 = vld [vmem:[%s6193_s7 + $0xfc8] sm:$0xff]  ;;  %v3088_v2 = vld [vmem:[%s6193_s7 + $0xda0] sm:$0xff] }
 0x2cd   :  { %1798 = vmatpush.msrb.mxu0 %v2938_v24  ;;  %1818 = vmatpush.msrb.mxu1 %v3002_v27  ;;  %v3152_v24 = vld [vmem:[%s6193_s7 + $0xfa0] sm:$0xff]  ;;  %v3089_v27 = vld [vmem:[%s6193_s7 + $0xda8] sm:$0xff] }
 0x2ce   :  { %1838 = vmatpush.msrb.mxu2 %v2939_v21  ;;  %1858 = vmatpush.msrb.mxu3 %v3003_v45  ;;  %v3153_v21 = vld [vmem:[%s6193_s7 + $0xfa8] sm:$0xff]  ;;  %v3084_v45 = vld [vmem:[%s6193_s7 + $0xd80] sm:$0xff] }
 0x2cf   :  { %1799 = vmatpush.msrb.mxu0 %v2934_v11  ;;  %1819 = vmatpush.msrb.mxu1 %v2998_v26  ;;  %v3148_v11 = vld [vmem:[%s6193_s7 + $0xf80] sm:$0xff]  ;;  %v3085_v26 = vld [vmem:[%s6193_s7 + $0xd88] sm:$0xff] }
 0x2d0   :  { %1839 = vmatpush.msrb.mxu2 %v2935_v3  ;;  %1859 = vmatpush.msrb.mxu3 %v2999_v29  ;;  %v3149_v3 = vld [vmem:[%s6193_s7 + $0xf88] sm:$0xff]  ;;  %v3080_v29 = vld [vmem:[%s6193_s7 + $0xd60] sm:$0xff] }
 0x2d1   :  { %1800 = vmatpush.msrb.mxu0 %v2930_v43  ;;  %1820 = vmatpush.msrb.mxu1 %v2994_v33  ;;  %v3144_v43 = vld [vmem:[%s6193_s7 + $0xf60] sm:$0xff]  ;;  %v3081_v33 = vld [vmem:[%s6193_s7 + $0xd68] sm:$0xff] }
 0x2d2   :  { %1840 = vmatpush.msrb.mxu2 %v2931_v49  ;;  %1860 = vmatpush.msrb.mxu3 %v2995_v36  ;;  %v3145_v49 = vld [vmem:[%s6193_s7 + $0xf68] sm:$0xff]  ;;  %v3076_v36 = vld [vmem:[%s6193_s7 + $0xd40] sm:$0xff] }
 0x2d3   :  { %v5108_v18 = vpop.f32.mrf.mxu1  ;;  %1801 = vmatpush.msrb.mxu0 %v2926_v47  ;;  %1821 = vmatpush.msrb.mxu1 %v2990_v34  ;;  %v3140_v47 = vld [vmem:[%s6193_s7 + $0xf40] sm:$0xff]  ;;  %v3077_v34 = vld [vmem:[%s6193_s7 + $0xd48] sm:$0xff] }
 0x2d4   :  { %v5116_v38 = vpop.f32.mrf.mxu0  ;;  %1841 = vmatpush.msrb.mxu2 %v2927_v52  ;;  %1861 = vmatpush.msrb.mxu3 %v2991_v35  ;;  %v3141_v52 = vld [vmem:[%s6193_s7 + $0xf48] sm:$0xff]  ;;  %v3072_v35 = vld [vmem:[%s6193_s7 + $0xd20] sm:$0xff] }
 0x2d5   :  { %1802 = vmatpush.msrb.mxu0 %v2922_v23  ;;  %1822 = vmatpush.msrb.mxu1 %v2986_v37  ;;  %v1690_v6 = vpop.permute.xlu2 %1689  ;;  %v3136_v23 = vld [vmem:[%s6193_s7 + $0xf20] sm:$0xff]  ;;  %v3073_v37 = vld [vmem:[%s6193_s7 + $0xd28] sm:$0xff] }
 0x2d6   :  { %1842 = vmatpush.msrb.mxu2 %v2923_v39  ;;  %1862 = vmatpush.msrb.mxu3 %v2987_v61  ;;  %v3137_v39 = vld [vmem:[%s6193_s7 + $0xf28] sm:$0xff]  ;;  %v3068_v61 = vld [vmem:[%s6193_s7 + $0xd00] sm:$0xff] }
 0x2d7   :  { %1803 = vmatpush.msrb.mxu0 %v2918_v41  ;;  %1823 = vmatpush.msrb.mxu1 %v2982_v44  ;;  %v3132_v41 = vld [vmem:[%s6193_s7 + $0xf00] sm:$0xff]  ;;  %v3069_v44 = vld [vmem:[%s6193_s7 + $0xd08] sm:$0xff] }
 0x2d8   :  { %1843 = vmatpush.msrb.mxu2 %v2919_v48  ;;  %1863 = vmatpush.msrb.mxu3 %v2983_v51  ;;  %v3133_v48 = vld [vmem:[%s6193_s7 + $0xf08] sm:$0xff]  ;;  %v3064_v51 = vld [vmem:[%s6193_s7 + $0xce0] sm:$0xff] }
 0x2d9   :  { %1804 = vmatpush.msrb.mxu0 %v2914_v40  ;;  %1824 = vmatpush.msrb.mxu1 %v2978_v46  ;;  %v5156_v57 = vpop.f32.mrf.mxu3  ;;  %v3128_v40 = vld [vmem:[%s6193_s7 + $0xee0] sm:$0xff]  ;;  %v3065_v46 = vld [vmem:[%s6193_s7 + $0xce8] sm:$0xff] }
 0x2da   :  { %v5154_v31 = vpop.f32.mrf.mxu2  ;;  %1844 = vmatpush.msrb.mxu2 %v2915_v14  ;;  %1864 = vmatpush.msrb.mxu3 %v2979_v53  ;;  %v3129_v14 = vld [vmem:[%s6193_s7 + $0xee8] sm:$0xff]  ;;  %v3060_v53 = vld [vmem:[%s6193_s7 + $0xcc0] sm:$0xff] }
 0x2db   :  { %1805 = vmatpush.msrb.mxu0 %v2910_v8  ;;  %1825 = vmatpush.msrb.mxu1 %v2974_v0  ;;  %v3124_v8 = vld [vmem:[%s6193_s7 + $0xec0] sm:$0xff]  ;;  %v3061_v0 = vld [vmem:[%s6193_s7 + $0xcc8] sm:$0xff] }
 0x2dc   :  { %1845 = vmatpush.msrb.mxu2 %v2911_v55  ;;  %1865 = vmatpush.msrb.mxu3 %v2975_v56  ;;  %v3125_v55 = vld [vmem:[%s6193_s7 + $0xec8] sm:$0xff]  ;;  %v3056_v56 = vld [vmem:[%s6193_s7 + $0xca0] sm:$0xff] }
 0x2dd   :  { %v1304_v42 = vpop.f32.mrf.mxu0  ;;  %v1324_v4 = vpop.f32.mrf.mxu1  ;;  %1806 = vmatpush.msrb.mxu0 %v2906_v58  ;;  %1826 = vmatpush.msrb.mxu1 %v2970_v50  ;;  %v3120_v58 = vld [vmem:[%s6193_s7 + $0xea0] sm:$0xff]  ;;  %v3057_v50 = vld [vmem:[%s6193_s7 + $0xca8] sm:$0xff] }
 0x2de   :  { %v5182_v9 = vadd.f32 %v1324_v4, %v1304_v42  ;;  %1846 = vmatpush.msrb.mxu2 %v2907_v30  ;;  %1866 = vmatpush.msrb.mxu3 %v2971_v59  ;;  %v3121_v30 = vld [vmem:[%s6193_s7 + $0xea8] sm:$0xff]  ;;  %v3052_v59 = vld [vmem:[%s6193_s7 + $0xc80] sm:$0xff] }
 0x2df   :  { %1807 = vmatpush.msrb.mxu0 %v2902_v60  ;;  %1827 = vmatpush.msrb.mxu1 %v2966_v63  ;;  %v3116_v60 = vld [vmem:[%s6193_s7 + $0xe80] sm:$0xff]  ;;  %v3053_v63 = vld [vmem:[%s6193_s7 + $0xc88] sm:$0xff] }
 0x2e0   :  { %1847 = vmatpush.msrb.mxu2 %v2903_v5  ;;  %1867 = vmatpush.msrb.mxu3 %v2967_v25  ;;  %v3117_v42 = vld [vmem:[%s6193_s7 + $0xe88] sm:$0xff]  ;;  %v3048_v4 = vld [vmem:[%s6193_s7 + $0xc60] sm:$0xff] }
 0x2e1   :  { %v3112_v5 = vld [vmem:[%s6193_s7 + $0xe60] sm:$0xff]  ;;  %v3049_v25 = vld [vmem:[%s6193_s7 + $0xc68] sm:$0xff] }
 0x2e4   :  { %v1344_v54 = vpop.f32.mrf.mxu2  ;;  %v1364_v32 = vpop.f32.mrf.mxu3 }
 0x2e5   :  { %v5184_v28 = vadd.f32 %v1364_v32, %v1344_v54  ;;  %v3113_v54 = vld [vmem:[%s6193_s7 + $0xe68] sm:$0xff]  ;;  %v3044_v32 = vld [vmem:[%s6193_s7 + $0xc40] sm:$0xff] }
 0x2ec   :  { %v1694_v12 = vpop.permute.xlu1 %1693  ;;  %v1692_v19 = vpop.permute.xlu0 %1691 }
 0x2ed   :  { %v1695_v62 = vsel %vm587_vm4, %v1690_v6, %v1692_v19  ;;  %v1696_v1 = vsel %vm587_vm4, %v1692_v19, %v1694_v12  ;;  %v3108_v12 = vld [vmem:[%s6193_s7 + $0xe40] sm:$0xff]  ;;  %v3045_v6 = vld [vmem:[%s6193_s7 + $0xc48] sm:$0xff] }
 0x2ee   :  { %1728 = vmatmul.f32.vlgmr.msra.gmra.mxu0 %v1695_v62  ;;  %3029 = vmatmul.msk.f32.vlgmr.msra.gmra.mxu1 %vm1192_vm6, %v1696_v1  ;;  %v3109_v19 = vld [vmem:[%s6193_s7 + $0xe48] sm:$0xff] }
 0x2ef   :  { %1768 = vmatmul.f32.vlgmr.msra.gmra.mxu2 %v1695_v62  ;;  %3031 = vmatmul.msk.f32.vlgmr.msra.gmra.mxu3 %vm1192_vm6, %v1696_v1 }
 0x2f0   :  { %2033 = vmatpush.msra.mxu0 %v3096_v10  ;;  %3164 = vmatpush.msk.msra.mxu1 %vm133_vm0, %v3160_v7  ;;  %v3041_v10 = vld [vmem:[%s6193_s7 + $0xc28] sm:$0xff] }
 0x2f1   :  { %2073 = vmatpush.msra.mxu2 %v3097_v13  ;;  %3166 = vmatpush.msk.msra.mxu3 %vm133_vm0, %v3161_v15  ;;  %v3105_v7 = vld [vmem:[%s6193_s7 + $0xe28] sm:$0xff]  ;;  %v3036_v13 = vld [vmem:[%s6193_s7 + $0xc00] sm:$0xff] }
 0x2f2   :  { %2034 = vmatpush.msra.mxu0 %v3092_v16  ;;  %2054 = vmatpush.msra.mxu1 %v3156_v22  ;;  %v3100_v15 = vld [vmem:[%s6193_s7 + $0xe00] sm:$0xff] }
 0x2f3   :  { %2074 = vmatpush.msra.mxu2 %v3093_v17  ;;  %2094 = vmatpush.msra.mxu3 %v3157_v20  ;;  %v3037_v17 = vld [vmem:[%s6193_s7 + $0xc08] sm:$0xff] }
 0x2f4   :  { %2035 = vmatpush.msra.mxu0 %v3088_v2  ;;  %2055 = vmatpush.msra.mxu1 %v3152_v24  ;;  %v3101_v20 = vld [vmem:[%s6193_s7 + $0xe08] sm:$0xff]  ;;  %v2011_v2 = vpop.permute.xlu2 %2010 }
 0x2f5   :  { %2075 = vmatpush.msra.mxu2 %v3089_v27  ;;  %2095 = vmatpush.msra.mxu3 %v3153_v21  ;;  %v3098_v21 = vld [vmem:[%s6193_s7 + $0xdf0] sm:$0xff] }
 0x2f6   :  { %2036 = vmatpush.msra.mxu0 %v3084_v45  ;;  %2056 = vmatpush.msra.mxu1 %v3148_v11  ;;  %v3162_v45 = vld [vmem:[%s6193_s7 + $0xff0] sm:$0x3]  ;;  %v3099_v11 = vld [vmem:[%s6193_s7 + $0xdf8] sm:$0xff] }
 0x2f7   :  { %2076 = vmatpush.msra.mxu2 %v3085_v26  ;;  %2096 = vmatpush.msra.mxu3 %v3149_v3  ;;  %v3163_v26 = vld [vmem:[%s6193_s7 + $0xff8] sm:$0x3]  ;;  %v3094_v3 = vld [vmem:[%s6193_s7 + $0xdd0] sm:$0xff] }
 0x2f8   :  { %1808 = vmatmul.f32.vlgmr.msrb.gmra.mxu0 %v1695_v62  ;;  %3033 = vmatmul.msk.f32.vlgmr.msrb.gmra.mxu1 %vm1192_vm6, %v1696_v1 }
 0x2f9   :  { %1848 = vmatmul.f32.vlgmr.msrb.gmra.mxu2 %v1695_v62  ;;  %3035 = vmatmul.msk.f32.vlgmr.msrb.gmra.mxu3 %vm1192_vm6, %v1696_v1  ;;  %v3040_v62 = vld [vmem:[%s6193_s7 + $0xc20] sm:$0xff] }
 0x2fa   :  { %2037 = vmatpush.msra.mxu0 %v3080_v29  ;;  %2057 = vmatpush.msra.mxu1 %v3144_v43  ;;  %v3104_v1 = vld [vmem:[%s6193_s7 + $0xe20] sm:$0xff]  ;;  %v3158_v29 = vld [vmem:[%s6193_s7 + $0xfd0] sm:$0xff]  ;;  %v3095_v43 = vld [vmem:[%s6193_s7 + $0xdd8] sm:$0xff] }
 0x2fb   :  { %2077 = vmatpush.msra.mxu2 %v3081_v33  ;;  %2097 = vmatpush.msra.mxu3 %v3145_v49  ;;  %v3159_v33 = vld [vmem:[%s6193_s7 + $0xfd8] sm:$0xff]  ;;  %v3090_v49 = vld [vmem:[%s6193_s7 + $0xdb0] sm:$0xff] }
 0x2fc   :  { %2038 = vmatpush.msra.mxu0 %v3076_v36  ;;  %2058 = vmatpush.msra.mxu1 %v3140_v47  ;;  %v3154_v36 = vld [vmem:[%s6193_s7 + $0xfb0] sm:$0xff]  ;;  %v3091_v47 = vld [vmem:[%s6193_s7 + $0xdb8] sm:$0xff] }
 0x2fd   :  { %2078 = vmatpush.msra.mxu2 %v3077_v34  ;;  %2098 = vmatpush.msra.mxu3 %v3141_v52  ;;  %v3155_v34 = vld [vmem:[%s6193_s7 + $0xfb8] sm:$0xff]  ;;  %v3086_v52 = vld [vmem:[%s6193_s7 + $0xd90] sm:$0xff] }
 0x2fe   :  { %2039 = vmatpush.msra.mxu0 %v3072_v35  ;;  %2059 = vmatpush.msra.mxu1 %v3136_v23  ;;  %v3150_v35 = vld [vmem:[%s6193_s7 + $0xf90] sm:$0xff]  ;;  %v3087_v23 = vld [vmem:[%s6193_s7 + $0xd98] sm:$0xff] }
 0x2ff   :  { %2079 = vmatpush.msra.mxu2 %v3073_v37  ;;  %2099 = vmatpush.msra.mxu3 %v3137_v39  ;;  %v3151_v37 = vld [vmem:[%s6193_s7 + $0xf98] sm:$0xff]  ;;  %v3082_v39 = vld [vmem:[%s6193_s7 + $0xd70] sm:$0xff] }
 0x300   :  { %2040 = vmatpush.msra.mxu0 %v3068_v61  ;;  %2060 = vmatpush.msra.mxu1 %v3132_v41  ;;  %v3146_v61 = vld [vmem:[%s6193_s7 + $0xf70] sm:$0xff]  ;;  %v3083_v41 = vld [vmem:[%s6193_s7 + $0xd78] sm:$0xff] }
 0x301   :  { %2080 = vmatpush.msra.mxu2 %v3069_v44  ;;  %2100 = vmatpush.msra.mxu3 %v3133_v48  ;;  %v3147_v44 = vld [vmem:[%s6193_s7 + $0xf78] sm:$0xff]  ;;  %v3078_v48 = vld [vmem:[%s6193_s7 + $0xd50] sm:$0xff] }
 0x302   :  { %2041 = vmatpush.msra.mxu0 %v3064_v51  ;;  %2061 = vmatpush.msra.mxu1 %v3128_v40  ;;  %v3142_v51 = vld [vmem:[%s6193_s7 + $0xf50] sm:$0xff]  ;;  %v3079_v40 = vld [vmem:[%s6193_s7 + $0xd58] sm:$0xff] }
 0x303   :  { %2081 = vmatpush.msra.mxu2 %v3065_v46  ;;  %2101 = vmatpush.msra.mxu3 %v3129_v14  ;;  %v2015_v16 = vpop.permute.xlu1 %2014  ;;  %v3143_v46 = vld [vmem:[%s6193_s7 + $0xf58] sm:$0xff]  ;;  %v3074_v14 = vld [vmem:[%s6193_s7 + $0xd30] sm:$0xff] }
 0x304   :  { %2042 = vmatpush.msra.mxu0 %v3060_v53  ;;  %2062 = vmatpush.msra.mxu1 %v3124_v8  ;;  %v2013_v22 = vpop.permute.xlu0 %2012  ;;  %v3138_v53 = vld [vmem:[%s6193_s7 + $0xf30] sm:$0xff]  ;;  %v3075_v8 = vld [vmem:[%s6193_s7 + $0xd38] sm:$0xff] }
 0x305   :  { %2082 = vmatpush.msra.mxu2 %v3061_v0  ;;  %2102 = vmatpush.msra.mxu3 %v3125_v55  ;;  %v5387_v24 = vsel %vm587_vm4, %v2011_v2, %v2013_v22  ;;  %v5390_v27 = vsel %vm587_vm4, %v2013_v22, %v2015_v16  ;;  %v3139_v0 = vld [vmem:[%s6193_s7 + $0xf38] sm:$0xff]  ;;  %v3070_v55 = vld [vmem:[%s6193_s7 + $0xd10] sm:$0xff] }
 0x306   :  { %2043 = vmatpush.msra.mxu0 %v3056_v56  ;;  %2063 = vmatpush.msra.mxu1 %v3120_v58  ;;  %v3134_v56 = vld [vmem:[%s6193_s7 + $0xf10] sm:$0xff]  ;;  %v3071_v58 = vld [vmem:[%s6193_s7 + $0xd18] sm:$0xff] }
 0x307   :  { %2083 = vmatpush.msra.mxu2 %v3057_v50  ;;  %2103 = vmatpush.msra.mxu3 %v3121_v30  ;;  %v3135_v50 = vld [vmem:[%s6193_s7 + $0xf18] sm:$0xff]  ;;  %v3066_v30 = vld [vmem:[%s6193_s7 + $0xcf0] sm:$0xff] }
 0x308   :  { %2044 = vmatpush.msra.mxu0 %v3052_v59  ;;  %2064 = vmatpush.msra.mxu1 %v3116_v60  ;;  %v3130_v59 = vld [vmem:[%s6193_s7 + $0xef0] sm:$0xff]  ;;  %v3067_v60 = vld [vmem:[%s6193_s7 + $0xcf8] sm:$0xff] }
 0x309   :  { %2084 = vmatpush.msra.mxu2 %v3053_v63  ;;  %2104 = vmatpush.msra.mxu3 %v3117_v42  ;;  %v3131_v63 = vld [vmem:[%s6193_s7 + $0xef8] sm:$0xff]  ;;  %v3062_v42 = vld [vmem:[%s6193_s7 + $0xcd0] sm:$0xff] }
 0x30a   :  { %2045 = vmatpush.msra.mxu0 %v3048_v4  ;;  %2065 = vmatpush.msra.mxu1 %v3112_v5  ;;  %v3126_v4 = vld [vmem:[%s6193_s7 + $0xed0] sm:$0xff]  ;;  %v3063_v5 = vld [vmem:[%s6193_s7 + $0xcd8] sm:$0xff] }
 0x30b   :  { %2085 = vmatpush.msra.mxu2 %v3049_v25  ;;  %2105 = vmatpush.msra.mxu3 %v3113_v54  ;;  %v3127_v25 = vld [vmem:[%s6193_s7 + $0xed8] sm:$0xff]  ;;  %v3058_v54 = vld [vmem:[%s6193_s7 + $0xcb0] sm:$0xff] }
 0x30c   :  { %2046 = vmatpush.msra.mxu0 %v3044_v32  ;;  %2066 = vmatpush.msra.mxu1 %v3108_v12  ;;  %v3122_v32 = vld [vmem:[%s6193_s7 + $0xeb0] sm:$0xff]  ;;  %v3059_v12 = vld [vmem:[%s6193_s7 + $0xcb8] sm:$0xff] }
 0x30d   :  { %2086 = vmatpush.msra.mxu2 %v3045_v6  ;;  %2106 = vmatpush.msra.mxu3 %v3109_v19  ;;  %v3123_v6 = vld [vmem:[%s6193_s7 + $0xeb8] sm:$0xff]  ;;  %v3054_v19 = vld [vmem:[%s6193_s7 + $0xc90] sm:$0xff] }
 0x30e   :  { %2047 = vmatpush.msra.mxu0 %v3040_v62  ;;  %2067 = vmatpush.msra.mxu1 %v3104_v1  ;;  %v3118_v62 = vld [vmem:[%s6193_s7 + $0xe90] sm:$0xff]  ;;  %v3055_v1 = vld [vmem:[%s6193_s7 + $0xc98] sm:$0xff] }
 0x30f   :  { %2087 = vmatpush.msra.mxu2 %v3041_v10  ;;  %2107 = vmatpush.msra.mxu3 %v3105_v7  ;;  %v3119_v10 = vld [vmem:[%s6193_s7 + $0xe98] sm:$0xff]  ;;  %v3050_v7 = vld [vmem:[%s6193_s7 + $0xc70] sm:$0xff] }
 0x310   :  { %2048 = vmatpush.msra.mxu0 %v3036_v13  ;;  %2068 = vmatpush.msra.mxu1 %v3100_v15  ;;  %v3114_v13 = vld [vmem:[%s6193_s7 + $0xe70] sm:$0xff]  ;;  %v3051_v15 = vld [vmem:[%s6193_s7 + $0xc78] sm:$0xff] }
 0x311   :  { %2088 = vmatpush.msra.mxu2 %v3037_v17  ;;  %2108 = vmatpush.msra.mxu3 %v3101_v20  ;;  %v3115_v16 = vld [vmem:[%s6193_s7 + $0xe78] sm:$0xff]  ;;  %v3046_v22 = vld [vmem:[%s6193_s7 + $0xc50] sm:$0xff] }
 0x312   :  { %2049 = vmatmul.f32.vlgmr.msra.gmra.mxu0 %v5387_v24  ;;  %3165 = vmatmul.msk.f32.vlgmr.msra.gmra.mxu1 %vm1192_vm6, %v5390_v27  ;;  %v3110_v17 = vld [vmem:[%s6193_s7 + $0xe50] sm:$0xff]  ;;  %v3047_v20 = vld [vmem:[%s6193_s7 + $0xc58] sm:$0xff] }
 0x313   :  { %2089 = vmatmul.f32.vlgmr.msra.gmra.mxu2 %v5387_v24  ;;  %3167 = vmatmul.msk.f32.vlgmr.msra.gmra.mxu3 %vm1192_vm6, %v5390_v27  ;;  %v3111_v2 = vld [vmem:[%s6193_s7 + $0xe58] sm:$0xff] }
 0x314   :  { %2113 = vmatpush.msrb.mxu0 %v3098_v21  ;;  %3168 = vmatpush.msk.msrb.mxu1 %vm133_vm0, %v3162_v45  ;;  %v3042_v21 = vld [vmem:[%s6193_s7 + $0xc30] sm:$0xff] }
 0x315   :  { %2153 = vmatpush.msrb.mxu2 %v3099_v11  ;;  %3170 = vmatpush.msk.msrb.mxu3 %vm133_vm0, %v3163_v26  ;;  %v3106_v45 = vld [vmem:[%s6193_s7 + $0xe30] sm:$0xff]  ;;  %v3043_v11 = vld [vmem:[%s6193_s7 + $0xc38] sm:$0xff] }
 0x316   :  { %2114 = vmatpush.msrb.mxu0 %v3094_v3  ;;  %2134 = vmatpush.msrb.mxu1 %v3158_v29  ;;  %v3107_v26 = vld [vmem:[%s6193_s7 + $0xe38] sm:$0xff]  ;;  %v3038_v3 = vld [vmem:[%s6193_s7 + $0xc10] sm:$0xff] }
 0x317   :  { %2154 = vmatpush.msrb.mxu2 %v3095_v43  ;;  %2174 = vmatpush.msrb.mxu3 %v3159_v33  ;;  %v3102_v29 = vld [vmem:[%s6193_s7 + $0xe10] sm:$0xff]  ;;  %v3039_v43 = vld [vmem:[%s6193_s7 + $0xc18] sm:$0xff] }
 0x318   :  { %2115 = vmatpush.msrb.mxu0 %v3090_v49  ;;  %2135 = vmatpush.msrb.mxu1 %v3154_v36  ;;  %v3103_v33 = vld [vmem:[%s6193_s7 + $0xe18] sm:$0xff]  ;;  %v2245_v49 = vld [vmem:[%s6195_s9 + $0xf0] sm:$0xff] }
 0x319   :  { %2155 = vmatpush.msrb.mxu2 %v3091_v47  ;;  %2175 = vmatpush.msrb.mxu3 %v3155_v34  ;;  %v2277_v36 = vld [vmem:[%s6195_s9 + $0x1f0] sm:$0xff]  ;;  %v2243_v47 = vld [vmem:[%s6195_s9 + $0xe0] sm:$0xff] }
 0x31a   :  { %2116 = vmatpush.msrb.mxu0 %v3086_v52  ;;  %2136 = vmatpush.msrb.mxu1 %v3150_v35  ;;  %v2275_v34 = vld [vmem:[%s6195_s9 + $0x1e0] sm:$0xff]  ;;  %v2241_v52 = vld [vmem:[%s6195_s9 + $0xd0] sm:$0xff] }
 0x31b   :  { %2156 = vmatpush.msrb.mxu2 %v3087_v23  ;;  %2176 = vmatpush.msrb.mxu3 %v3151_v37  ;;  %v2271_v35 = vld [vmem:[%s6195_s9 + $0x1c0] sm:$0xff]  ;;  %v2237_v23 = vld [vmem:[%s6195_s9 + $0xb0] sm:$0xff] }
 0x31c   :  { %2117 = vmatpush.msrb.mxu0 %v3082_v39  ;;  %2137 = vmatpush.msrb.mxu1 %v3146_v61  ;;  %v2235_v37 = vld [vmem:[%s6195_s9 + $0xa0] sm:$0xff]  ;;  %v2233_v39 = vld [vmem:[%s6195_s9 + $0x90] sm:$0xff] }
 0x31d   :  { %2157 = vmatpush.msrb.mxu2 %v3083_v41  ;;  %2177 = vmatpush.msrb.mxu3 %v3147_v44  ;;  %v2231_v61 = vld [vmem:[%s6195_s9 + $0x80] sm:$0xff]  ;;  %v2269_v41 = vld [vmem:[%s6195_s9 + $0x1b0] sm:$0xff] }
 0x31e   :  { %2118 = vmatpush.msrb.mxu0 %v3078_v48  ;;  %2138 = vmatpush.msrb.mxu1 %v3142_v51  ;;  %v2229_v44 = vld [vmem:[%s6195_s9 + $0x70] sm:$0xff]  ;;  %v2267_v48 = vld [vmem:[%s6195_s9 + $0x1a0] sm:$0xff] }
 0x31f   :  { %2158 = vmatpush.msrb.mxu2 %v3079_v40  ;;  %2178 = vmatpush.msrb.mxu3 %v3143_v46  ;;  %v2227_v51 = vld [vmem:[%s6195_s9 + $0x60] sm:$0xff]  ;;  %v2265_v40 = vld [vmem:[%s6195_s9 + $0x190] sm:$0xff] }
 0x320   :  { %2119 = vmatpush.msrb.mxu0 %v3074_v14  ;;  %2139 = vmatpush.msrb.mxu1 %v3138_v53  ;;  %v2225_v46 = vld [vmem:[%s6195_s9 + $0x50] sm:$0xff]  ;;  %v2263_v14 = vld [vmem:[%s6195_s9 + $0x180] sm:$0xff] }
 0x321   :  { %2159 = vmatpush.msrb.mxu2 %v3075_v8  ;;  %2179 = vmatpush.msrb.mxu3 %v3139_v0  ;;  %v2223_v53 = vld [vmem:[%s6195_s9 + $0x40] sm:$0xff]  ;;  %v2261_v8 = vld [vmem:[%s6195_s9 + $0x170] sm:$0xff] }
 0x322   :  { %2120 = vmatpush.msrb.mxu0 %v3070_v55  ;;  %2140 = vmatpush.msrb.mxu1 %v3134_v56  ;;  %v2221_v0 = vld [vmem:[%s6195_s9 + $0x30] sm:$0xff]  ;;  %v2259_v55 = vld [vmem:[%s6195_s9 + $0x160] sm:$0xff] }
 0x323   :  { %2160 = vmatpush.msrb.mxu2 %v3071_v58  ;;  %2180 = vmatpush.msrb.mxu3 %v3135_v50  ;;  %v2219_v56 = vld [vmem:[%s6195_s9 + $0x20] sm:$0xff]  ;;  %v2257_v58 = vld [vmem:[%s6195_s9 + $0x150] sm:$0xff] }
 0x324   :  { %2121 = vmatpush.msrb.mxu0 %v3066_v30  ;;  %2141 = vmatpush.msrb.mxu1 %v3130_v59  ;;  %v2217_v50 = vld [vmem:[%s6195_s9 + $0x10] sm:$0xff]  ;;  %v2255_v30 = vld [vmem:[%s6195_s9 + $0x140] sm:$0xff] }
 0x325   :  { %2161 = vmatpush.msrb.mxu2 %v3067_v60  ;;  %2181 = vmatpush.msrb.mxu3 %v3131_v63  ;;  %v2215_v59 = vld [vmem:[%s6195_s9] sm:$0xff]  ;;  %v2253_v60 = vld [vmem:[%s6195_s9 + $0x130] sm:$0xff] }
 0x326   :  { %2122 = vmatpush.msrb.mxu0 %v3062_v42  ;;  %2142 = vmatpush.msrb.mxu1 %v3126_v4  ;;  %v2309_v63 = vld [vmem:[%s6195_s9 + $0x2f0] sm:$0xff]  ;;  %v2246_v42 = vld [vmem:[%s6195_s9 + $0xf8] sm:$0xff]  ;;  %v2251_v4 = vld [vmem:[%s6195_s9 + $0x120] sm:$0xff] }
 0x327   :  { %2162 = vmatpush.msrb.mxu2 %v3063_v5  ;;  %2182 = vmatpush.msrb.mxu3 %v3127_v25  ;;  %v2307_v5 = vld [vmem:[%s6195_s9 + $0x2e0] sm:$0xff]  ;;  %v2244_v25 = vld [vmem:[%s6195_s9 + $0xe8] sm:$0xff] }
 0x328   :  { %2123 = vmatpush.msrb.mxu0 %v3058_v54  ;;  %2143 = vmatpush.msrb.mxu1 %v3122_v32  ;;  %v2305_v54 = vld [vmem:[%s6195_s9 + $0x2d0] sm:$0xff] }
 0x329   :  { %2163 = vmatpush.msrb.mxu2 %v3059_v12  ;;  %2183 = vmatpush.msrb.mxu3 %v3123_v6  ;;  %v2249_v32 = vld [vmem:[%s6195_s9 + $0x110] sm:$0xff]  ;;  %v2242_v6 = vld [vmem:[%s6195_s9 + $0xd8] sm:$0xff] }
 0x32a   :  { %2124 = vmatpush.msrb.mxu0 %v3054_v19  ;;  %2144 = vmatpush.msrb.mxu1 %v3118_v62  ;;  %v2341_v12 = vld [vmem:[%s6195_s9 + $0x3f0] sm:$0xff]  ;;  %v2303_v19 = vld [vmem:[%s6195_s9 + $0x2c0] sm:$0xff] }
 0x32b   :  { %2164 = vmatpush.msrb.mxu2 %v3055_v1  ;;  %2184 = vmatpush.msrb.mxu3 %v3119_v10  ;;  %v2247_v62 = vld [vmem:[%s6195_s9 + $0x100] sm:$0xff]  ;;  %v2240_v10 = vld [vmem:[%s6195_s9 + $0xc8] sm:$0xff] }
 0x32c   :  { %2125 = vmatpush.msrb.mxu0 %v3050_v7  ;;  %2145 = vmatpush.msrb.mxu1 %v3114_v13  ;;  %v2339_v1 = vld [vmem:[%s6195_s9 + $0x3e0] sm:$0xff]  ;;  %v2278_v7 = vld [vmem:[%s6195_s9 + $0x1f8] sm:$0xff]  ;;  %v2337_v13 = vld [vmem:[%s6195_s9 + $0x3d0] sm:$0xff] }
 0x32d   :  { %2165 = vmatpush.msrb.mxu2 %v3051_v15  ;;  %2185 = vmatpush.msrb.mxu3 %v3115_v16  ;;  %v2301_v15 = vld [vmem:[%s6195_s9 + $0x2b0] sm:$0xff]  ;;  %v2335_v16 = vld [vmem:[%s6195_s9 + $0x3c0] sm:$0xff] }
 0x32e   :  { %2126 = vmatpush.msrb.mxu0 %v3046_v22  ;;  %2146 = vmatpush.msrb.mxu1 %v3110_v17  ;;  %v2238_v22 = vld [vmem:[%s6195_s9 + $0xb8] sm:$0xff]  ;;  %v2276_v17 = vld [vmem:[%s6195_s9 + $0x1e8] sm:$0xff] }
 0x32f   :  { %2166 = vmatpush.msrb.mxu2 %v3047_v20  ;;  %2186 = vmatpush.msrb.mxu3 %v3111_v2  ;;  %v2299_v20 = vld [vmem:[%s6195_s9 + $0x2a0] sm:$0xff]  ;;  %v2236_v2 = vld [vmem:[%s6195_s9 + $0xa8] sm:$0xff] }
 0x330   :  { %2127 = vmatpush.msrb.mxu0 %v3042_v21  ;;  %2147 = vmatpush.msrb.mxu1 %v3106_v45  ;;  %v2274_v21 = vld [vmem:[%s6195_s9 + $0x1d8] sm:$0xff]  ;;  %v2297_v45 = vld [vmem:[%s6195_s9 + $0x290] sm:$0xff] }
 0x331   :  { %2167 = vmatpush.msrb.mxu2 %v3043_v11  ;;  %2187 = vmatpush.msrb.mxu3 %v3107_v26  ;;  %v2234_v11 = vld [vmem:[%s6195_s9 + $0x98] sm:$0xff]  ;;  %v2272_v26 = vld [vmem:[%s6195_s9 + $0x1c8] sm:$0xff] }
 0x332   :  { %2128 = vmatpush.msrb.mxu0 %v3038_v3  ;;  %2148 = vmatpush.msrb.mxu1 %v3102_v29  ;;  %v5760_v3 = vpop.f32.mrf.mxu0  ;;  %v5762_v29 = vpop.f32.mrf.mxu1 }
 0x333   :  { %2168 = vmatpush.msrb.mxu2 %v3039_v43  ;;  %2188 = vmatpush.msrb.mxu3 %v3103_v33  ;;  %v2295_v43 = vld [vmem:[%s6195_s9 + $0x280] sm:$0xff]  ;;  %v2333_v33 = vld [vmem:[%s6195_s9 + $0x3b0] sm:$0xff] }
 0x334   :  { %2129 = vmatmul.f32.vlgmr.msrb.gmra.mxu0 %v5387_v24  ;;  %3169 = vmatmul.msk.f32.vlgmr.msrb.gmra.mxu1 %vm1192_vm6, %v5390_v27 }
 0x335   :  { %2169 = vmatmul.f32.vlgmr.msrb.gmra.mxu2 %v5387_v24  ;;  %3171 = vmatmul.msk.f32.vlgmr.msrb.gmra.mxu3 %vm1192_vm6, %v5390_v27  ;;  %v2273_v24 = vld [vmem:[%s6195_s9 + $0x1d0] sm:$0xff]  ;;  %v2239_v27 = vld [vmem:[%s6195_s9 + $0xc0] sm:$0xff] }
 0x336   :  { %2349 = vmatpush.msra.mxu0 %v2245_v49  ;;  %2369 = vmatpush.msra.mxu1 %v2277_v36  ;;  %v2232_v49 = vld [vmem:[%s6195_s9 + $0x88] sm:$0xff]  ;;  %v2270_v36 = vld [vmem:[%s6195_s9 + $0x1b8] sm:$0xff] }
 0x337   :  { %2389 = vmatpush.msra.mxu2 %v2309_v63  ;;  %2409 = vmatpush.msra.mxu3 %v2341_v12  ;;  %v2260_v63 = vld [vmem:[%s6195_s9 + $0x168] sm:$0xff]  ;;  %v2218_v12 = vld [vmem:[%s6195_s9 + $0x18] sm:$0xff] }
 0x338   :  { %2350 = vmatpush.msra.mxu0 %v2243_v47  ;;  %2370 = vmatpush.msra.mxu1 %v2275_v34  ;;  %v5776_v47 = vpop.f32.mrf.mxu2  ;;  %v5778_v34 = vpop.f32.mrf.mxu3 }
 0x339   :  { %2390 = vmatpush.msra.mxu2 %v2307_v5  ;;  %2410 = vmatpush.msra.mxu3 %v2339_v1  ;;  %v2220_v5 = vld [vmem:[%s6195_s9 + $0x28] sm:$0xff] }
 0x33a   :  { %2351 = vmatpush.msra.mxu0 %v2241_v52  ;;  %2371 = vmatpush.msra.mxu1 %v2273_v24  ;;  %v2293_v52 = vld [vmem:[%s6195_s9 + $0x270] sm:$0xff]  ;;  %v2331_v24 = vld [vmem:[%s6195_s9 + $0x3a0] sm:$0xff]  ;;  %v2216_v1 = vld [vmem:[%s6195_s9 + $0x8] sm:$0xff] }
 0x33b   :  { %2391 = vmatpush.msra.mxu2 %v2305_v54  ;;  %2411 = vmatpush.msra.mxu3 %v2337_v13  ;;  %v2281_v54 = vld [vmem:[%s6195_s9 + $0x210] sm:$0xff]  ;;  %v2315_v13 = vld [vmem:[%s6195_s9 + $0x320] sm:$0xff] }
 0x33c   :  { %2352 = vmatpush.msra.mxu0 %v2239_v27  ;;  %2372 = vmatpush.msra.mxu1 %v2271_v35  ;;  %v2230_v27 = vld [vmem:[%s6195_s9 + $0x78] sm:$0xff]  ;;  %v5789_v35 = vpop.f32.mrf.mxu0 }
 0x33d   :  { %2392 = vmatpush.msra.mxu2 %v2303_v19  ;;  %2412 = vmatpush.msra.mxu3 %v2335_v16  ;;  %v2279_v19 = vld [vmem:[%s6195_s9 + $0x200] sm:$0xff] }
 0x33e   :  { %2353 = vmatpush.msra.mxu0 %v2237_v23  ;;  %2373 = vmatpush.msra.mxu1 %v2269_v41  ;;  %v5791_v23 = vpop.f32.mrf.mxu1  ;;  %v2228_v41 = vld [vmem:[%s6195_s9 + $0x68] sm:$0xff] }
 0x33f   :  { %2393 = vmatpush.msra.mxu2 %v2301_v15  ;;  %2413 = vmatpush.msra.mxu3 %v2333_v33  ;;  %v2252_v15 = vld [vmem:[%s6195_s9 + $0x128] sm:$0xff]  ;;  %v2342_v33 = vld [vmem:[%s6195_s9 + $0x3f8] sm:$0xff] }
 0x340   :  { %2354 = vmatpush.msra.mxu0 %v2235_v37  ;;  %2374 = vmatpush.msra.mxu1 %v2267_v48  ;;  %v2268_v37 = vld [vmem:[%s6195_s9 + $0x1a8] sm:$0xff]  ;;  %v2289_v48 = vld [vmem:[%s6195_s9 + $0x250] sm:$0xff] }
 0x341   :  { %2394 = vmatpush.msra.mxu2 %v2299_v20  ;;  %2414 = vmatpush.msra.mxu3 %v2331_v24  ;;  %v2313_v20 = vld [vmem:[%s6195_s9 + $0x310] sm:$0xff] }
 0x342   :  { %2355 = vmatpush.msra.mxu0 %v2233_v39  ;;  %2375 = vmatpush.msra.mxu1 %v2265_v40  ;;  %v2291_v39 = vld [vmem:[%s6195_s9 + $0x260] sm:$0xff]  ;;  %v2226_v40 = vld [vmem:[%s6195_s9 + $0x58] sm:$0xff] }
 0x343   :  { %2395 = vmatpush.msra.mxu2 %v2297_v45  ;;  %v2311_v45 = vld [vmem:[%s6195_s9 + $0x300] sm:$0xff] }
 0x344   :  { %2356 = vmatpush.msra.mxu0 %v2231_v61  ;;  %2376 = vmatpush.msra.mxu1 %v2263_v14  ;;  %v2329_v61 = vld [vmem:[%s6195_s9 + $0x390] sm:$0xff]  ;;  %v2287_v14 = vld [vmem:[%s6195_s9 + $0x240] sm:$0xff] }
 0x345   :  { %2396 = vmatpush.msra.mxu2 %v2295_v43  ;;  %2415 = vmatpush.msra.mxu3 %v2329_v61  ;;  %v2248_v43 = vld [vmem:[%s6195_s9 + $0x108] sm:$0xff] }
 0x346   :  { %2357 = vmatpush.msra.mxu0 %v2229_v44  ;;  %2377 = vmatpush.msra.mxu1 %v2261_v8  ;;  %v2266_v44 = vld [vmem:[%s6195_s9 + $0x198] sm:$0xff]  ;;  %v2224_v8 = vld [vmem:[%s6195_s9 + $0x48] sm:$0xff] }
 0x347   :  { %2397 = vmatpush.msra.mxu2 %v2293_v52  ;;  %v2340_v52 = vld [vmem:[%s6195_s9 + $0x3e8] sm:$0xff] }
 0x348   :  { %2358 = vmatpush.msra.mxu0 %v2227_v51  ;;  %2378 = vmatpush.msra.mxu1 %v2259_v55  ;;  %v2327_v51 = vld [vmem:[%s6195_s9 + $0x380] sm:$0xff]  ;;  %v5832_v55 = vpop.f32.mrf.mxu2 }
 0x349   :  { %2398 = vmatpush.msra.mxu2 %v2291_v39  ;;  %2416 = vmatpush.msra.mxu3 %v2327_v51  ;;  %v2336_v39 = vld [vmem:[%s6195_s9 + $0x3c8] sm:$0xff]  ;;  %v1285_v51 = vadd.f32 %v5156_v57, %v5154_v31 }
 0x34a   :  { %2359 = vmatpush.msra.mxu0 %v2225_v46  ;;  %2379 = vmatpush.msra.mxu1 %v2257_v58  ;;  %v2264_v46 = vld [vmem:[%s6195_s9 + $0x188] sm:$0xff]  ;;  %v2285_v58 = vld [vmem:[%s6195_s9 + $0x230] sm:$0xff] }
 0x34b   :  { %2399 = vmatpush.msra.mxu2 %v2289_v48  ;;  %v2298_v48 = vld [vmem:[%s6195_s9 + $0x298] sm:$0xff] }
 0x34c   :  { %2360 = vmatpush.msra.mxu0 %v2223_v53  ;;  %2380 = vmatpush.msra.mxu1 %v2255_v30  ;;  %v2325_v53 = vld [vmem:[%s6195_s9 + $0x370] sm:$0xff]  ;;  %v2222_v30 = vld [vmem:[%s6195_s9 + $0x38] sm:$0xff] }
 0x34d   :  { %2400 = vmatpush.msra.mxu2 %v2287_v14  ;;  %2417 = vmatpush.msra.mxu3 %v2325_v53 }
 0x34e   :  { %2361 = vmatpush.msra.mxu0 %v2221_v0  ;;  %2381 = vmatpush.msra.mxu1 %v2253_v60  ;;  %v2262_v0 = vld [vmem:[%s6195_s9 + $0x178] sm:$0xff] }
 0x34f   :  { %2401 = vmatpush.msra.mxu2 %v2285_v58  ;;  %v2334_v58 = vld [vmem:[%s6195_s9 + $0x3b8] sm:$0xff] }
 0x350   :  { %2362 = vmatpush.msra.mxu0 %v2219_v56  ;;  %2382 = vmatpush.msra.mxu1 %v2251_v4  ;;  %v5834_v56 = vpop.f32.mrf.mxu3  ;;  %v2321_v4 = vld [vmem:[%s6195_s9 + $0x350] sm:$0xff] }
 0x352   :  { %2363 = vmatpush.msra.mxu0 %v2217_v50  ;;  %2383 = vmatpush.msra.mxu1 %v2249_v32  ;;  %v2323_v50 = vld [vmem:[%s6195_s9 + $0x360] sm:$0xff] }
 0x353   :  { %2418 = vmatpush.msra.mxu3 %v2323_v50  ;;  %v2319_v32 = vld [vmem:[%s6195_s9 + $0x340] sm:$0xff]  ;;  %v2294_v50 = vld [vmem:[%s6195_s9 + $0x278] sm:$0xff] }
 0x354   :  { %2364 = vmatpush.msra.mxu0 %v2215_v59  ;;  %2384 = vmatpush.msra.mxu1 %v2247_v62  ;;  %v2317_v62 = vld [vmem:[%s6195_s9 + $0x330] sm:$0xff] }
 0x355   :  { %2419 = vmatpush.msra.mxu3 %v2321_v4 }
 0x356   :  { %2429 = vmatpush.msrb.mxu0 %v2246_v42  ;;  %2449 = vmatpush.msrb.mxu1 %v2278_v7  ;;  %v2283_v42 = vld [vmem:[%s6195_s9 + $0x220] sm:$0xff]  ;;  %v2310_v7 = vld [vmem:[%s6195_s9 + $0x2f8] sm:$0xff] }
 0x357   :  { %2402 = vmatpush.msra.mxu2 %v2283_v42  ;;  %2420 = vmatpush.msra.mxu3 %v2319_v32 }
 0x358   :  { %2430 = vmatpush.msrb.mxu0 %v2244_v25  ;;  %2450 = vmatpush.msrb.mxu1 %v2276_v17  ;;  %v2258_v25 = vld [vmem:[%s6195_s9 + $0x158] sm:$0xff]  ;;  %v2308_v17 = vld [vmem:[%s6195_s9 + $0x2e8] sm:$0xff] }
 0x359   :  { %2403 = vmatpush.msra.mxu2 %v2281_v54  ;;  %2421 = vmatpush.msra.mxu3 %v2317_v62  ;;  %v2326_v62 = vld [vmem:[%s6195_s9 + $0x378] sm:$0xff] }
 0x35a   :  { %2431 = vmatpush.msrb.mxu0 %v2242_v6  ;;  %2451 = vmatpush.msrb.mxu1 %v2274_v21  ;;  %v2256_v6 = vld [vmem:[%s6195_s9 + $0x148] sm:$0xff]  ;;  %v2306_v21 = vld [vmem:[%s6195_s9 + $0x2d8] sm:$0xff] }
 0x35b   :  { %2404 = vmatpush.msra.mxu2 %v2279_v19  ;;  %2422 = vmatpush.msra.mxu3 %v2315_v13  ;;  %v2288_v19 = vld [vmem:[%s6195_s9 + $0x248] sm:$0xff] }
 0x35c   :  { %2432 = vmatpush.msrb.mxu0 %v2240_v10  ;;  %2452 = vmatpush.msrb.mxu1 %v2272_v26  ;;  %v2254_v10 = vld [vmem:[%s6195_s9 + $0x138] sm:$0xff] }
 0x35d   :  { %2469 = vmatpush.msrb.mxu2 %v2310_v7  ;;  %2423 = vmatpush.msra.mxu3 %v2313_v20  ;;  %v2324_v7 = vld [vmem:[%s6195_s9 + $0x368] sm:$0xff] }
 0x35e   :  { %2433 = vmatpush.msrb.mxu0 %v2238_v22  ;;  %2453 = vmatpush.msrb.mxu1 %v2270_v36  ;;  %v2304_v36 = vld [vmem:[%s6195_s9 + $0x2c8] sm:$0xff] }
 0x35f   :  { %2470 = vmatpush.msrb.mxu2 %v2308_v17  ;;  %2424 = vmatpush.msra.mxu3 %v2311_v45  ;;  %v2320_v17 = vld [vmem:[%s6195_s9 + $0x348] sm:$0xff]  ;;  %v2314_v45 = vld [vmem:[%s6195_s9 + $0x318] sm:$0xff] }
 0x360   :  { %2434 = vmatpush.msrb.mxu0 %v2236_v2  ;;  %2454 = vmatpush.msrb.mxu1 %v2268_v37  ;;  %v2250_v2 = vld [vmem:[%s6195_s9 + $0x118] sm:$0xff]  ;;  %v2300_v37 = vld [vmem:[%s6195_s9 + $0x2a8] sm:$0xff] }
 0x361   :  { %2471 = vmatpush.msrb.mxu2 %v2306_v21  ;;  %2489 = vmatpush.msrb.mxu3 %v2342_v33  ;;  %v2280_v20 = vld [vmem:[%s6195_s9 + $0x208] sm:$0xff]  ;;  %v1493_v33 = vadd.f32 %v5789_v35, %v5182_v9 }
 0x362   :  { %2435 = vmatpush.msrb.mxu0 %v2234_v11  ;;  %2455 = vmatpush.msrb.mxu1 %v2266_v44  ;;  %v2316_v21 = vld [vmem:[%s6195_s9 + $0x328] sm:$0xff] }
 0x363   :  { %2472 = vmatpush.msrb.mxu2 %v2304_v36  ;;  %2490 = vmatpush.msrb.mxu3 %v2340_v52  ;;  %v1513_v36 = vadd.f32 %v5791_v23, %v1493_v33 }
 0x364   :  { %2436 = vmatpush.msrb.mxu0 %v2232_v49  ;;  %2456 = vmatpush.msrb.mxu1 %v2264_v46  ;;  %v1245_v49 = vadd.f32 %v5108_v18, %v5116_v38  ;;  %v2338_v18 = vld [vmem:[%s6195_s9 + $0x3d8] sm:$0xff] }
 0x365   :  { %2491 = vmatpush.msrb.mxu3 %v2338_v18 }
 0x366   :  { %2437 = vmatpush.msrb.mxu0 %v2230_v27  ;;  %2457 = vmatpush.msrb.mxu1 %v2262_v0  ;;  %v1413_v24 = vadd.f32 %v5760_v3, %v1245_v49  ;;  %v2302_v27 = vld [vmem:[%s6195_s9 + $0x2b8] sm:$0xff]  ;;  %v5939_v3 = vld [vmem:[%s6194_s8] sm:$0xf]  ;;  %v2296_v0 = vld [vmem:[%s6195_s9 + $0x288] sm:$0xff] }
 0x367   :  { %2473 = vmatpush.msrb.mxu2 %v2302_v27  ;;  %2492 = vmatpush.msrb.mxu3 %v2336_v39  ;;  %v2200_v32 = vperm.slane %v5939_v3, 1 }
 0x368   :  { %2438 = vmatpush.msrb.mxu0 %v2228_v41  ;;  %2458 = vmatpush.msrb.mxu1 %v2260_v63  ;;  %v1433_v61 = vadd.f32 %v5762_v29, %v1413_v24  ;;  %v1453_v29 = vadd.f32 %v5776_v47, %v1285_v51  ;;  %v2332_v47 = vld [vmem:[%s6195_s9 + $0x3a8] sm:$0xff]  ;;  %v2330_v63 = vld [vmem:[%s6195_s9 + $0x398] sm:$0xff] }
 0x369   :  { %2474 = vmatpush.msrb.mxu2 %v2300_v37  ;;  %2493 = vmatpush.msrb.mxu3 %v2334_v58  ;;  %v1533_v37 = vadd.f32 %v5832_v55, %v5184_v28  ;;  %v2526_v28 = vld [vmem:[%s6197_s11 + $0x78] sm:$0xff]  ;;  %v2525_v55 = vld [vmem:[%s6197_s11 + $0x70] sm:$0xff] }
 0x36a   :  { %2439 = vmatpush.msrb.mxu0 %v2226_v40  ;;  %2459 = vmatpush.msrb.mxu1 %v2258_v25  ;;  %v2538_v58 = vld [vmem:[%s6197_s11 + $0xd8] sm:$0xff] }
 0x36b   :  { %v1729_v59 = vpop.f32.mrf.mxu0  ;;  %v1749_v60 = vpop.f32.mrf.mxu1  ;;  %2475 = vmatpush.msrb.mxu2 %v2298_v48  ;;  %2494 = vmatpush.msrb.mxu3 %v2332_v47  ;;  %v1553_v9 = vadd.f32 %v5834_v56, %v1533_v37  ;;  %v2542_v56 = vld [vmem:[%s6197_s11 + $0xf8] sm:$0xff]  ;;  %v2519_v47 = vld [vmem:[%s6197_s11 + $0x40] sm:$0xff] }
 0x36c   :  { %2440 = vmatpush.msrb.mxu0 %v2224_v8  ;;  %2460 = vmatpush.msrb.mxu1 %v2256_v6  ;;  %v1750_v38 = vadd.f32 %v1749_v60, %v1729_v59  ;;  %v2199_v8 = vperm.slane %v5939_v3, 0  ;;  %v1473_v59 = vadd.f32 %v5778_v34, %v1453_v29  ;;  %v2292_v60 = vld [vmem:[%s6195_s9 + $0x268] sm:$0xff]  ;;  %v2290_v34 = vld [vmem:[%s6195_s9 + $0x258] sm:$0xff]  ;;  %v2539_v29 = vld [vmem:[%s6197_s11 + $0xe0] sm:$0xff] }
 0x36d   :  { %2476 = vmatpush.msrb.mxu2 %v2296_v0  ;;  %2495 = vmatpush.msrb.mxu3 %v2330_v63  ;;  %v2522_v0 = vld [vmem:[%s6197_s11 + $0x58] sm:$0xff]  ;;  %v2536_v63 = vld [vmem:[%s6197_s11 + $0xc8] sm:$0xff] }
 0x36e   :  { %2441 = vmatpush.msrb.mxu0 %v2222_v30  ;;  %2461 = vmatpush.msrb.mxu1 %v2254_v10  ;;  %v1872_v14 = vadd.f32 %v1750_v38, %v1433_v61  ;;  %v2286_v10 = vld [vmem:[%s6195_s9 + $0x238] sm:$0xff]  ;;  %v2201_v38 = vperm.slane %v5939_v3, 2 }
 0x36f   :  { %2477 = vmatpush.msrb.mxu2 %v2294_v50  ;;  %v2520_v50 = vld [vmem:[%s6197_s11 + $0x48] sm:$0xff] }
 0x370   :  { %2442 = vmatpush.msrb.mxu0 %v2220_v5  ;;  %2462 = vmatpush.msrb.mxu1 %v2252_v15  ;;  %v2284_v15 = vld [vmem:[%s6195_s9 + $0x228] sm:$0xff] }
 0x371   :  { %2478 = vmatpush.msrb.mxu2 %v2292_v60  ;;  %v2516_v60 = vld [vmem:[%s6197_s11 + $0x28] sm:$0xff] }
 0x372   :  { %2443 = vmatpush.msrb.mxu0 %v2218_v12  ;;  %v1769_v16 = vpop.f32.mrf.mxu2  ;;  %v1789_v22 = vpop.f32.mrf.mxu3  ;;  %2463 = vmatpush.msrb.mxu1 %v2250_v2  ;;  %v2328_v12 = vld [vmem:[%s6195_s9 + $0x388] sm:$0xff]  ;;  %v2318_v2 = vld [vmem:[%s6195_s9 + $0x338] sm:$0xff] }
 0x373   :  { %v1790_v57 = vadd.f32 %v1789_v22, %v1769_v16  ;;  %2496 = vmatpush.msrb.mxu3 %v2328_v12  ;;  %2479 = vmatpush.msrb.mxu2 %v2290_v34  ;;  %v2322_v16 = vld [vmem:[%s6195_s9 + $0x358] sm:$0xff]  ;;  %v2512_v34 = vld [vmem:[%s6197_s11 + $0x8] sm:$0xff] }
 0x374   :  { %2444 = vmatpush.msrb.mxu0 %v2216_v1  ;;  %2464 = vmatpush.msrb.mxu1 %v2248_v43  ;;  %v2282_v22 = vld [vmem:[%s6195_s9 + $0x218] sm:$0xff]  ;;  %v2312_v43 = vld [vmem:[%s6195_s9 + $0x308] sm:$0xff] }
 0x375   :  { %v5908_v11 = vpop.f32.mrf.mxu0  ;;  %v5910_v26 = vpop.f32.mrf.mxu1  ;;  %v1873_v25 = vadd.f32 %v1790_v57, %v1473_v59  ;;  %2497 = vmatpush.msrb.mxu3 %v2326_v62  ;;  %2480 = vmatpush.msrb.mxu2 %v2288_v19  ;;  %v2537_v57 = vld [vmem:[%s6197_s11 + $0xd0] sm:$0xff]  ;;  %v2532_v12 = vld [vmem:[%s6197_s11 + $0xa8] sm:$0xff]  ;;  %v2531_v19 = vld [vmem:[%s6197_s11 + $0xa0] sm:$0xff] }
 0x376   :  { %v1830_v49 = vadd.f32 %v5910_v26, %v5908_v11  ;;  %v2517_v59 = vld [vmem:[%s6197_s11 + $0x30] sm:$0xff]  ;;  %v2530_v62 = vld [vmem:[%s6197_s11 + $0x98] sm:$0xff] }
 0x377   :  { %2498 = vmatpush.msrb.mxu3 %v2324_v7  ;;  %2481 = vmatpush.msrb.mxu2 %v2286_v10  ;;  %v2528_v10 = vld [vmem:[%s6197_s11 + $0x88] sm:$0xff]  ;;  %v2527_v7 = vld [vmem:[%s6197_s11 + $0x80] sm:$0xff] }
 0x378   :  { %v1874_v27 = vadd.f32 %v1830_v49, %v1513_v36  ;;  %v2596_v49 = vld [vmem:[%s6199_s13 + $0x40] sm:$0xff] }
 0x379   :  { %2499 = vmatpush.msrb.mxu3 %v2322_v16  ;;  %2482 = vmatpush.msrb.mxu2 %v2284_v15  ;;  %v2602_v15 = vld [vmem:[%s6199_s13 + $0x70] sm:$0xff]  ;;  %v2601_v16 = vld [vmem:[%s6199_s13 + $0x68] sm:$0xff] }
 0x37b   :  { %2500 = vmatpush.msrb.mxu3 %v2320_v17  ;;  %2483 = vmatpush.msrb.mxu2 %v2282_v22  ;;  %v2600_v22 = vld [vmem:[%s6199_s13 + $0x60] sm:$0xff]  ;;  %v2599_v17 = vld [vmem:[%s6199_s13 + $0x58] sm:$0xff] }
 0x37c   :  { %v5945_v41 = vpop.f32.mrf.mxu2  ;;  %v5947_v44 = vpop.f32.mrf.mxu3 }
 0x37d   :  { %2501 = vmatpush.msrb.mxu3 %v2318_v2  ;;  %2484 = vmatpush.msrb.mxu2 %v2280_v20  ;;  %v1870_v61 = vadd.f32 %v5947_v44, %v5945_v41  ;;  %v2541_v41 = vld [vmem:[%s6197_s11 + $0xf0] sm:$0xff]  ;;  %v2540_v44 = vld [vmem:[%s6197_s11 + $0xe8] sm:$0xff]  ;;  %v2343_v20 = vld [vmem:[%s6196_s10] sm:$0x3] }
 0x37e   :  { %v2598_v2 = vld [vmem:[%s6199_s13 + $0x50] sm:$0xff] }
 0x37f   :  { %2502 = vmatpush.msrb.mxu3 %v2316_v21  ;;  %v1875_v23 = vadd.f32 %v1870_v61, %v1553_v9 }
 0x381   :  { %2503 = vmatpush.msrb.mxu3 %v2314_v45  ;;  %v2345_v45 = vperm.slane %v2343_v20, 0 }
 0x383   :  { %2504 = vmatpush.msrb.mxu3 %v2312_v43  ;;  %v2597_v43 = vld [vmem:[%s6199_s13 + $0x48] sm:$0xff] }
 0x38f   :  { %v2050_v40 = vpop.f32.mrf.mxu0  ;;  %v2070_v46 = vpop.f32.mrf.mxu1 }
 0x390   :  { %v2071_v53 = vadd.f32 %v2070_v46, %v2050_v40  ;;  %v2202_v40 = vperm.slane %v5939_v3, 3  ;;  %v2524_v3 = vld [vmem:[%s6197_s11 + $0x68] sm:$0xff] }
 0x392   :  { %v2193_v31 = vadd.f32 %v2071_v53, %v1872_v14 }
 0x394   :  { %v2207_v30 = vadd.f32 %v2199_v8, %v2193_v31  ;;  %v2523_v8 = vld [vmem:[%s6197_s11 + $0x60] sm:$0xff]  ;;  %v2521_v31 = vld [vmem:[%s6197_s11 + $0x50] sm:$0xff] }
 0x396   :  { %v2211_v42 = vmax.f32 %v2207_v30, 0.0  ;;  %v2090_v4 = vpop.f32.mrf.mxu2  ;;  %v2110_v5 = vpop.f32.mrf.mxu3  ;;  %v2518_v30 = vld [vmem:[%s6197_s11 + $0x38] sm:$0xff] }
 0x397   :  { %v2111_v54 = vadd.f32 %v2110_v5, %v2090_v4  ;;  %v2535_v4 = vld [vmem:[%s6197_s11 + $0xc0] sm:$0xff]  ;;  %v2514_v5 = vld [vmem:[%s6197_s11 + $0x18] sm:$0xff] }
 0x398   :  { %2365 = vmatmul.f32.vlgmr.msra.gmra.mxu0 %v2211_v42 }
 0x399   :  { %v2194_v6 = vadd.f32 %v2111_v54, %v1873_v25  ;;  %2547 = vmatpush.msra.mxu0 %v2526_v28  ;;  %v2534_v25 = vld [vmem:[%s6197_s11 + $0xb8] sm:$0xff]  ;;  %v2513_v54 = vld [vmem:[%s6197_s11 + $0x10] sm:$0xff]  ;;  %v2592_v28 = vld [vmem:[%s6199_s13 + $0x20] sm:$0xff] }
 0x39b   :  { %v2208_v1 = vadd.f32 %v2200_v32, %v2194_v6  ;;  %2548 = vmatpush.msra.mxu0 %v2525_v55  ;;  %v2533_v32 = vld [vmem:[%s6197_s11 + $0xb0] sm:$0xff]  ;;  %v2511_v6 = vld [vmem:[%s6197_s11] sm:$0xff]  ;;  %v2591_v55 = vld [vmem:[%s6199_s13 + $0x18] sm:$0xff] }
 0x39d   :  { %v2212_v13 = vmax.f32 %v2208_v1, 0.0  ;;  %2549 = vmatpush.msra.mxu0 %v2524_v3  ;;  %v2529_v1 = vld [vmem:[%s6197_s11 + $0x90] sm:$0xff]  ;;  %v2589_v3 = vld [vmem:[%s6199_s13 + $0x8] sm:$0xff] }
 0x39f   :  { %2385 = vmatmul.f32.vlgmr.msra.gmra.mxu1 %v2212_v13  ;;  %2550 = vmatpush.msra.mxu0 %v2523_v8 }
 0x3a0   :  { %2445 = vmatmul.f32.vlgmr.msrb.gmra.mxu0 %v2211_v42  ;;  %2567 = vmatpush.msra.mxu1 %v2542_v56  ;;  %v2515_v42 = vld [vmem:[%s6197_s11 + $0x20] sm:$0xff]  ;;  %v2590_v56 = vld [vmem:[%s6199_s13 + $0x10] sm:$0xff] }
 0x3a1   :  { %2551 = vmatpush.msra.mxu0 %v2522_v0 }
 0x3a2   :  { %2568 = vmatpush.msra.mxu1 %v2541_v41  ;;  %v2588_v41 = vld [vmem:[%s6199_s13] sm:$0xff] }
 0x3a3   :  { %2552 = vmatpush.msra.mxu0 %v2521_v31 }
 0x3a4   :  { %2569 = vmatpush.msra.mxu1 %v2540_v44  ;;  %v3182_v44 = vld [vmem:[%s6198_s12] ss:$0 sm:$0xff] }
 0x3a5   :  { %2553 = vmatpush.msra.mxu0 %v2520_v50 }
 0x3a6   :  { %2570 = vmatpush.msra.mxu1 %v2539_v29 }
 0x3a7   :  { %2465 = vmatmul.f32.vlgmr.msrb.gmra.mxu1 %v2212_v13  ;;  %2554 = vmatpush.msra.mxu0 %v2519_v47  ;;  %v2603_v13 = vld [vmem:[%s6199_s13 + $0x78] sm:$0xff] }
 0x3a8   :  { %2571 = vmatpush.msra.mxu1 %v2538_v58 }
 0x3a9   :  { %2555 = vmatpush.msra.mxu0 %v2518_v30 }
 0x3aa   :  { %2572 = vmatpush.msra.mxu1 %v2537_v57  ;;  %v3183_v57 = vld [vmem:[#allocation3] ss:$0 sm:$0xff] }
 0x3ab   :  { %2556 = vmatpush.msra.mxu0 %v2517_v59 }
 0x3ac   :  { %2573 = vmatpush.msra.mxu1 %v2536_v63 }
 0x3ad   :  { %2557 = vmatpush.msra.mxu0 %v2516_v60 }
 0x3ae   :  { %2574 = vmatpush.msra.mxu1 %v2535_v4 }
 0x3af   :  { %2558 = vmatpush.msra.mxu0 %v2515_v42 }
 0x3b0   :  { %2575 = vmatpush.msra.mxu1 %v2534_v25 }
 0x3b1   :  { %v2130_v52 = vpop.f32.mrf.mxu0  ;;  %v2150_v24 = vpop.f32.mrf.mxu1  ;;  %2559 = vmatpush.msra.mxu0 %v2514_v5 }
 0x3b2   :  { %v2151_v18 = vadd.f32 %v2150_v24, %v2130_v52  ;;  %2576 = vmatpush.msra.mxu1 %v2533_v32  ;;  %v2595_v24 = vld [vmem:[%s6199_s13 + $0x38] sm:$0xff] }
 0x3b3   :  { %2560 = vmatpush.msra.mxu0 %v2513_v54 }
 0x3b4   :  { %v2195_v39 = vadd.f32 %v2151_v18, %v1874_v27  ;;  %2577 = vmatpush.msra.mxu1 %v2532_v12  ;;  %v2346_v18 = vperm.slane %v2343_v20, 1 }
 0x3b5   :  { %2561 = vmatpush.msra.mxu0 %v2512_v34 }
 0x3b6   :  { %v2209_v48 = vadd.f32 %v2201_v38, %v2195_v39  ;;  %2578 = vmatpush.msra.mxu1 %v2531_v19 }
 0x3b7   :  { %2562 = vmatpush.msra.mxu0 %v2511_v6 }
 0x3b8   :  { %v2213_v35 = vmax.f32 %v2209_v48, 0.0  ;;  %v2170_v11 = vpop.f32.mrf.mxu2  ;;  %v2190_v26 = vpop.f32.mrf.mxu3  ;;  %2579 = vmatpush.msra.mxu1 %v2530_v62 }
 0x3b9   :  { %v2191_v51 = vadd.f32 %v2190_v26, %v2170_v11 }
 0x3ba   :  { %2405 = vmatmul.f32.vlgmr.msra.gmra.mxu2 %v2213_v35  ;;  %2580 = vmatpush.msra.mxu1 %v2529_v1 }
 0x3bb   :  { %v2196_v46 = vadd.f32 %v2191_v51, %v1875_v23  ;;  %2608 = vmatpush.msra.mxu2 %v2603_v13 }
 0x3bc   :  { %2581 = vmatpush.msra.mxu1 %v2528_v10 }
 0x3bd   :  { %v2210_v14 = vadd.f32 %v2202_v40, %v2196_v46  ;;  %2609 = vmatpush.msra.mxu2 %v2602_v15 }
 0x3be   :  { %2582 = vmatpush.msra.mxu1 %v2527_v7 }
 0x3bf   :  { %v2214_v53 = vmax.f32 %v2210_v14, 0.0  ;;  %2610 = vmatpush.msra.mxu2 %v2601_v16  ;;  %v2594_v14 = vld [vmem:[%s6199_s13 + $0x30] sm:$0xff] }
 0x3c1   :  { %2425 = vmatmul.f32.vlgmr.msra.gmra.mxu3 %v2214_v53  ;;  %2611 = vmatpush.msra.mxu2 %v2600_v22 }
 0x3c2   :  { %2485 = vmatmul.f32.vlgmr.msrb.gmra.mxu2 %v2213_v35 }
 0x3c3   :  { %2612 = vmatpush.msra.mxu2 %v2599_v17 }
 0x3c5   :  { %2613 = vmatpush.msra.mxu2 %v2598_v2 }
 0x3c7   :  { %2614 = vmatpush.msra.mxu2 %v2597_v43 }
 0x3c9   :  { %2505 = vmatmul.f32.vlgmr.msrb.gmra.mxu3 %v2214_v53  ;;  %2615 = vmatpush.msra.mxu2 %v2596_v49  ;;  %v2593_v53 = vld [vmem:[%s6199_s13 + $0x28] sm:$0xff] }
 0x3cb   :  { %2616 = vmatpush.msra.mxu2 %v2595_v24 }
 0x3cd   :  { %2617 = vmatpush.msra.mxu2 %v2594_v14 }
 0x3cf   :  { %2618 = vmatpush.msra.mxu2 %v2593_v53 }
 0x3d1   :  { %2619 = vmatpush.msra.mxu2 %v2592_v28 }
 0x3d3   :  { %2620 = vmatpush.msra.mxu2 %v2591_v55 }
 0x3d5   :  { %2621 = vmatpush.msra.mxu2 %v2590_v56 }
 0x3d7   :  { %2622 = vmatpush.msra.mxu2 %v2589_v3 }
 0x3d9   :  { %2623 = vmatpush.msra.mxu2 %v2588_v41 }
 0x415   :  { %v2366_v21 = vpop.f32.mrf.mxu0 }
 0x416   :  { %v2367_v52 = vadd.f32 %v2366_v21, %v2345_v45 }
 0x41c   :  { %v2386_v33 = vpop.f32.mrf.mxu1 }
 0x41d   :  { %v2387_v27 = vadd.f32 %v2386_v33, %v2367_v52  ;;  %v2446_v37 = vpop.f32.mrf.mxu0 }
 0x41e   :  { %v2447_v9 = vadd.f32 %v2446_v37, %v2346_v18 }
 0x424   :  { %v2466_v48 = vpop.f32.mrf.mxu1 }
 0x425   :  { %v2467_v26 = vadd.f32 %v2466_v48, %v2447_v9 }
 0x43d   :  { %v2406_v36 = vpop.f32.mrf.mxu2 }
 0x43e   :  { %v2407_v38 = vadd.f32 %v2406_v36, %v2387_v27 }
 0x444   :  { %v2426_v39 = vpop.f32.mrf.mxu3 }
 0x445   :  { %v2427_v61 = vadd.f32 %v2426_v39, %v2407_v38  ;;  %v2486_v11 = vpop.f32.mrf.mxu2 }
 0x446   :  { %v2487_v23 = vadd.f32 %v2486_v11, %v2467_v26 }
 0x447   :  { %v2509_v35 = vmax.f32 %v2427_v61, 0.0 }
 0x449   :  { %2563 = vmatmul.f32.vlgmr.msra.gmra.mxu0 %v2509_v35 }
 0x44c   :  { %v2506_v51 = vpop.f32.mrf.mxu3 }
 0x44d   :  { %v2507_v40 = vadd.f32 %v2506_v51, %v2487_v23 }
 0x44f   :  { %v2510_v46 = vmax.f32 %v2507_v40, 0.0 }
 0x451   :  { %2583 = vmatmul.f32.vlgmr.msra.gmra.mxu1 %v2510_v46 }
 0x4c6   :  { %v2564_v8 = vpop.f32.mrf.mxu0 }
 0x4c7   :  { %v2565_v29 = vadd.f32 %v3182_v44, %v2564_v8 }
 0x4ce   :  { %v2584_v0 = vpop.f32.mrf.mxu1 }
 0x4cf   :  { %v2585_v58 = vadd.f32 %v2584_v0, %v2565_v29 }
 0x4d1   :  { %v2587_v31 = vmax.f32 %v2585_v58, 0.0 }
 0x4d3   :  { %2624 = vmatmul.f32.vlgmr.msra.gmra.mxu2 %v2587_v31 }
 0x556   :  { %v2625_v50 = vpop.f32.mrf.mxu2 }
 0x557   :  { %v2626_v47 = vadd.f32 %v3183_v57, %v2625_v50 }
 0x559   :  { %v2628_v30 = vmax.f32 %v2626_v47, 0.0 }
 0x55b   :  { %2630 = vst.msk [vmem:[%s6201_s15] sm:$0x3] %vm2629_vm7, %v2628_v30 }
 0x55c   :  { %2635 = vsyncpa [#allocation5], 1 }
 0x55d   :  { %2636 = vsyncpa [#allocation7], 1 }
 0x55e   :  { %2637 = vsyncpa [#allocation10], 1 }
 0x55f   :  { %2638 = vsyncpa [#allocation13], 1 }

</bundles_post_ra>
